<compile_context>
chip_gen: v5e
topology: v5e:2x2
jax: 0.10.0
libtpu: 0.0.40
codegen_flags: <defaults>
</compile_context>

<pallas_src>
import functools

import jax
import jax.numpy as jnp
import numpy as np
from jax.experimental import pallas as pl
from jax.experimental.pallas import tpu as pltpu


def _round_up(n, m):
    return ((n + m - 1) // m) * m


def _pad2(a, shape):
    out = jnp.zeros(shape, a.dtype)
    return out.at[: a.shape[0], : a.shape[1]].set(a)


# ---------------------------------------------------------------------------
# Single-invocation kernel: px prologue + seq_len RK4(3/8) steps + fc readout.
# ---------------------------------------------------------------------------
def _ltc_rk4_kernel(x_ref, w_in_t_ref, w_rg_ref, inv_tau_ref, gamma_ref,
                    beta_ref, mask_ref, w_fc_t_ref, b_fc_ref,
                    y_ref, h_ref, px_sc, *, seq_len, real_h):
    Bp, Hp = h_ref.shape

    # ---- Prologue: hoisted input projection for ALL timesteps (one matmul). ----
    # px_sc[t*Bp:(t+1)*Bp, :] == x[t] @ W_in^T   (f32; K = I is tiny, done once)
    px_sc[...] = jnp.dot(x_ref[...], w_in_t_ref[...],
                         preferred_element_type=jnp.float32)

    # ---- Loop-invariant operands: load once, reuse across all steps/stages. ----
    w_rg = w_rg_ref[...]           # (Hp, 2*Hp) = [W_rec^T | W_gate^T], bf16 MXU dtype
    inv_tau = inv_tau_ref[...]     # (1, Hp); padded lanes are exactly 0
    gamma = gamma_ref[...]         # (1, Hp); padded lanes 0
    beta = beta_ref[...]           # (1, Hp); padded lanes 0
    mask = mask_ref[...]           # (1, Hp); 1.0 on the real_h lanes
    inv_n = 1.0 / float(real_h)

    def deriv(px, h):
        # Single merged MXU contraction for recurrent + gate paths (f32 accum).
        z = jnp.dot(h.astype(w_rg.dtype), w_rg,
                    preferred_element_type=jnp.float32)            # (Bp, 2*Hp)
        pre = px + z[:, :Hp]
        gate = jax.nn.sigmoid(z[:, Hp:])
        # Padded lanes of dh are exactly 0 (inv_tau pad == 0): no extra mask here.
        dh = (gate * jnp.tanh(pre) - h) * inv_tau
        # LayerNorm over the REAL hidden width (mask only where pads would leak).
        mu = jnp.sum(dh, axis=-1, keepdims=True) * inv_n
        diff = (dh - mu) * mask
        var = jnp.sum(diff * diff, axis=-1, keepdims=True) * inv_n
        return diff * jax.lax.rsqrt(var + 1e-5) * gamma + beta

    def px_at(t):
        start = pl.multiple_of(t * Bp, 8)
        return px_sc[pl.ds(start, Bp), :]

    # torchdiffeq 'rk4' == 3/8-rule step (rk4_alt_step_func), dt = 1:
    #   k1@t, k2@t+1/3, k3@t+2/3 all sample x[t]; k4@t+1 samples x[min(t+1, S-1)].
    def step(t, h):
        px_t = px_at(t)
        px_t1 = px_at(jnp.minimum(t + 1, seq_len - 1))
        k1 = deriv(px_t, h)
        k2 = deriv(px_t, h + k1 * (1.0 / 3.0))
        k3 = deriv(px_t, h + (k2 - k1 * (1.0 / 3.0)))
        k4 = deriv(px_t1, h + (k1 - k2 + k3))
        return h + (k1 + 3.0 * (k2 + k3) + k4) * 0.125

    h = jax.lax.fori_loop(0, seq_len, step,
                          jnp.zeros((Bp, Hp), jnp.float32),
                          unroll=bool(seq_len <= 32))

    h_ref[...] = h
    y_ref[...] = (jnp.dot(h.astype(w_fc_t_ref.dtype), w_fc_t_ref[...],
                          preferred_element_type=jnp.float32) + b_fc_ref[...])


@functools.partial(jax.jit, static_argnames=("mxu_dtype",))
def mainmodel_forward(x, params, mxu_dtype=jnp.bfloat16):
    """Replicates MAINMODEL.forward(x, t_span=None): seq_len RK4(3/8) steps of dt=1."""
    B, S, I = x.shape
    H = params["w_rec"].shape[0]
    O = params["w_fc"].shape[0]

    Bp = _round_up(B, 8)
    Hp = _round_up(H, 128)
    Op = _round_up(O, 128)

    f32 = jnp.float32
    # One-time parameter prep: transpose to (in, out), zero-pad, fold exp(-log_tau).
    w_in_t = _pad2(params["w_in"].T.astype(f32), (I, Hp))          # f32: tiny K, one use
    w_rg = jnp.concatenate(
        [_pad2(params["w_rec"].T.astype(f32), (Hp, Hp)),
         _pad2(params["w_gate"].T.astype(f32), (Hp, Hp))], axis=1).astype(mxu_dtype)
    inv_tau = _pad2(jnp.exp(-params["log_tau"]).astype(f32), (1, Hp))
    gamma = _pad2(params["ln_gamma"].astype(f32), (1, Hp))
    beta = _pad2(params["ln_beta"].astype(f32), (1, Hp))
    mask = (jax.lax.broadcasted_iota(jnp.int32, (1, Hp), 1) < H).astype(f32)
    w_fc_t = _pad2(params["w_fc"].T.astype(f32), (Hp, Op)).astype(mxu_dtype)
    b_fc = _pad2(params["b_fc"].astype(f32), (1, Op))

    # x -> (S*Bp, I): time-major, zero-padded batch rows (sliced away below).
    x_p = jnp.zeros((S, Bp, I), f32).at[:, :B, :].set(
        jnp.transpose(x.astype(f32), (1, 0, 2))).reshape(S * Bp, I)

    kernel = functools.partial(_ltc_rk4_kernel, seq_len=S, real_h=H)
    vmem_spec = pl.BlockSpec(memory_space=pltpu.MemorySpace.VMEM)
    inputs = (x_p, w_in_t, w_rg, inv_tau, gamma, beta, mask, w_fc_t, b_fc)

    # Explicit VMEM budget: everything is resident for the whole kernel.
    vmem_bytes = (sum(a.size * a.dtype.itemsize for a in inputs)
                  + (Bp * Op + Bp * Hp) * 4          # outputs
                  + S * Bp * Hp * 4)                 # px scratch
    vmem_limit = int(min(64 * 2 ** 20, max(4 * 2 ** 20, 2 * vmem_bytes)))

    y_p, h_p = pl.pallas_call(
        kernel,
        out_shape=(jax.ShapeDtypeStruct((Bp, Op), f32),
                   jax.ShapeDtypeStruct((Bp, Hp), f32)),
        in_specs=[vmem_spec] * len(inputs),
        out_specs=(vmem_spec, vmem_spec),
        scratch_shapes=[pltpu.VMEM((S * Bp, Hp), f32)],
        compiler_params=pltpu.CompilerParams(vmem_limit_bytes=vmem_limit),
    )(*inputs)

    return y_p[:B, :O], h_p[:B, :H]


# --------------------------- pure-JAX reference ----------------------------
def _reference_forward(x, params):
    B, S, I = x.shape
    H = params["w_rec"].shape[0]
    h = jnp.zeros((B, H), jnp.float32)
    inv_tau = jnp.exp(-params["log_tau"])

    def deriv(h, xt):
        pre = xt @ params["w_in"].T + h @ params["w_rec"].T
        gate = jax.nn.sigmoid(h @ params["w_gate"].T)
        dh = (gate * jnp.tanh(pre) - h) * inv_tau
        mu = jnp.mean(dh, axis=-1, keepdims=True)
        var = jnp.mean(jnp.square(dh - mu), axis=-1, keepdims=True)
        return ((dh - mu) * jax.lax.rsqrt(var + 1e-5)
                * params["ln_gamma"] + params["ln_beta"])

    for i in range(S):
        xt = x[:, i, :]
        xt1 = x[:, min(i + 1, S - 1), :]
        k1 = deriv(h, xt)
        k2 = deriv(h + k1 / 3.0, xt)
        k3 = deriv(h + (k2 - k1 / 3.0), xt)
        k4 = deriv(h + (k1 - k2 + k3), xt1)
        h = h + (k1 + 3.0 * (k2 + k3) + k4) * 0.125
    y = h @ params["w_fc"].T + params["b_fc"]
    return y, h


def init_params(key, input_size, hidden_size, output_size):
    ks = jax.random.split(key, 6)

    def _uniform(k, shape, fan_in):
        bound = 1.0 / jnp.sqrt(fan_in)
        return jax.random.uniform(k, shape, jnp.float32, -bound, bound)

    return {
        "log_tau": jax.random.normal(ks[0], (1, hidden_size), jnp.float32),
        "w_in":    _uniform(ks[1], (hidden_size, input_size), input_size),
        "w_rec":   _uniform(ks[2], (hidden_size, hidden_size), hidden_size),
        "w_gate":  _uniform(ks[3], (hidden_size, hidden_size), hidden_size),
        "ln_gamma": jnp.ones((1, hidden_size), jnp.float32),
        "ln_beta":  jnp.zeros((1, hidden_size), jnp.float32),
        "w_fc":    _uniform(ks[4], (output_size, hidden_size), hidden_size),
        "b_fc":    _uniform(ks[5], (1, output_size), hidden_size),
    }


if __name__ == "__main__":
    # hidden must be a multiple of 64 (module's BLOCK_SIZE assert)
    B, S, I, H, O = 2, 8, 8, 64, 4

    root = jax.random.PRNGKey(0)
    k_params, k_x = jax.random.split(root)
    params = init_params(k_params, I, H, O)
    x = jax.random.normal(k_x, (B, S, I), jnp.float32)

    y, h_final = mainmodel_forward(x, params)
    jax.block_until_ready((y, h_final))
    assert y.shape == (B, O) and h_final.shape == (B, H)

    y_ref, h_ref = _reference_forward(x, params)
    # MXU weight operands run in bf16 (native MXU dtype, per perf review); compare
    # against the f32 XLA reference with a correspondingly relaxed tolerance
    # (error grows slowly with S/H through the serial recurrence).
    np.testing.assert_allclose(np.asarray(y), np.asarray(y_ref), rtol=2e-2, atol=5e-2)
    np.testing.assert_allclose(np.asarray(h_final), np.asarray(h_ref), rtol=2e-2, atol=5e-2)

    print("KERNEL_OK")
</pallas_src>

<mosaic_0001>
module attributes {stable_mosaic.version = 11 : i64} {
  func.func @_ltc_rk4_kernel(%arg0: memref<64x8xf32, #tpu.memory_space<vmem>>, %arg1: memref<8x128xf32, #tpu.memory_space<vmem>>, %arg2: memref<128x256xbf16, #tpu.memory_space<vmem>>, %arg3: memref<1x128xf32, #tpu.memory_space<vmem>>, %arg4: memref<1x128xf32, #tpu.memory_space<vmem>>, %arg5: memref<1x128xf32, #tpu.memory_space<vmem>>, %arg6: memref<1x128xf32, #tpu.memory_space<vmem>>, %arg7: memref<128x128xbf16, #tpu.memory_space<vmem>>, %arg8: memref<1x128xf32, #tpu.memory_space<vmem>>, %arg9: memref<8x128xf32, #tpu.memory_space<vmem>>, %arg10: memref<8x128xf32, #tpu.memory_space<vmem>>, %arg11: memref<64x128xf32, #tpu.memory_space<vmem>>) attributes {dimension_semantics = [], scalar_prefetch = 0 : i64, scratch_operands = 1 : i64, tpu.core_type = #tpu.core_type<tc>} {
    %c0 = arith.constant 0 : index
    %c0_0 = arith.constant 0 : index
    %0 = vector.load %arg0[%c0, %c0_0] : memref<64x8xf32, #tpu.memory_space<vmem>>, vector<64x8xf32>
    %c0_1 = arith.constant 0 : index
    %c0_2 = arith.constant 0 : index
    %1 = vector.load %arg1[%c0_1, %c0_2] : memref<8x128xf32, #tpu.memory_space<vmem>>, vector<8x128xf32>
    %cst = arith.constant dense<0.000000e+00> : vector<64x128xf32>
    %2 = tpu.matmul %0, %1, %cst {dimension_numbers = #tpu.dot_dimension_numbers<[1], [0], [0], [1], [0, 0, 1, 1], [], []>} : vector<64x8xf32>, vector<8x128xf32>, vector<64x128xf32> -> vector<64x128xf32>
    %c0_3 = arith.constant 0 : index
    %c0_4 = arith.constant 0 : index
    %3 = vector.load %arg11[%c0_3, %c0_4] : memref<64x128xf32, #tpu.memory_space<vmem>>, vector<64x128xf32>
    tpu.vector_store %arg11[%c0_3, %c0_4], %2 {strides = array<i32>} : memref<64x128xf32, #tpu.memory_space<vmem>>, vector<64x128xf32>,
    %c0_5 = arith.constant 0 : index
    %c0_6 = arith.constant 0 : index
    %4 = vector.load %arg2[%c0_5, %c0_6] : memref<128x256xbf16, #tpu.memory_space<vmem>>, vector<128x256xbf16>
    %c0_7 = arith.constant 0 : index
    %c0_8 = arith.constant 0 : index
    %5 = vector.load %arg3[%c0_7, %c0_8] : memref<1x128xf32, #tpu.memory_space<vmem>>, vector<1x128xf32>
    %c0_9 = arith.constant 0 : index
    %c0_10 = arith.constant 0 : index
    %6 = vector.load %arg4[%c0_9, %c0_10] : memref<1x128xf32, #tpu.memory_space<vmem>>, vector<1x128xf32>
    %c0_11 = arith.constant 0 : index
    %c0_12 = arith.constant 0 : index
    %7 = vector.load %arg5[%c0_11, %c0_12] : memref<1x128xf32, #tpu.memory_space<vmem>>, vector<1x128xf32>
    %c0_13 = arith.constant 0 : index
    %c0_14 = arith.constant 0 : index
    %8 = vector.load %arg6[%c0_13, %c0_14] : memref<1x128xf32, #tpu.memory_space<vmem>>, vector<1x128xf32>
    %cst_15 = arith.constant 0.000000e+00 : f32
    %9 = vector.broadcast %cst_15 : f32 to vector<8x128xf32>
    %c0_i32 = arith.constant 0 : i32
    %c8_i32 = arith.constant 8 : i32
    %10 = arith.muli %c0_i32, %c8_i32 : i32
    %11 = tpu.assume_multiple %10, 8 : i32
    %12 = arith.index_cast %11 : i32 to index
    %c0_16 = arith.constant 0 : index
    %13 = vector.load %arg11[%12, %c0_16] : memref<64x128xf32, #tpu.memory_space<vmem>>, vector<8x128xf32>
    %c1_i32 = arith.constant 1 : i32
    %14 = arith.addi %c0_i32, %c1_i32 : i32
    %c7_i32 = arith.constant 7 : i32
    %15 = arith.minsi %14, %c7_i32 : i32
    %c8_i32_17 = arith.constant 8 : i32
    %16 = arith.muli %15, %c8_i32_17 : i32
    %17 = tpu.assume_multiple %16, 8 : i32
    %18 = arith.index_cast %17 : i32 to index
    %c0_18 = arith.constant 0 : index
    %19 = vector.load %arg11[%18, %c0_18] : memref<64x128xf32, #tpu.memory_space<vmem>>, vector<8x128xf32>
    %20 = arith.truncf %9 : vector<8x128xf32> to vector<8x128xbf16>
    %cst_19 = arith.constant dense<0.000000e+00> : vector<8x256xf32>
    %21 = tpu.matmul %20, %4, %cst_19 {dimension_numbers = #tpu.dot_dimension_numbers<[1], [0], [0], [1], [0, 0, 1, 1], [], []>} : vector<8x128xbf16>, vector<128x256xbf16>, vector<8x256xf32> -> vector<8x256xf32>
    %22 = vector.extract_strided_slice %21 {offsets = [0, 0], sizes = [8, 128], strides = [1, 1]} : vector<8x256xf32> to vector<8x128xf32>
    %23 = arith.addf %13, %22 : vector<8x128xf32>
    %24 = vector.extract_strided_slice %21 {offsets = [0, 128], sizes = [8, 128], strides = [1, 1]} : vector<8x256xf32> to vector<8x128xf32>
    %25 = arith.negf %24 : vector<8x128xf32>
    %26 = math.exp %25 : vector<8x128xf32>
    %cst_20 = arith.constant 1.000000e+00 : f32
    %27 = vector.broadcast %cst_20 : f32 to vector<8x128xf32>
    %28 = arith.addf %27, %26 : vector<8x128xf32>
    %29 = arith.divf %27, %28 : vector<8x128xf32>
    %30 = math.tanh %23 : vector<8x128xf32>
    %31 = arith.mulf %29, %30 : vector<8x128xf32>
    %32 = arith.subf %31, %9 : vector<8x128xf32>
    %33 = vector.broadcast %5 : vector<1x128xf32> to vector<8x128xf32>
    %34 = arith.mulf %32, %33 : vector<8x128xf32>
    %cst_21 = arith.constant dense<0.000000e+00> : vector<8xf32>
    %35 = vector.multi_reduction <add>, %34, %cst_21 [1] : vector<8x128xf32> to vector<8xf32>
    %36 = vector.shape_cast %35 : vector<8xf32> to vector<8x1xf32>
    %cst_22 = arith.constant 1.562500e-02 : f32
    %37 = vector.broadcast %cst_22 : f32 to vector<8x1xf32>
    %38 = arith.mulf %36, %37 : vector<8x1xf32>
    %39 = vector.broadcast %38 : vector<8x1xf32> to vector<8x128xf32>
    %40 = arith.subf %34, %39 : vector<8x128xf32>
    %41 = vector.broadcast %8 : vector<1x128xf32> to vector<8x128xf32>
    %42 = arith.mulf %40, %41 : vector<8x128xf32>
    %43 = arith.mulf %42, %42 : vector<8x128xf32>
    %cst_23 = arith.constant dense<0.000000e+00> : vector<8xf32>
    %44 = vector.multi_reduction <add>, %43, %cst_23 [1] : vector<8x128xf32> to vector<8xf32>
    %45 = vector.shape_cast %44 : vector<8xf32> to vector<8x1xf32>
    %cst_24 = arith.constant 1.562500e-02 : f32
    %46 = vector.broadcast %cst_24 : f32 to vector<8x1xf32>
    %47 = arith.mulf %45, %46 : vector<8x1xf32>
    %cst_25 = arith.constant 9.99999974E-6 : f32
    %48 = vector.broadcast %cst_25 : f32 to vector<8x1xf32>
    %49 = arith.addf %47, %48 : vector<8x1xf32>
    %50 = math.rsqrt %49 : vector<8x1xf32>
    %51 = vector.broadcast %50 : vector<8x1xf32> to vector<8x128xf32>
    %52 = arith.mulf %42, %51 : vector<8x128xf32>
    %53 = vector.broadcast %6 : vector<1x128xf32> to vector<8x128xf32>
    %54 = arith.mulf %52, %53 : vector<8x128xf32>
    %55 = vector.broadcast %7 : vector<1x128xf32> to vector<8x128xf32>
    %56 = arith.addf %54, %55 : vector<8x128xf32>
    %cst_26 = arith.constant 0.333333343 : f32
    %57 = vector.broadcast %cst_26 : f32 to vector<8x128xf32>
    %58 = arith.mulf %56, %57 : vector<8x128xf32>
    %59 = arith.addf %9, %58 : vector<8x128xf32>
    %60 = arith.truncf %59 : vector<8x128xf32> to vector<8x128xbf16>
    %cst_27 = arith.constant dense<0.000000e+00> : vector<8x256xf32>
    %61 = tpu.matmul %60, %4, %cst_27 {dimension_numbers = #tpu.dot_dimension_numbers<[1], [0], [0], [1], [0, 0, 1, 1], [], []>} : vector<8x128xbf16>, vector<128x256xbf16>, vector<8x256xf32> -> vector<8x256xf32>
    %62 = vector.extract_strided_slice %61 {offsets = [0, 0], sizes = [8, 128], strides = [1, 1]} : vector<8x256xf32> to vector<8x128xf32>
    %63 = arith.addf %13, %62 : vector<8x128xf32>
    %64 = vector.extract_strided_slice %61 {offsets = [0, 128], sizes = [8, 128], strides = [1, 1]} : vector<8x256xf32> to vector<8x128xf32>
    %65 = arith.negf %64 : vector<8x128xf32>
    %66 = math.exp %65 : vector<8x128xf32>
    %cst_28 = arith.constant 1.000000e+00 : f32
    %67 = vector.broadcast %cst_28 : f32 to vector<8x128xf32>
    %68 = arith.addf %67, %66 : vector<8x128xf32>
    %69 = arith.divf %67, %68 : vector<8x128xf32>
    %70 = math.tanh %63 : vector<8x128xf32>
    %71 = arith.mulf %69, %70 : vector<8x128xf32>
    %72 = arith.subf %71, %59 : vector<8x128xf32>
    %73 = vector.broadcast %5 : vector<1x128xf32> to vector<8x128xf32>
    %74 = arith.mulf %72, %73 : vector<8x128xf32>
    %cst_29 = arith.constant dense<0.000000e+00> : vector<8xf32>
    %75 = vector.multi_reduction <add>, %74, %cst_29 [1] : vector<8x128xf32> to vector<8xf32>
    %76 = vector.shape_cast %75 : vector<8xf32> to vector<8x1xf32>
    %cst_30 = arith.constant 1.562500e-02 : f32
    %77 = vector.broadcast %cst_30 : f32 to vector<8x1xf32>
    %78 = arith.mulf %76, %77 : vector<8x1xf32>
    %79 = vector.broadcast %78 : vector<8x1xf32> to vector<8x128xf32>
    %80 = arith.subf %74, %79 : vector<8x128xf32>
    %81 = vector.broadcast %8 : vector<1x128xf32> to vector<8x128xf32>
    %82 = arith.mulf %80, %81 : vector<8x128xf32>
    %83 = arith.mulf %82, %82 : vector<8x128xf32>
    %cst_31 = arith.constant dense<0.000000e+00> : vector<8xf32>
    %84 = vector.multi_reduction <add>, %83, %cst_31 [1] : vector<8x128xf32> to vector<8xf32>
    %85 = vector.shape_cast %84 : vector<8xf32> to vector<8x1xf32>
    %cst_32 = arith.constant 1.562500e-02 : f32
    %86 = vector.broadcast %cst_32 : f32 to vector<8x1xf32>
    %87 = arith.mulf %85, %86 : vector<8x1xf32>
    %cst_33 = arith.constant 9.99999974E-6 : f32
    %88 = vector.broadcast %cst_33 : f32 to vector<8x1xf32>
    %89 = arith.addf %87, %88 : vector<8x1xf32>
    %90 = math.rsqrt %89 : vector<8x1xf32>
    %91 = vector.broadcast %90 : vector<8x1xf32> to vector<8x128xf32>
    %92 = arith.mulf %82, %91 : vector<8x128xf32>
    %93 = vector.broadcast %6 : vector<1x128xf32> to vector<8x128xf32>
    %94 = arith.mulf %92, %93 : vector<8x128xf32>
    %95 = vector.broadcast %7 : vector<1x128xf32> to vector<8x128xf32>
    %96 = arith.addf %94, %95 : vector<8x128xf32>
    %cst_34 = arith.constant 0.333333343 : f32
    %97 = vector.broadcast %cst_34 : f32 to vector<8x128xf32>
    %98 = arith.mulf %56, %97 : vector<8x128xf32>
    %99 = arith.subf %96, %98 : vector<8x128xf32>
    %100 = arith.addf %9, %99 : vector<8x128xf32>
    %101 = arith.truncf %100 : vector<8x128xf32> to vector<8x128xbf16>
    %cst_35 = arith.constant dense<0.000000e+00> : vector<8x256xf32>
    %102 = tpu.matmul %101, %4, %cst_35 {dimension_numbers = #tpu.dot_dimension_numbers<[1], [0], [0], [1], [0, 0, 1, 1], [], []>} : vector<8x128xbf16>, vector<128x256xbf16>, vector<8x256xf32> -> vector<8x256xf32>
    %103 = vector.extract_strided_slice %102 {offsets = [0, 0], sizes = [8, 128], strides = [1, 1]} : vector<8x256xf32> to vector<8x128xf32>
    %104 = arith.addf %13, %103 : vector<8x128xf32>
    %105 = vector.extract_strided_slice %102 {offsets = [0, 128], sizes = [8, 128], strides = [1, 1]} : vector<8x256xf32> to vector<8x128xf32>
    %106 = arith.negf %105 : vector<8x128xf32>
    %107 = math.exp %106 : vector<8x128xf32>
    %cst_36 = arith.constant 1.000000e+00 : f32
    %108 = vector.broadcast %cst_36 : f32 to vector<8x128xf32>
    %109 = arith.addf %108, %107 : vector<8x128xf32>
    %110 = arith.divf %108, %109 : vector<8x128xf32>
    %111 = math.tanh %104 : vector<8x128xf32>
    %112 = arith.mulf %110, %111 : vector<8x128xf32>
    %113 = arith.subf %112, %100 : vector<8x128xf32>
    %114 = vector.broadcast %5 : vector<1x128xf32> to vector<8x128xf32>
    %115 = arith.mulf %113, %114 : vector<8x128xf32>
    %cst_37 = arith.constant dense<0.000000e+00> : vector<8xf32>
    %116 = vector.multi_reduction <add>, %115, %cst_37 [1] : vector<8x128xf32> to vector<8xf32>
    %117 = vector.shape_cast %116 : vector<8xf32> to vector<8x1xf32>
    %cst_38 = arith.constant 1.562500e-02 : f32
    %118 = vector.broadcast %cst_38 : f32 to vector<8x1xf32>
    %119 = arith.mulf %117, %118 : vector<8x1xf32>
    %120 = vector.broadcast %119 : vector<8x1xf32> to vector<8x128xf32>
    %121 = arith.subf %115, %120 : vector<8x128xf32>
    %122 = vector.broadcast %8 : vector<1x128xf32> to vector<8x128xf32>
    %123 = arith.mulf %121, %122 : vector<8x128xf32>
    %124 = arith.mulf %123, %123 : vector<8x128xf32>
    %cst_39 = arith.constant dense<0.000000e+00> : vector<8xf32>
    %125 = vector.multi_reduction <add>, %124, %cst_39 [1] : vector<8x128xf32> to vector<8xf32>
    %126 = vector.shape_cast %125 : vector<8xf32> to vector<8x1xf32>
    %cst_40 = arith.constant 1.562500e-02 : f32
    %127 = vector.broadcast %cst_40 : f32 to vector<8x1xf32>
    %128 = arith.mulf %126, %127 : vector<8x1xf32>
    %cst_41 = arith.constant 9.99999974E-6 : f32
    %129 = vector.broadcast %cst_41 : f32 to vector<8x1xf32>
    %130 = arith.addf %128, %129 : vector<8x1xf32>
    %131 = math.rsqrt %130 : vector<8x1xf32>
    %132 = vector.broadcast %131 : vector<8x1xf32> to vector<8x128xf32>
    %133 = arith.mulf %123, %132 : vector<8x128xf32>
    %134 = vector.broadcast %6 : vector<1x128xf32> to vector<8x128xf32>
    %135 = arith.mulf %133, %134 : vector<8x128xf32>
    %136 = vector.broadcast %7 : vector<1x128xf32> to vector<8x128xf32>
    %137 = arith.addf %135, %136 : vector<8x128xf32>
    %138 = arith.subf %56, %96 : vector<8x128xf32>
    %139 = arith.addf %138, %137 : vector<8x128xf32>
    %140 = arith.addf %9, %139 : vector<8x128xf32>
    %141 = arith.truncf %140 : vector<8x128xf32> to vector<8x128xbf16>
    %cst_42 = arith.constant dense<0.000000e+00> : vector<8x256xf32>
    %142 = tpu.matmul %141, %4, %cst_42 {dimension_numbers = #tpu.dot_dimension_numbers<[1], [0], [0], [1], [0, 0, 1, 1], [], []>} : vector<8x128xbf16>, vector<128x256xbf16>, vector<8x256xf32> -> vector<8x256xf32>
    %143 = vector.extract_strided_slice %142 {offsets = [0, 0], sizes = [8, 128], strides = [1, 1]} : vector<8x256xf32> to vector<8x128xf32>
    %144 = arith.addf %19, %143 : vector<8x128xf32>
    %145 = vector.extract_strided_slice %142 {offsets = [0, 128], sizes = [8, 128], strides = [1, 1]} : vector<8x256xf32> to vector<8x128xf32>
    %146 = arith.negf %145 : vector<8x128xf32>
    %147 = math.exp %146 : vector<8x128xf32>
    %cst_43 = arith.constant 1.000000e+00 : f32
    %148 = vector.broadcast %cst_43 : f32 to vector<8x128xf32>
    %149 = arith.addf %148, %147 : vector<8x128xf32>
    %150 = arith.divf %148, %149 : vector<8x128xf32>
    %151 = math.tanh %144 : vector<8x128xf32>
    %152 = arith.mulf %150, %151 : vector<8x128xf32>
    %153 = arith.subf %152, %140 : vector<8x128xf32>
    %154 = vector.broadcast %5 : vector<1x128xf32> to vector<8x128xf32>
    %155 = arith.mulf %153, %154 : vector<8x128xf32>
    %cst_44 = arith.constant dense<0.000000e+00> : vector<8xf32>
    %156 = vector.multi_reduction <add>, %155, %cst_44 [1] : vector<8x128xf32> to vector<8xf32>
    %157 = vector.shape_cast %156 : vector<8xf32> to vector<8x1xf32>
    %cst_45 = arith.constant 1.562500e-02 : f32
    %158 = vector.broadcast %cst_45 : f32 to vector<8x1xf32>
    %159 = arith.mulf %157, %158 : vector<8x1xf32>
    %160 = vector.broadcast %159 : vector<8x1xf32> to vector<8x128xf32>
    %161 = arith.subf %155, %160 : vector<8x128xf32>
    %162 = vector.broadcast %8 : vector<1x128xf32> to vector<8x128xf32>
    %163 = arith.mulf %161, %162 : vector<8x128xf32>
    %164 = arith.mulf %163, %163 : vector<8x128xf32>
    %cst_46 = arith.constant dense<0.000000e+00> : vector<8xf32>
    %165 = vector.multi_reduction <add>, %164, %cst_46 [1] : vector<8x128xf32> to vector<8xf32>
    %166 = vector.shape_cast %165 : vector<8xf32> to vector<8x1xf32>
    %cst_47 = arith.constant 1.562500e-02 : f32
    %167 = vector.broadcast %cst_47 : f32 to vector<8x1xf32>
    %168 = arith.mulf %166, %167 : vector<8x1xf32>
    %cst_48 = arith.constant 9.99999974E-6 : f32
    %169 = vector.broadcast %cst_48 : f32 to vector<8x1xf32>
    %170 = arith.addf %168, %169 : vector<8x1xf32>
    %171 = math.rsqrt %170 : vector<8x1xf32>
    %172 = vector.broadcast %171 : vector<8x1xf32> to vector<8x128xf32>
    %173 = arith.mulf %163, %172 : vector<8x128xf32>
    %174 = vector.broadcast %6 : vector<1x128xf32> to vector<8x128xf32>
    %175 = arith.mulf %173, %174 : vector<8x128xf32>
    %176 = vector.broadcast %7 : vector<1x128xf32> to vector<8x128xf32>
    %177 = arith.addf %175, %176 : vector<8x128xf32>
    %178 = arith.addf %96, %137 : vector<8x128xf32>
    %cst_49 = arith.constant 3.000000e+00 : f32
    %179 = vector.broadcast %cst_49 : f32 to vector<8x128xf32>
    %180 = arith.mulf %179, %178 : vector<8x128xf32>
    %181 = arith.addf %56, %180 : vector<8x128xf32>
    %182 = arith.addf %181, %177 : vector<8x128xf32>
    %cst_50 = arith.constant 1.250000e-01 : f32
    %183 = vector.broadcast %cst_50 : f32 to vector<8x128xf32>
    %184 = arith.mulf %182, %183 : vector<8x128xf32>
    %185 = arith.addf %9, %184 : vector<8x128xf32>
    %c1_i32_51 = arith.constant 1 : i32
    %c8_i32_52 = arith.constant 8 : i32
    %186 = arith.muli %c1_i32_51, %c8_i32_52 : i32
    %187 = tpu.assume_multiple %186, 8 : i32
    %188 = arith.index_cast %187 : i32 to index
    %c0_53 = arith.constant 0 : index
    %189 = vector.load %arg11[%188, %c0_53] : memref<64x128xf32, #tpu.memory_space<vmem>>, vector<8x128xf32>
    %c1_i32_54 = arith.constant 1 : i32
    %190 = arith.addi %c1_i32_51, %c1_i32_54 : i32
    %c7_i32_55 = arith.constant 7 : i32
    %191 = arith.minsi %190, %c7_i32_55 : i32
    %c8_i32_56 = arith.constant 8 : i32
    %192 = arith.muli %191, %c8_i32_56 : i32
    %193 = tpu.assume_multiple %192, 8 : i32
    %194 = arith.index_cast %193 : i32 to index
    %c0_57 = arith.constant 0 : index
    %195 = vector.load %arg11[%194, %c0_57] : memref<64x128xf32, #tpu.memory_space<vmem>>, vector<8x128xf32>
    %196 = arith.truncf %185 : vector<8x128xf32> to vector<8x128xbf16>
    %cst_58 = arith.constant dense<0.000000e+00> : vector<8x256xf32>
    %197 = tpu.matmul %196, %4, %cst_58 {dimension_numbers = #tpu.dot_dimension_numbers<[1], [0], [0], [1], [0, 0, 1, 1], [], []>} : vector<8x128xbf16>, vector<128x256xbf16>, vector<8x256xf32> -> vector<8x256xf32>
    %198 = vector.extract_strided_slice %197 {offsets = [0, 0], sizes = [8, 128], strides = [1, 1]} : vector<8x256xf32> to vector<8x128xf32>
    %199 = arith.addf %189, %198 : vector<8x128xf32>
    %200 = vector.extract_strided_slice %197 {offsets = [0, 128], sizes = [8, 128], strides = [1, 1]} : vector<8x256xf32> to vector<8x128xf32>
    %201 = arith.negf %200 : vector<8x128xf32>
    %202 = math.exp %201 : vector<8x128xf32>
    %cst_59 = arith.constant 1.000000e+00 : f32
    %203 = vector.broadcast %cst_59 : f32 to vector<8x128xf32>
    %204 = arith.addf %203, %202 : vector<8x128xf32>
    %205 = arith.divf %203, %204 : vector<8x128xf32>
    %206 = math.tanh %199 : vector<8x128xf32>
    %207 = arith.mulf %205, %206 : vector<8x128xf32>
    %208 = arith.subf %207, %185 : vector<8x128xf32>
    %209 = vector.broadcast %5 : vector<1x128xf32> to vector<8x128xf32>
    %210 = arith.mulf %208, %209 : vector<8x128xf32>
    %cst_60 = arith.constant dense<0.000000e+00> : vector<8xf32>
    %211 = vector.multi_reduction <add>, %210, %cst_60 [1] : vector<8x128xf32> to vector<8xf32>
    %212 = vector.shape_cast %211 : vector<8xf32> to vector<8x1xf32>
    %cst_61 = arith.constant 1.562500e-02 : f32
    %213 = vector.broadcast %cst_61 : f32 to vector<8x1xf32>
    %214 = arith.mulf %212, %213 : vector<8x1xf32>
    %215 = vector.broadcast %214 : vector<8x1xf32> to vector<8x128xf32>
    %216 = arith.subf %210, %215 : vector<8x128xf32>
    %217 = vector.broadcast %8 : vector<1x128xf32> to vector<8x128xf32>
    %218 = arith.mulf %216, %217 : vector<8x128xf32>
    %219 = arith.mulf %218, %218 : vector<8x128xf32>
    %cst_62 = arith.constant dense<0.000000e+00> : vector<8xf32>
    %220 = vector.multi_reduction <add>, %219, %cst_62 [1] : vector<8x128xf32> to vector<8xf32>
    %221 = vector.shape_cast %220 : vector<8xf32> to vector<8x1xf32>
    %cst_63 = arith.constant 1.562500e-02 : f32
    %222 = vector.broadcast %cst_63 : f32 to vector<8x1xf32>
    %223 = arith.mulf %221, %222 : vector<8x1xf32>
    %cst_64 = arith.constant 9.99999974E-6 : f32
    %224 = vector.broadcast %cst_64 : f32 to vector<8x1xf32>
    %225 = arith.addf %223, %224 : vector<8x1xf32>
    %226 = math.rsqrt %225 : vector<8x1xf32>
    %227 = vector.broadcast %226 : vector<8x1xf32> to vector<8x128xf32>
    %228 = arith.mulf %218, %227 : vector<8x128xf32>
    %229 = vector.broadcast %6 : vector<1x128xf32> to vector<8x128xf32>
    %230 = arith.mulf %228, %229 : vector<8x128xf32>
    %231 = vector.broadcast %7 : vector<1x128xf32> to vector<8x128xf32>
    %232 = arith.addf %230, %231 : vector<8x128xf32>
    %cst_65 = arith.constant 0.333333343 : f32
    %233 = vector.broadcast %cst_65 : f32 to vector<8x128xf32>
    %234 = arith.mulf %232, %233 : vector<8x128xf32>
    %235 = arith.addf %185, %234 : vector<8x128xf32>
    %236 = arith.truncf %235 : vector<8x128xf32> to vector<8x128xbf16>
    %cst_66 = arith.constant dense<0.000000e+00> : vector<8x256xf32>
    %237 = tpu.matmul %236, %4, %cst_66 {dimension_numbers = #tpu.dot_dimension_numbers<[1], [0], [0], [1], [0, 0, 1, 1], [], []>} : vector<8x128xbf16>, vector<128x256xbf16>, vector<8x256xf32> -> vector<8x256xf32>
    %238 = vector.extract_strided_slice %237 {offsets = [0, 0], sizes = [8, 128], strides = [1, 1]} : vector<8x256xf32> to vector<8x128xf32>
    %239 = arith.addf %189, %238 : vector<8x128xf32>
    %240 = vector.extract_strided_slice %237 {offsets = [0, 128], sizes = [8, 128], strides = [1, 1]} : vector<8x256xf32> to vector<8x128xf32>
    %241 = arith.negf %240 : vector<8x128xf32>
    %242 = math.exp %241 : vector<8x128xf32>
    %cst_67 = arith.constant 1.000000e+00 : f32
    %243 = vector.broadcast %cst_67 : f32 to vector<8x128xf32>
    %244 = arith.addf %243, %242 : vector<8x128xf32>
    %245 = arith.divf %243, %244 : vector<8x128xf32>
    %246 = math.tanh %239 : vector<8x128xf32>
    %247 = arith.mulf %245, %246 : vector<8x128xf32>
    %248 = arith.subf %247, %235 : vector<8x128xf32>
    %249 = vector.broadcast %5 : vector<1x128xf32> to vector<8x128xf32>
    %250 = arith.mulf %248, %249 : vector<8x128xf32>
    %cst_68 = arith.constant dense<0.000000e+00> : vector<8xf32>
    %251 = vector.multi_reduction <add>, %250, %cst_68 [1] : vector<8x128xf32> to vector<8xf32>
    %252 = vector.shape_cast %251 : vector<8xf32> to vector<8x1xf32>
    %cst_69 = arith.constant 1.562500e-02 : f32
    %253 = vector.broadcast %cst_69 : f32 to vector<8x1xf32>
    %254 = arith.mulf %252, %253 : vector<8x1xf32>
    %255 = vector.broadcast %254 : vector<8x1xf32> to vector<8x128xf32>
    %256 = arith.subf %250, %255 : vector<8x128xf32>
    %257 = vector.broadcast %8 : vector<1x128xf32> to vector<8x128xf32>
    %258 = arith.mulf %256, %257 : vector<8x128xf32>
    %259 = arith.mulf %258, %258 : vector<8x128xf32>
    %cst_70 = arith.constant dense<0.000000e+00> : vector<8xf32>
    %260 = vector.multi_reduction <add>, %259, %cst_70 [1] : vector<8x128xf32> to vector<8xf32>
    %261 = vector.shape_cast %260 : vector<8xf32> to vector<8x1xf32>
    %cst_71 = arith.constant 1.562500e-02 : f32
    %262 = vector.broadcast %cst_71 : f32 to vector<8x1xf32>
    %263 = arith.mulf %261, %262 : vector<8x1xf32>
    %cst_72 = arith.constant 9.99999974E-6 : f32
    %264 = vector.broadcast %cst_72 : f32 to vector<8x1xf32>
    %265 = arith.addf %263, %264 : vector<8x1xf32>
    %266 = math.rsqrt %265 : vector<8x1xf32>
    %267 = vector.broadcast %266 : vector<8x1xf32> to vector<8x128xf32>
    %268 = arith.mulf %258, %267 : vector<8x128xf32>
    %269 = vector.broadcast %6 : vector<1x128xf32> to vector<8x128xf32>
    %270 = arith.mulf %268, %269 : vector<8x128xf32>
    %271 = vector.broadcast %7 : vector<1x128xf32> to vector<8x128xf32>
    %272 = arith.addf %270, %271 : vector<8x128xf32>
    %cst_73 = arith.constant 0.333333343 : f32
    %273 = vector.broadcast %cst_73 : f32 to vector<8x128xf32>
    %274 = arith.mulf %232, %273 : vector<8x128xf32>
    %275 = arith.subf %272, %274 : vector<8x128xf32>
    %276 = arith.addf %185, %275 : vector<8x128xf32>
    %277 = arith.truncf %276 : vector<8x128xf32> to vector<8x128xbf16>
    %cst_74 = arith.constant dense<0.000000e+00> : vector<8x256xf32>
    %278 = tpu.matmul %277, %4, %cst_74 {dimension_numbers = #tpu.dot_dimension_numbers<[1], [0], [0], [1], [0, 0, 1, 1], [], []>} : vector<8x128xbf16>, vector<128x256xbf16>, vector<8x256xf32> -> vector<8x256xf32>
    %279 = vector.extract_strided_slice %278 {offsets = [0, 0], sizes = [8, 128], strides = [1, 1]} : vector<8x256xf32> to vector<8x128xf32>
    %280 = arith.addf %189, %279 : vector<8x128xf32>
    %281 = vector.extract_strided_slice %278 {offsets = [0, 128], sizes = [8, 128], strides = [1, 1]} : vector<8x256xf32> to vector<8x128xf32>
    %282 = arith.negf %281 : vector<8x128xf32>
    %283 = math.exp %282 : vector<8x128xf32>
    %cst_75 = arith.constant 1.000000e+00 : f32
    %284 = vector.broadcast %cst_75 : f32 to vector<8x128xf32>
    %285 = arith.addf %284, %283 : vector<8x128xf32>
    %286 = arith.divf %284, %285 : vector<8x128xf32>
    %287 = math.tanh %280 : vector<8x128xf32>
    %288 = arith.mulf %286, %287 : vector<8x128xf32>
    %289 = arith.subf %288, %276 : vector<8x128xf32>
    %290 = vector.broadcast %5 : vector<1x128xf32> to vector<8x128xf32>
    %291 = arith.mulf %289, %290 : vector<8x128xf32>
    %cst_76 = arith.constant dense<0.000000e+00> : vector<8xf32>
    %292 = vector.multi_reduction <add>, %291, %cst_76 [1] : vector<8x128xf32> to vector<8xf32>
    %293 = vector.shape_cast %292 : vector<8xf32> to vector<8x1xf32>
    %cst_77 = arith.constant 1.562500e-02 : f32
    %294 = vector.broadcast %cst_77 : f32 to vector<8x1xf32>
    %295 = arith.mulf %293, %294 : vector<8x1xf32>
    %296 = vector.broadcast %295 : vector<8x1xf32> to vector<8x128xf32>
    %297 = arith.subf %291, %296 : vector<8x128xf32>
    %298 = vector.broadcast %8 : vector<1x128xf32> to vector<8x128xf32>
    %299 = arith.mulf %297, %298 : vector<8x128xf32>
    %300 = arith.mulf %299, %299 : vector<8x128xf32>
    %cst_78 = arith.constant dense<0.000000e+00> : vector<8xf32>
    %301 = vector.multi_reduction <add>, %300, %cst_78 [1] : vector<8x128xf32> to vector<8xf32>
    %302 = vector.shape_cast %301 : vector<8xf32> to vector<8x1xf32>
    %cst_79 = arith.constant 1.562500e-02 : f32
    %303 = vector.broadcast %cst_79 : f32 to vector<8x1xf32>
    %304 = arith.mulf %302, %303 : vector<8x1xf32>
    %cst_80 = arith.constant 9.99999974E-6 : f32
    %305 = vector.broadcast %cst_80 : f32 to vector<8x1xf32>
    %306 = arith.addf %304, %305 : vector<8x1xf32>
    %307 = math.rsqrt %306 : vector<8x1xf32>
    %308 = vector.broadcast %307 : vector<8x1xf32> to vector<8x128xf32>
    %309 = arith.mulf %299, %308 : vector<8x128xf32>
    %310 = vector.broadcast %6 : vector<1x128xf32> to vector<8x128xf32>
    %311 = arith.mulf %309, %310 : vector<8x128xf32>
    %312 = vector.broadcast %7 : vector<1x128xf32> to vector<8x128xf32>
    %313 = arith.addf %311, %312 : vector<8x128xf32>
    %314 = arith.subf %232, %272 : vector<8x128xf32>
    %315 = arith.addf %314, %313 : vector<8x128xf32>
    %316 = arith.addf %185, %315 : vector<8x128xf32>
    %317 = arith.truncf %316 : vector<8x128xf32> to vector<8x128xbf16>
    %cst_81 = arith.constant dense<0.000000e+00> : vector<8x256xf32>
    %318 = tpu.matmul %317, %4, %cst_81 {dimension_numbers = #tpu.dot_dimension_numbers<[1], [0], [0], [1], [0, 0, 1, 1], [], []>} : vector<8x128xbf16>, vector<128x256xbf16>, vector<8x256xf32> -> vector<8x256xf32>
    %319 = vector.extract_strided_slice %318 {offsets = [0, 0], sizes = [8, 128], strides = [1, 1]} : vector<8x256xf32> to vector<8x128xf32>
    %320 = arith.addf %195, %319 : vector<8x128xf32>
    %321 = vector.extract_strided_slice %318 {offsets = [0, 128], sizes = [8, 128], strides = [1, 1]} : vector<8x256xf32> to vector<8x128xf32>
    %322 = arith.negf %321 : vector<8x128xf32>
    %323 = math.exp %322 : vector<8x128xf32>
    %cst_82 = arith.constant 1.000000e+00 : f32
    %324 = vector.broadcast %cst_82 : f32 to vector<8x128xf32>
    %325 = arith.addf %324, %323 : vector<8x128xf32>
    %326 = arith.divf %324, %325 : vector<8x128xf32>
    %327 = math.tanh %320 : vector<8x128xf32>
    %328 = arith.mulf %326, %327 : vector<8x128xf32>
    %329 = arith.subf %328, %316 : vector<8x128xf32>
    %330 = vector.broadcast %5 : vector<1x128xf32> to vector<8x128xf32>
    %331 = arith.mulf %329, %330 : vector<8x128xf32>
    %cst_83 = arith.constant dense<0.000000e+00> : vector<8xf32>
    %332 = vector.multi_reduction <add>, %331, %cst_83 [1] : vector<8x128xf32> to vector<8xf32>
    %333 = vector.shape_cast %332 : vector<8xf32> to vector<8x1xf32>
    %cst_84 = arith.constant 1.562500e-02 : f32
    %334 = vector.broadcast %cst_84 : f32 to vector<8x1xf32>
    %335 = arith.mulf %333, %334 : vector<8x1xf32>
    %336 = vector.broadcast %335 : vector<8x1xf32> to vector<8x128xf32>
    %337 = arith.subf %331, %336 : vector<8x128xf32>
    %338 = vector.broadcast %8 : vector<1x128xf32> to vector<8x128xf32>
    %339 = arith.mulf %337, %338 : vector<8x128xf32>
    %340 = arith.mulf %339, %339 : vector<8x128xf32>
    %cst_85 = arith.constant dense<0.000000e+00> : vector<8xf32>
    %341 = vector.multi_reduction <add>, %340, %cst_85 [1] : vector<8x128xf32> to vector<8xf32>
    %342 = vector.shape_cast %341 : vector<8xf32> to vector<8x1xf32>
    %cst_86 = arith.constant 1.562500e-02 : f32
    %343 = vector.broadcast %cst_86 : f32 to vector<8x1xf32>
    %344 = arith.mulf %342, %343 : vector<8x1xf32>
    %cst_87 = arith.constant 9.99999974E-6 : f32
    %345 = vector.broadcast %cst_87 : f32 to vector<8x1xf32>
    %346 = arith.addf %344, %345 : vector<8x1xf32>
    %347 = math.rsqrt %346 : vector<8x1xf32>
    %348 = vector.broadcast %347 : vector<8x1xf32> to vector<8x128xf32>
    %349 = arith.mulf %339, %348 : vector<8x128xf32>
    %350 = vector.broadcast %6 : vector<1x128xf32> to vector<8x128xf32>
    %351 = arith.mulf %349, %350 : vector<8x128xf32>
    %352 = vector.broadcast %7 : vector<1x128xf32> to vector<8x128xf32>
    %353 = arith.addf %351, %352 : vector<8x128xf32>
    %354 = arith.addf %272, %313 : vector<8x128xf32>
    %cst_88 = arith.constant 3.000000e+00 : f32
    %355 = vector.broadcast %cst_88 : f32 to vector<8x128xf32>
    %356 = arith.mulf %355, %354 : vector<8x128xf32>
    %357 = arith.addf %232, %356 : vector<8x128xf32>
    %358 = arith.addf %357, %353 : vector<8x128xf32>
    %cst_89 = arith.constant 1.250000e-01 : f32
    %359 = vector.broadcast %cst_89 : f32 to vector<8x128xf32>
    %360 = arith.mulf %358, %359 : vector<8x128xf32>
    %361 = arith.addf %185, %360 : vector<8x128xf32>
    %c2_i32 = arith.constant 2 : i32
    %c8_i32_90 = arith.constant 8 : i32
    %362 = arith.muli %c2_i32, %c8_i32_90 : i32
    %363 = tpu.assume_multiple %362, 8 : i32
    %364 = arith.index_cast %363 : i32 to index
    %c0_91 = arith.constant 0 : index
    %365 = vector.load %arg11[%364, %c0_91] : memref<64x128xf32, #tpu.memory_space<vmem>>, vector<8x128xf32>
    %c1_i32_92 = arith.constant 1 : i32
    %366 = arith.addi %c2_i32, %c1_i32_92 : i32
    %c7_i32_93 = arith.constant 7 : i32
    %367 = arith.minsi %366, %c7_i32_93 : i32
    %c8_i32_94 = arith.constant 8 : i32
    %368 = arith.muli %367, %c8_i32_94 : i32
    %369 = tpu.assume_multiple %368, 8 : i32
    %370 = arith.index_cast %369 : i32 to index
    %c0_95 = arith.constant 0 : index
    %371 = vector.load %arg11[%370, %c0_95] : memref<64x128xf32, #tpu.memory_space<vmem>>, vector<8x128xf32>
    %372 = arith.truncf %361 : vector<8x128xf32> to vector<8x128xbf16>
    %cst_96 = arith.constant dense<0.000000e+00> : vector<8x256xf32>
    %373 = tpu.matmul %372, %4, %cst_96 {dimension_numbers = #tpu.dot_dimension_numbers<[1], [0], [0], [1], [0, 0, 1, 1], [], []>} : vector<8x128xbf16>, vector<128x256xbf16>, vector<8x256xf32> -> vector<8x256xf32>
    %374 = vector.extract_strided_slice %373 {offsets = [0, 0], sizes = [8, 128], strides = [1, 1]} : vector<8x256xf32> to vector<8x128xf32>
    %375 = arith.addf %365, %374 : vector<8x128xf32>
    %376 = vector.extract_strided_slice %373 {offsets = [0, 128], sizes = [8, 128], strides = [1, 1]} : vector<8x256xf32> to vector<8x128xf32>
    %377 = arith.negf %376 : vector<8x128xf32>
    %378 = math.exp %377 : vector<8x128xf32>
    %cst_97 = arith.constant 1.000000e+00 : f32
    %379 = vector.broadcast %cst_97 : f32 to vector<8x128xf32>
    %380 = arith.addf %379, %378 : vector<8x128xf32>
    %381 = arith.divf %379, %380 : vector<8x128xf32>
    %382 = math.tanh %375 : vector<8x128xf32>
    %383 = arith.mulf %381, %382 : vector<8x128xf32>
    %384 = arith.subf %383, %361 : vector<8x128xf32>
    %385 = vector.broadcast %5 : vector<1x128xf32> to vector<8x128xf32>
    %386 = arith.mulf %384, %385 : vector<8x128xf32>
    %cst_98 = arith.constant dense<0.000000e+00> : vector<8xf32>
    %387 = vector.multi_reduction <add>, %386, %cst_98 [1] : vector<8x128xf32> to vector<8xf32>
    %388 = vector.shape_cast %387 : vector<8xf32> to vector<8x1xf32>
    %cst_99 = arith.constant 1.562500e-02 : f32
    %389 = vector.broadcast %cst_99 : f32 to vector<8x1xf32>
    %390 = arith.mulf %388, %389 : vector<8x1xf32>
    %391 = vector.broadcast %390 : vector<8x1xf32> to vector<8x128xf32>
    %392 = arith.subf %386, %391 : vector<8x128xf32>
    %393 = vector.broadcast %8 : vector<1x128xf32> to vector<8x128xf32>
    %394 = arith.mulf %392, %393 : vector<8x128xf32>
    %395 = arith.mulf %394, %394 : vector<8x128xf32>
    %cst_100 = arith.constant dense<0.000000e+00> : vector<8xf32>
    %396 = vector.multi_reduction <add>, %395, %cst_100 [1] : vector<8x128xf32> to vector<8xf32>
    %397 = vector.shape_cast %396 : vector<8xf32> to vector<8x1xf32>
    %cst_101 = arith.constant 1.562500e-02 : f32
    %398 = vector.broadcast %cst_101 : f32 to vector<8x1xf32>
    %399 = arith.mulf %397, %398 : vector<8x1xf32>
    %cst_102 = arith.constant 9.99999974E-6 : f32
    %400 = vector.broadcast %cst_102 : f32 to vector<8x1xf32>
    %401 = arith.addf %399, %400 : vector<8x1xf32>
    %402 = math.rsqrt %401 : vector<8x1xf32>
    %403 = vector.broadcast %402 : vector<8x1xf32> to vector<8x128xf32>
    %404 = arith.mulf %394, %403 : vector<8x128xf32>
    %405 = vector.broadcast %6 : vector<1x128xf32> to vector<8x128xf32>
    %406 = arith.mulf %404, %405 : vector<8x128xf32>
    %407 = vector.broadcast %7 : vector<1x128xf32> to vector<8x128xf32>
    %408 = arith.addf %406, %407 : vector<8x128xf32>
    %cst_103 = arith.constant 0.333333343 : f32
    %409 = vector.broadcast %cst_103 : f32 to vector<8x128xf32>
    %410 = arith.mulf %408, %409 : vector<8x128xf32>
    %411 = arith.addf %361, %410 : vector<8x128xf32>
    %412 = arith.truncf %411 : vector<8x128xf32> to vector<8x128xbf16>
    %cst_104 = arith.constant dense<0.000000e+00> : vector<8x256xf32>
    %413 = tpu.matmul %412, %4, %cst_104 {dimension_numbers = #tpu.dot_dimension_numbers<[1], [0], [0], [1], [0, 0, 1, 1], [], []>} : vector<8x128xbf16>, vector<128x256xbf16>, vector<8x256xf32> -> vector<8x256xf32>
    %414 = vector.extract_strided_slice %413 {offsets = [0, 0], sizes = [8, 128], strides = [1, 1]} : vector<8x256xf32> to vector<8x128xf32>
    %415 = arith.addf %365, %414 : vector<8x128xf32>
    %416 = vector.extract_strided_slice %413 {offsets = [0, 128], sizes = [8, 128], strides = [1, 1]} : vector<8x256xf32> to vector<8x128xf32>
    %417 = arith.negf %416 : vector<8x128xf32>
    %418 = math.exp %417 : vector<8x128xf32>
    %cst_105 = arith.constant 1.000000e+00 : f32
    %419 = vector.broadcast %cst_105 : f32 to vector<8x128xf32>
    %420 = arith.addf %419, %418 : vector<8x128xf32>
    %421 = arith.divf %419, %420 : vector<8x128xf32>
    %422 = math.tanh %415 : vector<8x128xf32>
    %423 = arith.mulf %421, %422 : vector<8x128xf32>
    %424 = arith.subf %423, %411 : vector<8x128xf32>
    %425 = vector.broadcast %5 : vector<1x128xf32> to vector<8x128xf32>
    %426 = arith.mulf %424, %425 : vector<8x128xf32>
    %cst_106 = arith.constant dense<0.000000e+00> : vector<8xf32>
    %427 = vector.multi_reduction <add>, %426, %cst_106 [1] : vector<8x128xf32> to vector<8xf32>
    %428 = vector.shape_cast %427 : vector<8xf32> to vector<8x1xf32>
    %cst_107 = arith.constant 1.562500e-02 : f32
    %429 = vector.broadcast %cst_107 : f32 to vector<8x1xf32>
    %430 = arith.mulf %428, %429 : vector<8x1xf32>
    %431 = vector.broadcast %430 : vector<8x1xf32> to vector<8x128xf32>
    %432 = arith.subf %426, %431 : vector<8x128xf32>
    %433 = vector.broadcast %8 : vector<1x128xf32> to vector<8x128xf32>
    %434 = arith.mulf %432, %433 : vector<8x128xf32>
    %435 = arith.mulf %434, %434 : vector<8x128xf32>
    %cst_108 = arith.constant dense<0.000000e+00> : vector<8xf32>
    %436 = vector.multi_reduction <add>, %435, %cst_108 [1] : vector<8x128xf32> to vector<8xf32>
    %437 = vector.shape_cast %436 : vector<8xf32> to vector<8x1xf32>
    %cst_109 = arith.constant 1.562500e-02 : f32
    %438 = vector.broadcast %cst_109 : f32 to vector<8x1xf32>
    %439 = arith.mulf %437, %438 : vector<8x1xf32>
    %cst_110 = arith.constant 9.99999974E-6 : f32
    %440 = vector.broadcast %cst_110 : f32 to vector<8x1xf32>
    %441 = arith.addf %439, %440 : vector<8x1xf32>
    %442 = math.rsqrt %441 : vector<8x1xf32>
    %443 = vector.broadcast %442 : vector<8x1xf32> to vector<8x128xf32>
    %444 = arith.mulf %434, %443 : vector<8x128xf32>
    %445 = vector.broadcast %6 : vector<1x128xf32> to vector<8x128xf32>
    %446 = arith.mulf %444, %445 : vector<8x128xf32>
    %447 = vector.broadcast %7 : vector<1x128xf32> to vector<8x128xf32>
    %448 = arith.addf %446, %447 : vector<8x128xf32>
    %cst_111 = arith.constant 0.333333343 : f32
    %449 = vector.broadcast %cst_111 : f32 to vector<8x128xf32>
    %450 = arith.mulf %408, %449 : vector<8x128xf32>
    %451 = arith.subf %448, %450 : vector<8x128xf32>
    %452 = arith.addf %361, %451 : vector<8x128xf32>
    %453 = arith.truncf %452 : vector<8x128xf32> to vector<8x128xbf16>
    %cst_112 = arith.constant dense<0.000000e+00> : vector<8x256xf32>
    %454 = tpu.matmul %453, %4, %cst_112 {dimension_numbers = #tpu.dot_dimension_numbers<[1], [0], [0], [1], [0, 0, 1, 1], [], []>} : vector<8x128xbf16>, vector<128x256xbf16>, vector<8x256xf32> -> vector<8x256xf32>
    %455 = vector.extract_strided_slice %454 {offsets = [0, 0], sizes = [8, 128], strides = [1, 1]} : vector<8x256xf32> to vector<8x128xf32>
    %456 = arith.addf %365, %455 : vector<8x128xf32>
    %457 = vector.extract_strided_slice %454 {offsets = [0, 128], sizes = [8, 128], strides = [1, 1]} : vector<8x256xf32> to vector<8x128xf32>
    %458 = arith.negf %457 : vector<8x128xf32>
    %459 = math.exp %458 : vector<8x128xf32>
    %cst_113 = arith.constant 1.000000e+00 : f32
    %460 = vector.broadcast %cst_113 : f32 to vector<8x128xf32>
    %461 = arith.addf %460, %459 : vector<8x128xf32>
    %462 = arith.divf %460, %461 : vector<8x128xf32>
    %463 = math.tanh %456 : vector<8x128xf32>
    %464 = arith.mulf %462, %463 : vector<8x128xf32>
    %465 = arith.subf %464, %452 : vector<8x128xf32>
    %466 = vector.broadcast %5 : vector<1x128xf32> to vector<8x128xf32>
    %467 = arith.mulf %465, %466 : vector<8x128xf32>
    %cst_114 = arith.constant dense<0.000000e+00> : vector<8xf32>
    %468 = vector.multi_reduction <add>, %467, %cst_114 [1] : vector<8x128xf32> to vector<8xf32>
    %469 = vector.shape_cast %468 : vector<8xf32> to vector<8x1xf32>
    %cst_115 = arith.constant 1.562500e-02 : f32
    %470 = vector.broadcast %cst_115 : f32 to vector<8x1xf32>
    %471 = arith.mulf %469, %470 : vector<8x1xf32>
    %472 = vector.broadcast %471 : vector<8x1xf32> to vector<8x128xf32>
    %473 = arith.subf %467, %472 : vector<8x128xf32>
    %474 = vector.broadcast %8 : vector<1x128xf32> to vector<8x128xf32>
    %475 = arith.mulf %473, %474 : vector<8x128xf32>
    %476 = arith.mulf %475, %475 : vector<8x128xf32>
    %cst_116 = arith.constant dense<0.000000e+00> : vector<8xf32>
    %477 = vector.multi_reduction <add>, %476, %cst_116 [1] : vector<8x128xf32> to vector<8xf32>
    %478 = vector.shape_cast %477 : vector<8xf32> to vector<8x1xf32>
    %cst_117 = arith.constant 1.562500e-02 : f32
    %479 = vector.broadcast %cst_117 : f32 to vector<8x1xf32>
    %480 = arith.mulf %478, %479 : vector<8x1xf32>
    %cst_118 = arith.constant 9.99999974E-6 : f32
    %481 = vector.broadcast %cst_118 : f32 to vector<8x1xf32>
    %482 = arith.addf %480, %481 : vector<8x1xf32>
    %483 = math.rsqrt %482 : vector<8x1xf32>
    %484 = vector.broadcast %483 : vector<8x1xf32> to vector<8x128xf32>
    %485 = arith.mulf %475, %484 : vector<8x128xf32>
    %486 = vector.broadcast %6 : vector<1x128xf32> to vector<8x128xf32>
    %487 = arith.mulf %485, %486 : vector<8x128xf32>
    %488 = vector.broadcast %7 : vector<1x128xf32> to vector<8x128xf32>
    %489 = arith.addf %487, %488 : vector<8x128xf32>
    %490 = arith.subf %408, %448 : vector<8x128xf32>
    %491 = arith.addf %490, %489 : vector<8x128xf32>
    %492 = arith.addf %361, %491 : vector<8x128xf32>
    %493 = arith.truncf %492 : vector<8x128xf32> to vector<8x128xbf16>
    %cst_119 = arith.constant dense<0.000000e+00> : vector<8x256xf32>
    %494 = tpu.matmul %493, %4, %cst_119 {dimension_numbers = #tpu.dot_dimension_numbers<[1], [0], [0], [1], [0, 0, 1, 1], [], []>} : vector<8x128xbf16>, vector<128x256xbf16>, vector<8x256xf32> -> vector<8x256xf32>
    %495 = vector.extract_strided_slice %494 {offsets = [0, 0], sizes = [8, 128], strides = [1, 1]} : vector<8x256xf32> to vector<8x128xf32>
    %496 = arith.addf %371, %495 : vector<8x128xf32>
    %497 = vector.extract_strided_slice %494 {offsets = [0, 128], sizes = [8, 128], strides = [1, 1]} : vector<8x256xf32> to vector<8x128xf32>
    %498 = arith.negf %497 : vector<8x128xf32>
    %499 = math.exp %498 : vector<8x128xf32>
    %cst_120 = arith.constant 1.000000e+00 : f32
    %500 = vector.broadcast %cst_120 : f32 to vector<8x128xf32>
    %501 = arith.addf %500, %499 : vector<8x128xf32>
    %502 = arith.divf %500, %501 : vector<8x128xf32>
    %503 = math.tanh %496 : vector<8x128xf32>
    %504 = arith.mulf %502, %503 : vector<8x128xf32>
    %505 = arith.subf %504, %492 : vector<8x128xf32>
    %506 = vector.broadcast %5 : vector<1x128xf32> to vector<8x128xf32>
    %507 = arith.mulf %505, %506 : vector<8x128xf32>
    %cst_121 = arith.constant dense<0.000000e+00> : vector<8xf32>
    %508 = vector.multi_reduction <add>, %507, %cst_121 [1] : vector<8x128xf32> to vector<8xf32>
    %509 = vector.shape_cast %508 : vector<8xf32> to vector<8x1xf32>
    %cst_122 = arith.constant 1.562500e-02 : f32
    %510 = vector.broadcast %cst_122 : f32 to vector<8x1xf32>
    %511 = arith.mulf %509, %510 : vector<8x1xf32>
    %512 = vector.broadcast %511 : vector<8x1xf32> to vector<8x128xf32>
    %513 = arith.subf %507, %512 : vector<8x128xf32>
    %514 = vector.broadcast %8 : vector<1x128xf32> to vector<8x128xf32>
    %515 = arith.mulf %513, %514 : vector<8x128xf32>
    %516 = arith.mulf %515, %515 : vector<8x128xf32>
    %cst_123 = arith.constant dense<0.000000e+00> : vector<8xf32>
    %517 = vector.multi_reduction <add>, %516, %cst_123 [1] : vector<8x128xf32> to vector<8xf32>
    %518 = vector.shape_cast %517 : vector<8xf32> to vector<8x1xf32>
    %cst_124 = arith.constant 1.562500e-02 : f32
    %519 = vector.broadcast %cst_124 : f32 to vector<8x1xf32>
    %520 = arith.mulf %518, %519 : vector<8x1xf32>
    %cst_125 = arith.constant 9.99999974E-6 : f32
    %521 = vector.broadcast %cst_125 : f32 to vector<8x1xf32>
    %522 = arith.addf %520, %521 : vector<8x1xf32>
    %523 = math.rsqrt %522 : vector<8x1xf32>
    %524 = vector.broadcast %523 : vector<8x1xf32> to vector<8x128xf32>
    %525 = arith.mulf %515, %524 : vector<8x128xf32>
    %526 = vector.broadcast %6 : vector<1x128xf32> to vector<8x128xf32>
    %527 = arith.mulf %525, %526 : vector<8x128xf32>
    %528 = vector.broadcast %7 : vector<1x128xf32> to vector<8x128xf32>
    %529 = arith.addf %527, %528 : vector<8x128xf32>
    %530 = arith.addf %448, %489 : vector<8x128xf32>
    %cst_126 = arith.constant 3.000000e+00 : f32
    %531 = vector.broadcast %cst_126 : f32 to vector<8x128xf32>
    %532 = arith.mulf %531, %530 : vector<8x128xf32>
    %533 = arith.addf %408, %532 : vector<8x128xf32>
    %534 = arith.addf %533, %529 : vector<8x128xf32>
    %cst_127 = arith.constant 1.250000e-01 : f32
    %535 = vector.broadcast %cst_127 : f32 to vector<8x128xf32>
    %536 = arith.mulf %534, %535 : vector<8x128xf32>
    %537 = arith.addf %361, %536 : vector<8x128xf32>
    %c3_i32 = arith.constant 3 : i32
    %c8_i32_128 = arith.constant 8 : i32
    %538 = arith.muli %c3_i32, %c8_i32_128 : i32
    %539 = tpu.assume_multiple %538, 8 : i32
    %540 = arith.index_cast %539 : i32 to index
    %c0_129 = arith.constant 0 : index
    %541 = vector.load %arg11[%540, %c0_129] : memref<64x128xf32, #tpu.memory_space<vmem>>, vector<8x128xf32>
    %c1_i32_130 = arith.constant 1 : i32
    %542 = arith.addi %c3_i32, %c1_i32_130 : i32
    %c7_i32_131 = arith.constant 7 : i32
    %543 = arith.minsi %542, %c7_i32_131 : i32
    %c8_i32_132 = arith.constant 8 : i32
    %544 = arith.muli %543, %c8_i32_132 : i32
    %545 = tpu.assume_multiple %544, 8 : i32
    %546 = arith.index_cast %545 : i32 to index
    %c0_133 = arith.constant 0 : index
    %547 = vector.load %arg11[%546, %c0_133] : memref<64x128xf32, #tpu.memory_space<vmem>>, vector<8x128xf32>
    %548 = arith.truncf %537 : vector<8x128xf32> to vector<8x128xbf16>
    %cst_134 = arith.constant dense<0.000000e+00> : vector<8x256xf32>
    %549 = tpu.matmul %548, %4, %cst_134 {dimension_numbers = #tpu.dot_dimension_numbers<[1], [0], [0], [1], [0, 0, 1, 1], [], []>} : vector<8x128xbf16>, vector<128x256xbf16>, vector<8x256xf32> -> vector<8x256xf32>
    %550 = vector.extract_strided_slice %549 {offsets = [0, 0], sizes = [8, 128], strides = [1, 1]} : vector<8x256xf32> to vector<8x128xf32>
    %551 = arith.addf %541, %550 : vector<8x128xf32>
    %552 = vector.extract_strided_slice %549 {offsets = [0, 128], sizes = [8, 128], strides = [1, 1]} : vector<8x256xf32> to vector<8x128xf32>
    %553 = arith.negf %552 : vector<8x128xf32>
    %554 = math.exp %553 : vector<8x128xf32>
    %cst_135 = arith.constant 1.000000e+00 : f32
    %555 = vector.broadcast %cst_135 : f32 to vector<8x128xf32>
    %556 = arith.addf %555, %554 : vector<8x128xf32>
    %557 = arith.divf %555, %556 : vector<8x128xf32>
    %558 = math.tanh %551 : vector<8x128xf32>
    %559 = arith.mulf %557, %558 : vector<8x128xf32>
    %560 = arith.subf %559, %537 : vector<8x128xf32>
    %561 = vector.broadcast %5 : vector<1x128xf32> to vector<8x128xf32>
    %562 = arith.mulf %560, %561 : vector<8x128xf32>
    %cst_136 = arith.constant dense<0.000000e+00> : vector<8xf32>
    %563 = vector.multi_reduction <add>, %562, %cst_136 [1] : vector<8x128xf32> to vector<8xf32>
    %564 = vector.shape_cast %563 : vector<8xf32> to vector<8x1xf32>
    %cst_137 = arith.constant 1.562500e-02 : f32
    %565 = vector.broadcast %cst_137 : f32 to vector<8x1xf32>
    %566 = arith.mulf %564, %565 : vector<8x1xf32>
    %567 = vector.broadcast %566 : vector<8x1xf32> to vector<8x128xf32>
    %568 = arith.subf %562, %567 : vector<8x128xf32>
    %569 = vector.broadcast %8 : vector<1x128xf32> to vector<8x128xf32>
    %570 = arith.mulf %568, %569 : vector<8x128xf32>
    %571 = arith.mulf %570, %570 : vector<8x128xf32>
    %cst_138 = arith.constant dense<0.000000e+00> : vector<8xf32>
    %572 = vector.multi_reduction <add>, %571, %cst_138 [1] : vector<8x128xf32> to vector<8xf32>
    %573 = vector.shape_cast %572 : vector<8xf32> to vector<8x1xf32>
    %cst_139 = arith.constant 1.562500e-02 : f32
    %574 = vector.broadcast %cst_139 : f32 to vector<8x1xf32>
    %575 = arith.mulf %573, %574 : vector<8x1xf32>
    %cst_140 = arith.constant 9.99999974E-6 : f32
    %576 = vector.broadcast %cst_140 : f32 to vector<8x1xf32>
    %577 = arith.addf %575, %576 : vector<8x1xf32>
    %578 = math.rsqrt %577 : vector<8x1xf32>
    %579 = vector.broadcast %578 : vector<8x1xf32> to vector<8x128xf32>
    %580 = arith.mulf %570, %579 : vector<8x128xf32>
    %581 = vector.broadcast %6 : vector<1x128xf32> to vector<8x128xf32>
    %582 = arith.mulf %580, %581 : vector<8x128xf32>
    %583 = vector.broadcast %7 : vector<1x128xf32> to vector<8x128xf32>
    %584 = arith.addf %582, %583 : vector<8x128xf32>
    %cst_141 = arith.constant 0.333333343 : f32
    %585 = vector.broadcast %cst_141 : f32 to vector<8x128xf32>
    %586 = arith.mulf %584, %585 : vector<8x128xf32>
    %587 = arith.addf %537, %586 : vector<8x128xf32>
    %588 = arith.truncf %587 : vector<8x128xf32> to vector<8x128xbf16>
    %cst_142 = arith.constant dense<0.000000e+00> : vector<8x256xf32>
    %589 = tpu.matmul %588, %4, %cst_142 {dimension_numbers = #tpu.dot_dimension_numbers<[1], [0], [0], [1], [0, 0, 1, 1], [], []>} : vector<8x128xbf16>, vector<128x256xbf16>, vector<8x256xf32> -> vector<8x256xf32>
    %590 = vector.extract_strided_slice %589 {offsets = [0, 0], sizes = [8, 128], strides = [1, 1]} : vector<8x256xf32> to vector<8x128xf32>
    %591 = arith.addf %541, %590 : vector<8x128xf32>
    %592 = vector.extract_strided_slice %589 {offsets = [0, 128], sizes = [8, 128], strides = [1, 1]} : vector<8x256xf32> to vector<8x128xf32>
    %593 = arith.negf %592 : vector<8x128xf32>
    %594 = math.exp %593 : vector<8x128xf32>
    %cst_143 = arith.constant 1.000000e+00 : f32
    %595 = vector.broadcast %cst_143 : f32 to vector<8x128xf32>
    %596 = arith.addf %595, %594 : vector<8x128xf32>
    %597 = arith.divf %595, %596 : vector<8x128xf32>
    %598 = math.tanh %591 : vector<8x128xf32>
    %599 = arith.mulf %597, %598 : vector<8x128xf32>
    %600 = arith.subf %599, %587 : vector<8x128xf32>
    %601 = vector.broadcast %5 : vector<1x128xf32> to vector<8x128xf32>
    %602 = arith.mulf %600, %601 : vector<8x128xf32>
    %cst_144 = arith.constant dense<0.000000e+00> : vector<8xf32>
    %603 = vector.multi_reduction <add>, %602, %cst_144 [1] : vector<8x128xf32> to vector<8xf32>
    %604 = vector.shape_cast %603 : vector<8xf32> to vector<8x1xf32>
    %cst_145 = arith.constant 1.562500e-02 : f32
    %605 = vector.broadcast %cst_145 : f32 to vector<8x1xf32>
    %606 = arith.mulf %604, %605 : vector<8x1xf32>
    %607 = vector.broadcast %606 : vector<8x1xf32> to vector<8x128xf32>
    %608 = arith.subf %602, %607 : vector<8x128xf32>
    %609 = vector.broadcast %8 : vector<1x128xf32> to vector<8x128xf32>
    %610 = arith.mulf %608, %609 : vector<8x128xf32>
    %611 = arith.mulf %610, %610 : vector<8x128xf32>
    %cst_146 = arith.constant dense<0.000000e+00> : vector<8xf32>
    %612 = vector.multi_reduction <add>, %611, %cst_146 [1] : vector<8x128xf32> to vector<8xf32>
    %613 = vector.shape_cast %612 : vector<8xf32> to vector<8x1xf32>
    %cst_147 = arith.constant 1.562500e-02 : f32
    %614 = vector.broadcast %cst_147 : f32 to vector<8x1xf32>
    %615 = arith.mulf %613, %614 : vector<8x1xf32>
    %cst_148 = arith.constant 9.99999974E-6 : f32
    %616 = vector.broadcast %cst_148 : f32 to vector<8x1xf32>
    %617 = arith.addf %615, %616 : vector<8x1xf32>
    %618 = math.rsqrt %617 : vector<8x1xf32>
    %619 = vector.broadcast %618 : vector<8x1xf32> to vector<8x128xf32>
    %620 = arith.mulf %610, %619 : vector<8x128xf32>
    %621 = vector.broadcast %6 : vector<1x128xf32> to vector<8x128xf32>
    %622 = arith.mulf %620, %621 : vector<8x128xf32>
    %623 = vector.broadcast %7 : vector<1x128xf32> to vector<8x128xf32>
    %624 = arith.addf %622, %623 : vector<8x128xf32>
    %cst_149 = arith.constant 0.333333343 : f32
    %625 = vector.broadcast %cst_149 : f32 to vector<8x128xf32>
    %626 = arith.mulf %584, %625 : vector<8x128xf32>
    %627 = arith.subf %624, %626 : vector<8x128xf32>
    %628 = arith.addf %537, %627 : vector<8x128xf32>
    %629 = arith.truncf %628 : vector<8x128xf32> to vector<8x128xbf16>
    %cst_150 = arith.constant dense<0.000000e+00> : vector<8x256xf32>
    %630 = tpu.matmul %629, %4, %cst_150 {dimension_numbers = #tpu.dot_dimension_numbers<[1], [0], [0], [1], [0, 0, 1, 1], [], []>} : vector<8x128xbf16>, vector<128x256xbf16>, vector<8x256xf32> -> vector<8x256xf32>
    %631 = vector.extract_strided_slice %630 {offsets = [0, 0], sizes = [8, 128], strides = [1, 1]} : vector<8x256xf32> to vector<8x128xf32>
    %632 = arith.addf %541, %631 : vector<8x128xf32>
    %633 = vector.extract_strided_slice %630 {offsets = [0, 128], sizes = [8, 128], strides = [1, 1]} : vector<8x256xf32> to vector<8x128xf32>
    %634 = arith.negf %633 : vector<8x128xf32>
    %635 = math.exp %634 : vector<8x128xf32>
    %cst_151 = arith.constant 1.000000e+00 : f32
    %636 = vector.broadcast %cst_151 : f32 to vector<8x128xf32>
    %637 = arith.addf %636, %635 : vector<8x128xf32>
    %638 = arith.divf %636, %637 : vector<8x128xf32>
    %639 = math.tanh %632 : vector<8x128xf32>
    %640 = arith.mulf %638, %639 : vector<8x128xf32>
    %641 = arith.subf %640, %628 : vector<8x128xf32>
    %642 = vector.broadcast %5 : vector<1x128xf32> to vector<8x128xf32>
    %643 = arith.mulf %641, %642 : vector<8x128xf32>
    %cst_152 = arith.constant dense<0.000000e+00> : vector<8xf32>
    %644 = vector.multi_reduction <add>, %643, %cst_152 [1] : vector<8x128xf32> to vector<8xf32>
    %645 = vector.shape_cast %644 : vector<8xf32> to vector<8x1xf32>
    %cst_153 = arith.constant 1.562500e-02 : f32
    %646 = vector.broadcast %cst_153 : f32 to vector<8x1xf32>
    %647 = arith.mulf %645, %646 : vector<8x1xf32>
    %648 = vector.broadcast %647 : vector<8x1xf32> to vector<8x128xf32>
    %649 = arith.subf %643, %648 : vector<8x128xf32>
    %650 = vector.broadcast %8 : vector<1x128xf32> to vector<8x128xf32>
    %651 = arith.mulf %649, %650 : vector<8x128xf32>
    %652 = arith.mulf %651, %651 : vector<8x128xf32>
    %cst_154 = arith.constant dense<0.000000e+00> : vector<8xf32>
    %653 = vector.multi_reduction <add>, %652, %cst_154 [1] : vector<8x128xf32> to vector<8xf32>
    %654 = vector.shape_cast %653 : vector<8xf32> to vector<8x1xf32>
    %cst_155 = arith.constant 1.562500e-02 : f32
    %655 = vector.broadcast %cst_155 : f32 to vector<8x1xf32>
    %656 = arith.mulf %654, %655 : vector<8x1xf32>
    %cst_156 = arith.constant 9.99999974E-6 : f32
    %657 = vector.broadcast %cst_156 : f32 to vector<8x1xf32>
    %658 = arith.addf %656, %657 : vector<8x1xf32>
    %659 = math.rsqrt %658 : vector<8x1xf32>
    %660 = vector.broadcast %659 : vector<8x1xf32> to vector<8x128xf32>
    %661 = arith.mulf %651, %660 : vector<8x128xf32>
    %662 = vector.broadcast %6 : vector<1x128xf32> to vector<8x128xf32>
    %663 = arith.mulf %661, %662 : vector<8x128xf32>
    %664 = vector.broadcast %7 : vector<1x128xf32> to vector<8x128xf32>
    %665 = arith.addf %663, %664 : vector<8x128xf32>
    %666 = arith.subf %584, %624 : vector<8x128xf32>
    %667 = arith.addf %666, %665 : vector<8x128xf32>
    %668 = arith.addf %537, %667 : vector<8x128xf32>
    %669 = arith.truncf %668 : vector<8x128xf32> to vector<8x128xbf16>
    %cst_157 = arith.constant dense<0.000000e+00> : vector<8x256xf32>
    %670 = tpu.matmul %669, %4, %cst_157 {dimension_numbers = #tpu.dot_dimension_numbers<[1], [0], [0], [1], [0, 0, 1, 1], [], []>} : vector<8x128xbf16>, vector<128x256xbf16>, vector<8x256xf32> -> vector<8x256xf32>
    %671 = vector.extract_strided_slice %670 {offsets = [0, 0], sizes = [8, 128], strides = [1, 1]} : vector<8x256xf32> to vector<8x128xf32>
    %672 = arith.addf %547, %671 : vector<8x128xf32>
    %673 = vector.extract_strided_slice %670 {offsets = [0, 128], sizes = [8, 128], strides = [1, 1]} : vector<8x256xf32> to vector<8x128xf32>
    %674 = arith.negf %673 : vector<8x128xf32>
    %675 = math.exp %674 : vector<8x128xf32>
    %cst_158 = arith.constant 1.000000e+00 : f32
    %676 = vector.broadcast %cst_158 : f32 to vector<8x128xf32>
    %677 = arith.addf %676, %675 : vector<8x128xf32>
    %678 = arith.divf %676, %677 : vector<8x128xf32>
    %679 = math.tanh %672 : vector<8x128xf32>
    %680 = arith.mulf %678, %679 : vector<8x128xf32>
    %681 = arith.subf %680, %668 : vector<8x128xf32>
    %682 = vector.broadcast %5 : vector<1x128xf32> to vector<8x128xf32>
    %683 = arith.mulf %681, %682 : vector<8x128xf32>
    %cst_159 = arith.constant dense<0.000000e+00> : vector<8xf32>
    %684 = vector.multi_reduction <add>, %683, %cst_159 [1] : vector<8x128xf32> to vector<8xf32>
    %685 = vector.shape_cast %684 : vector<8xf32> to vector<8x1xf32>
    %cst_160 = arith.constant 1.562500e-02 : f32
    %686 = vector.broadcast %cst_160 : f32 to vector<8x1xf32>
    %687 = arith.mulf %685, %686 : vector<8x1xf32>
    %688 = vector.broadcast %687 : vector<8x1xf32> to vector<8x128xf32>
    %689 = arith.subf %683, %688 : vector<8x128xf32>
    %690 = vector.broadcast %8 : vector<1x128xf32> to vector<8x128xf32>
    %691 = arith.mulf %689, %690 : vector<8x128xf32>
    %692 = arith.mulf %691, %691 : vector<8x128xf32>
    %cst_161 = arith.constant dense<0.000000e+00> : vector<8xf32>
    %693 = vector.multi_reduction <add>, %692, %cst_161 [1] : vector<8x128xf32> to vector<8xf32>
    %694 = vector.shape_cast %693 : vector<8xf32> to vector<8x1xf32>
    %cst_162 = arith.constant 1.562500e-02 : f32
    %695 = vector.broadcast %cst_162 : f32 to vector<8x1xf32>
    %696 = arith.mulf %694, %695 : vector<8x1xf32>
    %cst_163 = arith.constant 9.99999974E-6 : f32
    %697 = vector.broadcast %cst_163 : f32 to vector<8x1xf32>
    %698 = arith.addf %696, %697 : vector<8x1xf32>
    %699 = math.rsqrt %698 : vector<8x1xf32>
    %700 = vector.broadcast %699 : vector<8x1xf32> to vector<8x128xf32>
    %701 = arith.mulf %691, %700 : vector<8x128xf32>
    %702 = vector.broadcast %6 : vector<1x128xf32> to vector<8x128xf32>
    %703 = arith.mulf %701, %702 : vector<8x128xf32>
    %704 = vector.broadcast %7 : vector<1x128xf32> to vector<8x128xf32>
    %705 = arith.addf %703, %704 : vector<8x128xf32>
    %706 = arith.addf %624, %665 : vector<8x128xf32>
    %cst_164 = arith.constant 3.000000e+00 : f32
    %707 = vector.broadcast %cst_164 : f32 to vector<8x128xf32>
    %708 = arith.mulf %707, %706 : vector<8x128xf32>
    %709 = arith.addf %584, %708 : vector<8x128xf32>
    %710 = arith.addf %709, %705 : vector<8x128xf32>
    %cst_165 = arith.constant 1.250000e-01 : f32
    %711 = vector.broadcast %cst_165 : f32 to vector<8x128xf32>
    %712 = arith.mulf %710, %711 : vector<8x128xf32>
    %713 = arith.addf %537, %712 : vector<8x128xf32>
    %c4_i32 = arith.constant 4 : i32
    %c8_i32_166 = arith.constant 8 : i32
    %714 = arith.muli %c4_i32, %c8_i32_166 : i32
    %715 = tpu.assume_multiple %714, 8 : i32
    %716 = arith.index_cast %715 : i32 to index
    %c0_167 = arith.constant 0 : index
    %717 = vector.load %arg11[%716, %c0_167] : memref<64x128xf32, #tpu.memory_space<vmem>>, vector<8x128xf32>
    %c1_i32_168 = arith.constant 1 : i32
    %718 = arith.addi %c4_i32, %c1_i32_168 : i32
    %c7_i32_169 = arith.constant 7 : i32
    %719 = arith.minsi %718, %c7_i32_169 : i32
    %c8_i32_170 = arith.constant 8 : i32
    %720 = arith.muli %719, %c8_i32_170 : i32
    %721 = tpu.assume_multiple %720, 8 : i32
    %722 = arith.index_cast %721 : i32 to index
    %c0_171 = arith.constant 0 : index
    %723 = vector.load %arg11[%722, %c0_171] : memref<64x128xf32, #tpu.memory_space<vmem>>, vector<8x128xf32>
    %724 = arith.truncf %713 : vector<8x128xf32> to vector<8x128xbf16>
    %cst_172 = arith.constant dense<0.000000e+00> : vector<8x256xf32>
    %725 = tpu.matmul %724, %4, %cst_172 {dimension_numbers = #tpu.dot_dimension_numbers<[1], [0], [0], [1], [0, 0, 1, 1], [], []>} : vector<8x128xbf16>, vector<128x256xbf16>, vector<8x256xf32> -> vector<8x256xf32>
    %726 = vector.extract_strided_slice %725 {offsets = [0, 0], sizes = [8, 128], strides = [1, 1]} : vector<8x256xf32> to vector<8x128xf32>
    %727 = arith.addf %717, %726 : vector<8x128xf32>
    %728 = vector.extract_strided_slice %725 {offsets = [0, 128], sizes = [8, 128], strides = [1, 1]} : vector<8x256xf32> to vector<8x128xf32>
    %729 = arith.negf %728 : vector<8x128xf32>
    %730 = math.exp %729 : vector<8x128xf32>
    %cst_173 = arith.constant 1.000000e+00 : f32
    %731 = vector.broadcast %cst_173 : f32 to vector<8x128xf32>
    %732 = arith.addf %731, %730 : vector<8x128xf32>
    %733 = arith.divf %731, %732 : vector<8x128xf32>
    %734 = math.tanh %727 : vector<8x128xf32>
    %735 = arith.mulf %733, %734 : vector<8x128xf32>
    %736 = arith.subf %735, %713 : vector<8x128xf32>
    %737 = vector.broadcast %5 : vector<1x128xf32> to vector<8x128xf32>
    %738 = arith.mulf %736, %737 : vector<8x128xf32>
    %cst_174 = arith.constant dense<0.000000e+00> : vector<8xf32>
    %739 = vector.multi_reduction <add>, %738, %cst_174 [1] : vector<8x128xf32> to vector<8xf32>
    %740 = vector.shape_cast %739 : vector<8xf32> to vector<8x1xf32>
    %cst_175 = arith.constant 1.562500e-02 : f32
    %741 = vector.broadcast %cst_175 : f32 to vector<8x1xf32>
    %742 = arith.mulf %740, %741 : vector<8x1xf32>
    %743 = vector.broadcast %742 : vector<8x1xf32> to vector<8x128xf32>
    %744 = arith.subf %738, %743 : vector<8x128xf32>
    %745 = vector.broadcast %8 : vector<1x128xf32> to vector<8x128xf32>
    %746 = arith.mulf %744, %745 : vector<8x128xf32>
    %747 = arith.mulf %746, %746 : vector<8x128xf32>
    %cst_176 = arith.constant dense<0.000000e+00> : vector<8xf32>
    %748 = vector.multi_reduction <add>, %747, %cst_176 [1] : vector<8x128xf32> to vector<8xf32>
    %749 = vector.shape_cast %748 : vector<8xf32> to vector<8x1xf32>
    %cst_177 = arith.constant 1.562500e-02 : f32
    %750 = vector.broadcast %cst_177 : f32 to vector<8x1xf32>
    %751 = arith.mulf %749, %750 : vector<8x1xf32>
    %cst_178 = arith.constant 9.99999974E-6 : f32
    %752 = vector.broadcast %cst_178 : f32 to vector<8x1xf32>
    %753 = arith.addf %751, %752 : vector<8x1xf32>
    %754 = math.rsqrt %753 : vector<8x1xf32>
    %755 = vector.broadcast %754 : vector<8x1xf32> to vector<8x128xf32>
    %756 = arith.mulf %746, %755 : vector<8x128xf32>
    %757 = vector.broadcast %6 : vector<1x128xf32> to vector<8x128xf32>
    %758 = arith.mulf %756, %757 : vector<8x128xf32>
    %759 = vector.broadcast %7 : vector<1x128xf32> to vector<8x128xf32>
    %760 = arith.addf %758, %759 : vector<8x128xf32>
    %cst_179 = arith.constant 0.333333343 : f32
    %761 = vector.broadcast %cst_179 : f32 to vector<8x128xf32>
    %762 = arith.mulf %760, %761 : vector<8x128xf32>
    %763 = arith.addf %713, %762 : vector<8x128xf32>
    %764 = arith.truncf %763 : vector<8x128xf32> to vector<8x128xbf16>
    %cst_180 = arith.constant dense<0.000000e+00> : vector<8x256xf32>
    %765 = tpu.matmul %764, %4, %cst_180 {dimension_numbers = #tpu.dot_dimension_numbers<[1], [0], [0], [1], [0, 0, 1, 1], [], []>} : vector<8x128xbf16>, vector<128x256xbf16>, vector<8x256xf32> -> vector<8x256xf32>
    %766 = vector.extract_strided_slice %765 {offsets = [0, 0], sizes = [8, 128], strides = [1, 1]} : vector<8x256xf32> to vector<8x128xf32>
    %767 = arith.addf %717, %766 : vector<8x128xf32>
    %768 = vector.extract_strided_slice %765 {offsets = [0, 128], sizes = [8, 128], strides = [1, 1]} : vector<8x256xf32> to vector<8x128xf32>
    %769 = arith.negf %768 : vector<8x128xf32>
    %770 = math.exp %769 : vector<8x128xf32>
    %cst_181 = arith.constant 1.000000e+00 : f32
    %771 = vector.broadcast %cst_181 : f32 to vector<8x128xf32>
    %772 = arith.addf %771, %770 : vector<8x128xf32>
    %773 = arith.divf %771, %772 : vector<8x128xf32>
    %774 = math.tanh %767 : vector<8x128xf32>
    %775 = arith.mulf %773, %774 : vector<8x128xf32>
    %776 = arith.subf %775, %763 : vector<8x128xf32>
    %777 = vector.broadcast %5 : vector<1x128xf32> to vector<8x128xf32>
    %778 = arith.mulf %776, %777 : vector<8x128xf32>
    %cst_182 = arith.constant dense<0.000000e+00> : vector<8xf32>
    %779 = vector.multi_reduction <add>, %778, %cst_182 [1] : vector<8x128xf32> to vector<8xf32>
    %780 = vector.shape_cast %779 : vector<8xf32> to vector<8x1xf32>
    %cst_183 = arith.constant 1.562500e-02 : f32
    %781 = vector.broadcast %cst_183 : f32 to vector<8x1xf32>
    %782 = arith.mulf %780, %781 : vector<8x1xf32>
    %783 = vector.broadcast %782 : vector<8x1xf32> to vector<8x128xf32>
    %784 = arith.subf %778, %783 : vector<8x128xf32>
    %785 = vector.broadcast %8 : vector<1x128xf32> to vector<8x128xf32>
    %786 = arith.mulf %784, %785 : vector<8x128xf32>
    %787 = arith.mulf %786, %786 : vector<8x128xf32>
    %cst_184 = arith.constant dense<0.000000e+00> : vector<8xf32>
    %788 = vector.multi_reduction <add>, %787, %cst_184 [1] : vector<8x128xf32> to vector<8xf32>
    %789 = vector.shape_cast %788 : vector<8xf32> to vector<8x1xf32>
    %cst_185 = arith.constant 1.562500e-02 : f32
    %790 = vector.broadcast %cst_185 : f32 to vector<8x1xf32>
    %791 = arith.mulf %789, %790 : vector<8x1xf32>
    %cst_186 = arith.constant 9.99999974E-6 : f32
    %792 = vector.broadcast %cst_186 : f32 to vector<8x1xf32>
    %793 = arith.addf %791, %792 : vector<8x1xf32>
    %794 = math.rsqrt %793 : vector<8x1xf32>
    %795 = vector.broadcast %794 : vector<8x1xf32> to vector<8x128xf32>
    %796 = arith.mulf %786, %795 : vector<8x128xf32>
    %797 = vector.broadcast %6 : vector<1x128xf32> to vector<8x128xf32>
    %798 = arith.mulf %796, %797 : vector<8x128xf32>
    %799 = vector.broadcast %7 : vector<1x128xf32> to vector<8x128xf32>
    %800 = arith.addf %798, %799 : vector<8x128xf32>
    %cst_187 = arith.constant 0.333333343 : f32
    %801 = vector.broadcast %cst_187 : f32 to vector<8x128xf32>
    %802 = arith.mulf %760, %801 : vector<8x128xf32>
    %803 = arith.subf %800, %802 : vector<8x128xf32>
    %804 = arith.addf %713, %803 : vector<8x128xf32>
    %805 = arith.truncf %804 : vector<8x128xf32> to vector<8x128xbf16>
    %cst_188 = arith.constant dense<0.000000e+00> : vector<8x256xf32>
    %806 = tpu.matmul %805, %4, %cst_188 {dimension_numbers = #tpu.dot_dimension_numbers<[1], [0], [0], [1], [0, 0, 1, 1], [], []>} : vector<8x128xbf16>, vector<128x256xbf16>, vector<8x256xf32> -> vector<8x256xf32>
    %807 = vector.extract_strided_slice %806 {offsets = [0, 0], sizes = [8, 128], strides = [1, 1]} : vector<8x256xf32> to vector<8x128xf32>
    %808 = arith.addf %717, %807 : vector<8x128xf32>
    %809 = vector.extract_strided_slice %806 {offsets = [0, 128], sizes = [8, 128], strides = [1, 1]} : vector<8x256xf32> to vector<8x128xf32>
    %810 = arith.negf %809 : vector<8x128xf32>
    %811 = math.exp %810 : vector<8x128xf32>
    %cst_189 = arith.constant 1.000000e+00 : f32
    %812 = vector.broadcast %cst_189 : f32 to vector<8x128xf32>
    %813 = arith.addf %812, %811 : vector<8x128xf32>
    %814 = arith.divf %812, %813 : vector<8x128xf32>
    %815 = math.tanh %808 : vector<8x128xf32>
    %816 = arith.mulf %814, %815 : vector<8x128xf32>
    %817 = arith.subf %816, %804 : vector<8x128xf32>
    %818 = vector.broadcast %5 : vector<1x128xf32> to vector<8x128xf32>
    %819 = arith.mulf %817, %818 : vector<8x128xf32>
    %cst_190 = arith.constant dense<0.000000e+00> : vector<8xf32>
    %820 = vector.multi_reduction <add>, %819, %cst_190 [1] : vector<8x128xf32> to vector<8xf32>
    %821 = vector.shape_cast %820 : vector<8xf32> to vector<8x1xf32>
    %cst_191 = arith.constant 1.562500e-02 : f32
    %822 = vector.broadcast %cst_191 : f32 to vector<8x1xf32>
    %823 = arith.mulf %821, %822 : vector<8x1xf32>
    %824 = vector.broadcast %823 : vector<8x1xf32> to vector<8x128xf32>
    %825 = arith.subf %819, %824 : vector<8x128xf32>
    %826 = vector.broadcast %8 : vector<1x128xf32> to vector<8x128xf32>
    %827 = arith.mulf %825, %826 : vector<8x128xf32>
    %828 = arith.mulf %827, %827 : vector<8x128xf32>
    %cst_192 = arith.constant dense<0.000000e+00> : vector<8xf32>
    %829 = vector.multi_reduction <add>, %828, %cst_192 [1] : vector<8x128xf32> to vector<8xf32>
    %830 = vector.shape_cast %829 : vector<8xf32> to vector<8x1xf32>
    %cst_193 = arith.constant 1.562500e-02 : f32
    %831 = vector.broadcast %cst_193 : f32 to vector<8x1xf32>
    %832 = arith.mulf %830, %831 : vector<8x1xf32>
    %cst_194 = arith.constant 9.99999974E-6 : f32
    %833 = vector.broadcast %cst_194 : f32 to vector<8x1xf32>
    %834 = arith.addf %832, %833 : vector<8x1xf32>
    %835 = math.rsqrt %834 : vector<8x1xf32>
    %836 = vector.broadcast %835 : vector<8x1xf32> to vector<8x128xf32>
    %837 = arith.mulf %827, %836 : vector<8x128xf32>
    %838 = vector.broadcast %6 : vector<1x128xf32> to vector<8x128xf32>
    %839 = arith.mulf %837, %838 : vector<8x128xf32>
    %840 = vector.broadcast %7 : vector<1x128xf32> to vector<8x128xf32>
    %841 = arith.addf %839, %840 : vector<8x128xf32>
    %842 = arith.subf %760, %800 : vector<8x128xf32>
    %843 = arith.addf %842, %841 : vector<8x128xf32>
    %844 = arith.addf %713, %843 : vector<8x128xf32>
    %845 = arith.truncf %844 : vector<8x128xf32> to vector<8x128xbf16>
    %cst_195 = arith.constant dense<0.000000e+00> : vector<8x256xf32>
    %846 = tpu.matmul %845, %4, %cst_195 {dimension_numbers = #tpu.dot_dimension_numbers<[1], [0], [0], [1], [0, 0, 1, 1], [], []>} : vector<8x128xbf16>, vector<128x256xbf16>, vector<8x256xf32> -> vector<8x256xf32>
    %847 = vector.extract_strided_slice %846 {offsets = [0, 0], sizes = [8, 128], strides = [1, 1]} : vector<8x256xf32> to vector<8x128xf32>
    %848 = arith.addf %723, %847 : vector<8x128xf32>
    %849 = vector.extract_strided_slice %846 {offsets = [0, 128], sizes = [8, 128], strides = [1, 1]} : vector<8x256xf32> to vector<8x128xf32>
    %850 = arith.negf %849 : vector<8x128xf32>
    %851 = math.exp %850 : vector<8x128xf32>
    %cst_196 = arith.constant 1.000000e+00 : f32
    %852 = vector.broadcast %cst_196 : f32 to vector<8x128xf32>
    %853 = arith.addf %852, %851 : vector<8x128xf32>
    %854 = arith.divf %852, %853 : vector<8x128xf32>
    %855 = math.tanh %848 : vector<8x128xf32>
    %856 = arith.mulf %854, %855 : vector<8x128xf32>
    %857 = arith.subf %856, %844 : vector<8x128xf32>
    %858 = vector.broadcast %5 : vector<1x128xf32> to vector<8x128xf32>
    %859 = arith.mulf %857, %858 : vector<8x128xf32>
    %cst_197 = arith.constant dense<0.000000e+00> : vector<8xf32>
    %860 = vector.multi_reduction <add>, %859, %cst_197 [1] : vector<8x128xf32> to vector<8xf32>
    %861 = vector.shape_cast %860 : vector<8xf32> to vector<8x1xf32>
    %cst_198 = arith.constant 1.562500e-02 : f32
    %862 = vector.broadcast %cst_198 : f32 to vector<8x1xf32>
    %863 = arith.mulf %861, %862 : vector<8x1xf32>
    %864 = vector.broadcast %863 : vector<8x1xf32> to vector<8x128xf32>
    %865 = arith.subf %859, %864 : vector<8x128xf32>
    %866 = vector.broadcast %8 : vector<1x128xf32> to vector<8x128xf32>
    %867 = arith.mulf %865, %866 : vector<8x128xf32>
    %868 = arith.mulf %867, %867 : vector<8x128xf32>
    %cst_199 = arith.constant dense<0.000000e+00> : vector<8xf32>
    %869 = vector.multi_reduction <add>, %868, %cst_199 [1] : vector<8x128xf32> to vector<8xf32>
    %870 = vector.shape_cast %869 : vector<8xf32> to vector<8x1xf32>
    %cst_200 = arith.constant 1.562500e-02 : f32
    %871 = vector.broadcast %cst_200 : f32 to vector<8x1xf32>
    %872 = arith.mulf %870, %871 : vector<8x1xf32>
    %cst_201 = arith.constant 9.99999974E-6 : f32
    %873 = vector.broadcast %cst_201 : f32 to vector<8x1xf32>
    %874 = arith.addf %872, %873 : vector<8x1xf32>
    %875 = math.rsqrt %874 : vector<8x1xf32>
    %876 = vector.broadcast %875 : vector<8x1xf32> to vector<8x128xf32>
    %877 = arith.mulf %867, %876 : vector<8x128xf32>
    %878 = vector.broadcast %6 : vector<1x128xf32> to vector<8x128xf32>
    %879 = arith.mulf %877, %878 : vector<8x128xf32>
    %880 = vector.broadcast %7 : vector<1x128xf32> to vector<8x128xf32>
    %881 = arith.addf %879, %880 : vector<8x128xf32>
    %882 = arith.addf %800, %841 : vector<8x128xf32>
    %cst_202 = arith.constant 3.000000e+00 : f32
    %883 = vector.broadcast %cst_202 : f32 to vector<8x128xf32>
    %884 = arith.mulf %883, %882 : vector<8x128xf32>
    %885 = arith.addf %760, %884 : vector<8x128xf32>
    %886 = arith.addf %885, %881 : vector<8x128xf32>
    %cst_203 = arith.constant 1.250000e-01 : f32
    %887 = vector.broadcast %cst_203 : f32 to vector<8x128xf32>
    %888 = arith.mulf %886, %887 : vector<8x128xf32>
    %889 = arith.addf %713, %888 : vector<8x128xf32>
    %c5_i32 = arith.constant 5 : i32
    %c8_i32_204 = arith.constant 8 : i32
    %890 = arith.muli %c5_i32, %c8_i32_204 : i32
    %891 = tpu.assume_multiple %890, 8 : i32
    %892 = arith.index_cast %891 : i32 to index
    %c0_205 = arith.constant 0 : index
    %893 = vector.load %arg11[%892, %c0_205] : memref<64x128xf32, #tpu.memory_space<vmem>>, vector<8x128xf32>
    %c1_i32_206 = arith.constant 1 : i32
    %894 = arith.addi %c5_i32, %c1_i32_206 : i32
    %c7_i32_207 = arith.constant 7 : i32
    %895 = arith.minsi %894, %c7_i32_207 : i32
    %c8_i32_208 = arith.constant 8 : i32
    %896 = arith.muli %895, %c8_i32_208 : i32
    %897 = tpu.assume_multiple %896, 8 : i32
    %898 = arith.index_cast %897 : i32 to index
    %c0_209 = arith.constant 0 : index
    %899 = vector.load %arg11[%898, %c0_209] : memref<64x128xf32, #tpu.memory_space<vmem>>, vector<8x128xf32>
    %900 = arith.truncf %889 : vector<8x128xf32> to vector<8x128xbf16>
    %cst_210 = arith.constant dense<0.000000e+00> : vector<8x256xf32>
    %901 = tpu.matmul %900, %4, %cst_210 {dimension_numbers = #tpu.dot_dimension_numbers<[1], [0], [0], [1], [0, 0, 1, 1], [], []>} : vector<8x128xbf16>, vector<128x256xbf16>, vector<8x256xf32> -> vector<8x256xf32>
    %902 = vector.extract_strided_slice %901 {offsets = [0, 0], sizes = [8, 128], strides = [1, 1]} : vector<8x256xf32> to vector<8x128xf32>
    %903 = arith.addf %893, %902 : vector<8x128xf32>
    %904 = vector.extract_strided_slice %901 {offsets = [0, 128], sizes = [8, 128], strides = [1, 1]} : vector<8x256xf32> to vector<8x128xf32>
    %905 = arith.negf %904 : vector<8x128xf32>
    %906 = math.exp %905 : vector<8x128xf32>
    %cst_211 = arith.constant 1.000000e+00 : f32
    %907 = vector.broadcast %cst_211 : f32 to vector<8x128xf32>
    %908 = arith.addf %907, %906 : vector<8x128xf32>
    %909 = arith.divf %907, %908 : vector<8x128xf32>
    %910 = math.tanh %903 : vector<8x128xf32>
    %911 = arith.mulf %909, %910 : vector<8x128xf32>
    %912 = arith.subf %911, %889 : vector<8x128xf32>
    %913 = vector.broadcast %5 : vector<1x128xf32> to vector<8x128xf32>
    %914 = arith.mulf %912, %913 : vector<8x128xf32>
    %cst_212 = arith.constant dense<0.000000e+00> : vector<8xf32>
    %915 = vector.multi_reduction <add>, %914, %cst_212 [1] : vector<8x128xf32> to vector<8xf32>
    %916 = vector.shape_cast %915 : vector<8xf32> to vector<8x1xf32>
    %cst_213 = arith.constant 1.562500e-02 : f32
    %917 = vector.broadcast %cst_213 : f32 to vector<8x1xf32>
    %918 = arith.mulf %916, %917 : vector<8x1xf32>
    %919 = vector.broadcast %918 : vector<8x1xf32> to vector<8x128xf32>
    %920 = arith.subf %914, %919 : vector<8x128xf32>
    %921 = vector.broadcast %8 : vector<1x128xf32> to vector<8x128xf32>
    %922 = arith.mulf %920, %921 : vector<8x128xf32>
    %923 = arith.mulf %922, %922 : vector<8x128xf32>
    %cst_214 = arith.constant dense<0.000000e+00> : vector<8xf32>
    %924 = vector.multi_reduction <add>, %923, %cst_214 [1] : vector<8x128xf32> to vector<8xf32>
    %925 = vector.shape_cast %924 : vector<8xf32> to vector<8x1xf32>
    %cst_215 = arith.constant 1.562500e-02 : f32
    %926 = vector.broadcast %cst_215 : f32 to vector<8x1xf32>
    %927 = arith.mulf %925, %926 : vector<8x1xf32>
    %cst_216 = arith.constant 9.99999974E-6 : f32
    %928 = vector.broadcast %cst_216 : f32 to vector<8x1xf32>
    %929 = arith.addf %927, %928 : vector<8x1xf32>
    %930 = math.rsqrt %929 : vector<8x1xf32>
    %931 = vector.broadcast %930 : vector<8x1xf32> to vector<8x128xf32>
    %932 = arith.mulf %922, %931 : vector<8x128xf32>
    %933 = vector.broadcast %6 : vector<1x128xf32> to vector<8x128xf32>
    %934 = arith.mulf %932, %933 : vector<8x128xf32>
    %935 = vector.broadcast %7 : vector<1x128xf32> to vector<8x128xf32>
    %936 = arith.addf %934, %935 : vector<8x128xf32>
    %cst_217 = arith.constant 0.333333343 : f32
    %937 = vector.broadcast %cst_217 : f32 to vector<8x128xf32>
    %938 = arith.mulf %936, %937 : vector<8x128xf32>
    %939 = arith.addf %889, %938 : vector<8x128xf32>
    %940 = arith.truncf %939 : vector<8x128xf32> to vector<8x128xbf16>
    %cst_218 = arith.constant dense<0.000000e+00> : vector<8x256xf32>
    %941 = tpu.matmul %940, %4, %cst_218 {dimension_numbers = #tpu.dot_dimension_numbers<[1], [0], [0], [1], [0, 0, 1, 1], [], []>} : vector<8x128xbf16>, vector<128x256xbf16>, vector<8x256xf32> -> vector<8x256xf32>
    %942 = vector.extract_strided_slice %941 {offsets = [0, 0], sizes = [8, 128], strides = [1, 1]} : vector<8x256xf32> to vector<8x128xf32>
    %943 = arith.addf %893, %942 : vector<8x128xf32>
    %944 = vector.extract_strided_slice %941 {offsets = [0, 128], sizes = [8, 128], strides = [1, 1]} : vector<8x256xf32> to vector<8x128xf32>
    %945 = arith.negf %944 : vector<8x128xf32>
    %946 = math.exp %945 : vector<8x128xf32>
    %cst_219 = arith.constant 1.000000e+00 : f32
    %947 = vector.broadcast %cst_219 : f32 to vector<8x128xf32>
    %948 = arith.addf %947, %946 : vector<8x128xf32>
    %949 = arith.divf %947, %948 : vector<8x128xf32>
    %950 = math.tanh %943 : vector<8x128xf32>
    %951 = arith.mulf %949, %950 : vector<8x128xf32>
    %952 = arith.subf %951, %939 : vector<8x128xf32>
    %953 = vector.broadcast %5 : vector<1x128xf32> to vector<8x128xf32>
    %954 = arith.mulf %952, %953 : vector<8x128xf32>
    %cst_220 = arith.constant dense<0.000000e+00> : vector<8xf32>
    %955 = vector.multi_reduction <add>, %954, %cst_220 [1] : vector<8x128xf32> to vector<8xf32>
    %956 = vector.shape_cast %955 : vector<8xf32> to vector<8x1xf32>
    %cst_221 = arith.constant 1.562500e-02 : f32
    %957 = vector.broadcast %cst_221 : f32 to vector<8x1xf32>
    %958 = arith.mulf %956, %957 : vector<8x1xf32>
    %959 = vector.broadcast %958 : vector<8x1xf32> to vector<8x128xf32>
    %960 = arith.subf %954, %959 : vector<8x128xf32>
    %961 = vector.broadcast %8 : vector<1x128xf32> to vector<8x128xf32>
    %962 = arith.mulf %960, %961 : vector<8x128xf32>
    %963 = arith.mulf %962, %962 : vector<8x128xf32>
    %cst_222 = arith.constant dense<0.000000e+00> : vector<8xf32>
    %964 = vector.multi_reduction <add>, %963, %cst_222 [1] : vector<8x128xf32> to vector<8xf32>
    %965 = vector.shape_cast %964 : vector<8xf32> to vector<8x1xf32>
    %cst_223 = arith.constant 1.562500e-02 : f32
    %966 = vector.broadcast %cst_223 : f32 to vector<8x1xf32>
    %967 = arith.mulf %965, %966 : vector<8x1xf32>
    %cst_224 = arith.constant 9.99999974E-6 : f32
    %968 = vector.broadcast %cst_224 : f32 to vector<8x1xf32>
    %969 = arith.addf %967, %968 : vector<8x1xf32>
    %970 = math.rsqrt %969 : vector<8x1xf32>
    %971 = vector.broadcast %970 : vector<8x1xf32> to vector<8x128xf32>
    %972 = arith.mulf %962, %971 : vector<8x128xf32>
    %973 = vector.broadcast %6 : vector<1x128xf32> to vector<8x128xf32>
    %974 = arith.mulf %972, %973 : vector<8x128xf32>
    %975 = vector.broadcast %7 : vector<1x128xf32> to vector<8x128xf32>
    %976 = arith.addf %974, %975 : vector<8x128xf32>
    %cst_225 = arith.constant 0.333333343 : f32
    %977 = vector.broadcast %cst_225 : f32 to vector<8x128xf32>
    %978 = arith.mulf %936, %977 : vector<8x128xf32>
    %979 = arith.subf %976, %978 : vector<8x128xf32>
    %980 = arith.addf %889, %979 : vector<8x128xf32>
    %981 = arith.truncf %980 : vector<8x128xf32> to vector<8x128xbf16>
    %cst_226 = arith.constant dense<0.000000e+00> : vector<8x256xf32>
    %982 = tpu.matmul %981, %4, %cst_226 {dimension_numbers = #tpu.dot_dimension_numbers<[1], [0], [0], [1], [0, 0, 1, 1], [], []>} : vector<8x128xbf16>, vector<128x256xbf16>, vector<8x256xf32> -> vector<8x256xf32>
    %983 = vector.extract_strided_slice %982 {offsets = [0, 0], sizes = [8, 128], strides = [1, 1]} : vector<8x256xf32> to vector<8x128xf32>
    %984 = arith.addf %893, %983 : vector<8x128xf32>
    %985 = vector.extract_strided_slice %982 {offsets = [0, 128], sizes = [8, 128], strides = [1, 1]} : vector<8x256xf32> to vector<8x128xf32>
    %986 = arith.negf %985 : vector<8x128xf32>
    %987 = math.exp %986 : vector<8x128xf32>
    %cst_227 = arith.constant 1.000000e+00 : f32
    %988 = vector.broadcast %cst_227 : f32 to vector<8x128xf32>
    %989 = arith.addf %988, %987 : vector<8x128xf32>
    %990 = arith.divf %988, %989 : vector<8x128xf32>
    %991 = math.tanh %984 : vector<8x128xf32>
    %992 = arith.mulf %990, %991 : vector<8x128xf32>
    %993 = arith.subf %992, %980 : vector<8x128xf32>
    %994 = vector.broadcast %5 : vector<1x128xf32> to vector<8x128xf32>
    %995 = arith.mulf %993, %994 : vector<8x128xf32>
    %cst_228 = arith.constant dense<0.000000e+00> : vector<8xf32>
    %996 = vector.multi_reduction <add>, %995, %cst_228 [1] : vector<8x128xf32> to vector<8xf32>
    %997 = vector.shape_cast %996 : vector<8xf32> to vector<8x1xf32>
    %cst_229 = arith.constant 1.562500e-02 : f32
    %998 = vector.broadcast %cst_229 : f32 to vector<8x1xf32>
    %999 = arith.mulf %997, %998 : vector<8x1xf32>
    %1000 = vector.broadcast %999 : vector<8x1xf32> to vector<8x128xf32>
    %1001 = arith.subf %995, %1000 : vector<8x128xf32>
    %1002 = vector.broadcast %8 : vector<1x128xf32> to vector<8x128xf32>
    %1003 = arith.mulf %1001, %1002 : vector<8x128xf32>
    %1004 = arith.mulf %1003, %1003 : vector<8x128xf32>
    %cst_230 = arith.constant dense<0.000000e+00> : vector<8xf32>
    %1005 = vector.multi_reduction <add>, %1004, %cst_230 [1] : vector<8x128xf32> to vector<8xf32>
    %1006 = vector.shape_cast %1005 : vector<8xf32> to vector<8x1xf32>
    %cst_231 = arith.constant 1.562500e-02 : f32
    %1007 = vector.broadcast %cst_231 : f32 to vector<8x1xf32>
    %1008 = arith.mulf %1006, %1007 : vector<8x1xf32>
    %cst_232 = arith.constant 9.99999974E-6 : f32
    %1009 = vector.broadcast %cst_232 : f32 to vector<8x1xf32>
    %1010 = arith.addf %1008, %1009 : vector<8x1xf32>
    %1011 = math.rsqrt %1010 : vector<8x1xf32>
    %1012 = vector.broadcast %1011 : vector<8x1xf32> to vector<8x128xf32>
    %1013 = arith.mulf %1003, %1012 : vector<8x128xf32>
    %1014 = vector.broadcast %6 : vector<1x128xf32> to vector<8x128xf32>
    %1015 = arith.mulf %1013, %1014 : vector<8x128xf32>
    %1016 = vector.broadcast %7 : vector<1x128xf32> to vector<8x128xf32>
    %1017 = arith.addf %1015, %1016 : vector<8x128xf32>
    %1018 = arith.subf %936, %976 : vector<8x128xf32>
    %1019 = arith.addf %1018, %1017 : vector<8x128xf32>
    %1020 = arith.addf %889, %1019 : vector<8x128xf32>
    %1021 = arith.truncf %1020 : vector<8x128xf32> to vector<8x128xbf16>
    %cst_233 = arith.constant dense<0.000000e+00> : vector<8x256xf32>
    %1022 = tpu.matmul %1021, %4, %cst_233 {dimension_numbers = #tpu.dot_dimension_numbers<[1], [0], [0], [1], [0, 0, 1, 1], [], []>} : vector<8x128xbf16>, vector<128x256xbf16>, vector<8x256xf32> -> vector<8x256xf32>
    %1023 = vector.extract_strided_slice %1022 {offsets = [0, 0], sizes = [8, 128], strides = [1, 1]} : vector<8x256xf32> to vector<8x128xf32>
    %1024 = arith.addf %899, %1023 : vector<8x128xf32>
    %1025 = vector.extract_strided_slice %1022 {offsets = [0, 128], sizes = [8, 128], strides = [1, 1]} : vector<8x256xf32> to vector<8x128xf32>
    %1026 = arith.negf %1025 : vector<8x128xf32>
    %1027 = math.exp %1026 : vector<8x128xf32>
    %cst_234 = arith.constant 1.000000e+00 : f32
    %1028 = vector.broadcast %cst_234 : f32 to vector<8x128xf32>
    %1029 = arith.addf %1028, %1027 : vector<8x128xf32>
    %1030 = arith.divf %1028, %1029 : vector<8x128xf32>
    %1031 = math.tanh %1024 : vector<8x128xf32>
    %1032 = arith.mulf %1030, %1031 : vector<8x128xf32>
    %1033 = arith.subf %1032, %1020 : vector<8x128xf32>
    %1034 = vector.broadcast %5 : vector<1x128xf32> to vector<8x128xf32>
    %1035 = arith.mulf %1033, %1034 : vector<8x128xf32>
    %cst_235 = arith.constant dense<0.000000e+00> : vector<8xf32>
    %1036 = vector.multi_reduction <add>, %1035, %cst_235 [1] : vector<8x128xf32> to vector<8xf32>
    %1037 = vector.shape_cast %1036 : vector<8xf32> to vector<8x1xf32>
    %cst_236 = arith.constant 1.562500e-02 : f32
    %1038 = vector.broadcast %cst_236 : f32 to vector<8x1xf32>
    %1039 = arith.mulf %1037, %1038 : vector<8x1xf32>
    %1040 = vector.broadcast %1039 : vector<8x1xf32> to vector<8x128xf32>
    %1041 = arith.subf %1035, %1040 : vector<8x128xf32>
    %1042 = vector.broadcast %8 : vector<1x128xf32> to vector<8x128xf32>
    %1043 = arith.mulf %1041, %1042 : vector<8x128xf32>
    %1044 = arith.mulf %1043, %1043 : vector<8x128xf32>
    %cst_237 = arith.constant dense<0.000000e+00> : vector<8xf32>
    %1045 = vector.multi_reduction <add>, %1044, %cst_237 [1] : vector<8x128xf32> to vector<8xf32>
    %1046 = vector.shape_cast %1045 : vector<8xf32> to vector<8x1xf32>
    %cst_238 = arith.constant 1.562500e-02 : f32
    %1047 = vector.broadcast %cst_238 : f32 to vector<8x1xf32>
    %1048 = arith.mulf %1046, %1047 : vector<8x1xf32>
    %cst_239 = arith.constant 9.99999974E-6 : f32
    %1049 = vector.broadcast %cst_239 : f32 to vector<8x1xf32>
    %1050 = arith.addf %1048, %1049 : vector<8x1xf32>
    %1051 = math.rsqrt %1050 : vector<8x1xf32>
    %1052 = vector.broadcast %1051 : vector<8x1xf32> to vector<8x128xf32>
    %1053 = arith.mulf %1043, %1052 : vector<8x128xf32>
    %1054 = vector.broadcast %6 : vector<1x128xf32> to vector<8x128xf32>
    %1055 = arith.mulf %1053, %1054 : vector<8x128xf32>
    %1056 = vector.broadcast %7 : vector<1x128xf32> to vector<8x128xf32>
    %1057 = arith.addf %1055, %1056 : vector<8x128xf32>
    %1058 = arith.addf %976, %1017 : vector<8x128xf32>
    %cst_240 = arith.constant 3.000000e+00 : f32
    %1059 = vector.broadcast %cst_240 : f32 to vector<8x128xf32>
    %1060 = arith.mulf %1059, %1058 : vector<8x128xf32>
    %1061 = arith.addf %936, %1060 : vector<8x128xf32>
    %1062 = arith.addf %1061, %1057 : vector<8x128xf32>
    %cst_241 = arith.constant 1.250000e-01 : f32
    %1063 = vector.broadcast %cst_241 : f32 to vector<8x128xf32>
    %1064 = arith.mulf %1062, %1063 : vector<8x128xf32>
    %1065 = arith.addf %889, %1064 : vector<8x128xf32>
    %c6_i32 = arith.constant 6 : i32
    %c8_i32_242 = arith.constant 8 : i32
    %1066 = arith.muli %c6_i32, %c8_i32_242 : i32
    %1067 = tpu.assume_multiple %1066, 8 : i32
    %1068 = arith.index_cast %1067 : i32 to index
    %c0_243 = arith.constant 0 : index
    %1069 = vector.load %arg11[%1068, %c0_243] : memref<64x128xf32, #tpu.memory_space<vmem>>, vector<8x128xf32>
    %c1_i32_244 = arith.constant 1 : i32
    %1070 = arith.addi %c6_i32, %c1_i32_244 : i32
    %c7_i32_245 = arith.constant 7 : i32
    %1071 = arith.minsi %1070, %c7_i32_245 : i32
    %c8_i32_246 = arith.constant 8 : i32
    %1072 = arith.muli %1071, %c8_i32_246 : i32
    %1073 = tpu.assume_multiple %1072, 8 : i32
    %1074 = arith.index_cast %1073 : i32 to index
    %c0_247 = arith.constant 0 : index
    %1075 = vector.load %arg11[%1074, %c0_247] : memref<64x128xf32, #tpu.memory_space<vmem>>, vector<8x128xf32>
    %1076 = arith.truncf %1065 : vector<8x128xf32> to vector<8x128xbf16>
    %cst_248 = arith.constant dense<0.000000e+00> : vector<8x256xf32>
    %1077 = tpu.matmul %1076, %4, %cst_248 {dimension_numbers = #tpu.dot_dimension_numbers<[1], [0], [0], [1], [0, 0, 1, 1], [], []>} : vector<8x128xbf16>, vector<128x256xbf16>, vector<8x256xf32> -> vector<8x256xf32>
    %1078 = vector.extract_strided_slice %1077 {offsets = [0, 0], sizes = [8, 128], strides = [1, 1]} : vector<8x256xf32> to vector<8x128xf32>
    %1079 = arith.addf %1069, %1078 : vector<8x128xf32>
    %1080 = vector.extract_strided_slice %1077 {offsets = [0, 128], sizes = [8, 128], strides = [1, 1]} : vector<8x256xf32> to vector<8x128xf32>
    %1081 = arith.negf %1080 : vector<8x128xf32>
    %1082 = math.exp %1081 : vector<8x128xf32>
    %cst_249 = arith.constant 1.000000e+00 : f32
    %1083 = vector.broadcast %cst_249 : f32 to vector<8x128xf32>
    %1084 = arith.addf %1083, %1082 : vector<8x128xf32>
    %1085 = arith.divf %1083, %1084 : vector<8x128xf32>
    %1086 = math.tanh %1079 : vector<8x128xf32>
    %1087 = arith.mulf %1085, %1086 : vector<8x128xf32>
    %1088 = arith.subf %1087, %1065 : vector<8x128xf32>
    %1089 = vector.broadcast %5 : vector<1x128xf32> to vector<8x128xf32>
    %1090 = arith.mulf %1088, %1089 : vector<8x128xf32>
    %cst_250 = arith.constant dense<0.000000e+00> : vector<8xf32>
    %1091 = vector.multi_reduction <add>, %1090, %cst_250 [1] : vector<8x128xf32> to vector<8xf32>
    %1092 = vector.shape_cast %1091 : vector<8xf32> to vector<8x1xf32>
    %cst_251 = arith.constant 1.562500e-02 : f32
    %1093 = vector.broadcast %cst_251 : f32 to vector<8x1xf32>
    %1094 = arith.mulf %1092, %1093 : vector<8x1xf32>
    %1095 = vector.broadcast %1094 : vector<8x1xf32> to vector<8x128xf32>
    %1096 = arith.subf %1090, %1095 : vector<8x128xf32>
    %1097 = vector.broadcast %8 : vector<1x128xf32> to vector<8x128xf32>
    %1098 = arith.mulf %1096, %1097 : vector<8x128xf32>
    %1099 = arith.mulf %1098, %1098 : vector<8x128xf32>
    %cst_252 = arith.constant dense<0.000000e+00> : vector<8xf32>
    %1100 = vector.multi_reduction <add>, %1099, %cst_252 [1] : vector<8x128xf32> to vector<8xf32>
    %1101 = vector.shape_cast %1100 : vector<8xf32> to vector<8x1xf32>
    %cst_253 = arith.constant 1.562500e-02 : f32
    %1102 = vector.broadcast %cst_253 : f32 to vector<8x1xf32>
    %1103 = arith.mulf %1101, %1102 : vector<8x1xf32>
    %cst_254 = arith.constant 9.99999974E-6 : f32
    %1104 = vector.broadcast %cst_254 : f32 to vector<8x1xf32>
    %1105 = arith.addf %1103, %1104 : vector<8x1xf32>
    %1106 = math.rsqrt %1105 : vector<8x1xf32>
    %1107 = vector.broadcast %1106 : vector<8x1xf32> to vector<8x128xf32>
    %1108 = arith.mulf %1098, %1107 : vector<8x128xf32>
    %1109 = vector.broadcast %6 : vector<1x128xf32> to vector<8x128xf32>
    %1110 = arith.mulf %1108, %1109 : vector<8x128xf32>
    %1111 = vector.broadcast %7 : vector<1x128xf32> to vector<8x128xf32>
    %1112 = arith.addf %1110, %1111 : vector<8x128xf32>
    %cst_255 = arith.constant 0.333333343 : f32
    %1113 = vector.broadcast %cst_255 : f32 to vector<8x128xf32>
    %1114 = arith.mulf %1112, %1113 : vector<8x128xf32>
    %1115 = arith.addf %1065, %1114 : vector<8x128xf32>
    %1116 = arith.truncf %1115 : vector<8x128xf32> to vector<8x128xbf16>
    %cst_256 = arith.constant dense<0.000000e+00> : vector<8x256xf32>
    %1117 = tpu.matmul %1116, %4, %cst_256 {dimension_numbers = #tpu.dot_dimension_numbers<[1], [0], [0], [1], [0, 0, 1, 1], [], []>} : vector<8x128xbf16>, vector<128x256xbf16>, vector<8x256xf32> -> vector<8x256xf32>
    %1118 = vector.extract_strided_slice %1117 {offsets = [0, 0], sizes = [8, 128], strides = [1, 1]} : vector<8x256xf32> to vector<8x128xf32>
    %1119 = arith.addf %1069, %1118 : vector<8x128xf32>
    %1120 = vector.extract_strided_slice %1117 {offsets = [0, 128], sizes = [8, 128], strides = [1, 1]} : vector<8x256xf32> to vector<8x128xf32>
    %1121 = arith.negf %1120 : vector<8x128xf32>
    %1122 = math.exp %1121 : vector<8x128xf32>
    %cst_257 = arith.constant 1.000000e+00 : f32
    %1123 = vector.broadcast %cst_257 : f32 to vector<8x128xf32>
    %1124 = arith.addf %1123, %1122 : vector<8x128xf32>
    %1125 = arith.divf %1123, %1124 : vector<8x128xf32>
    %1126 = math.tanh %1119 : vector<8x128xf32>
    %1127 = arith.mulf %1125, %1126 : vector<8x128xf32>
    %1128 = arith.subf %1127, %1115 : vector<8x128xf32>
    %1129 = vector.broadcast %5 : vector<1x128xf32> to vector<8x128xf32>
    %1130 = arith.mulf %1128, %1129 : vector<8x128xf32>
    %cst_258 = arith.constant dense<0.000000e+00> : vector<8xf32>
    %1131 = vector.multi_reduction <add>, %1130, %cst_258 [1] : vector<8x128xf32> to vector<8xf32>
    %1132 = vector.shape_cast %1131 : vector<8xf32> to vector<8x1xf32>
    %cst_259 = arith.constant 1.562500e-02 : f32
    %1133 = vector.broadcast %cst_259 : f32 to vector<8x1xf32>
    %1134 = arith.mulf %1132, %1133 : vector<8x1xf32>
    %1135 = vector.broadcast %1134 : vector<8x1xf32> to vector<8x128xf32>
    %1136 = arith.subf %1130, %1135 : vector<8x128xf32>
    %1137 = vector.broadcast %8 : vector<1x128xf32> to vector<8x128xf32>
    %1138 = arith.mulf %1136, %1137 : vector<8x128xf32>
    %1139 = arith.mulf %1138, %1138 : vector<8x128xf32>
    %cst_260 = arith.constant dense<0.000000e+00> : vector<8xf32>
    %1140 = vector.multi_reduction <add>, %1139, %cst_260 [1] : vector<8x128xf32> to vector<8xf32>
    %1141 = vector.shape_cast %1140 : vector<8xf32> to vector<8x1xf32>
    %cst_261 = arith.constant 1.562500e-02 : f32
    %1142 = vector.broadcast %cst_261 : f32 to vector<8x1xf32>
    %1143 = arith.mulf %1141, %1142 : vector<8x1xf32>
    %cst_262 = arith.constant 9.99999974E-6 : f32
    %1144 = vector.broadcast %cst_262 : f32 to vector<8x1xf32>
    %1145 = arith.addf %1143, %1144 : vector<8x1xf32>
    %1146 = math.rsqrt %1145 : vector<8x1xf32>
    %1147 = vector.broadcast %1146 : vector<8x1xf32> to vector<8x128xf32>
    %1148 = arith.mulf %1138, %1147 : vector<8x128xf32>
    %1149 = vector.broadcast %6 : vector<1x128xf32> to vector<8x128xf32>
    %1150 = arith.mulf %1148, %1149 : vector<8x128xf32>
    %1151 = vector.broadcast %7 : vector<1x128xf32> to vector<8x128xf32>
    %1152 = arith.addf %1150, %1151 : vector<8x128xf32>
    %cst_263 = arith.constant 0.333333343 : f32
    %1153 = vector.broadcast %cst_263 : f32 to vector<8x128xf32>
    %1154 = arith.mulf %1112, %1153 : vector<8x128xf32>
    %1155 = arith.subf %1152, %1154 : vector<8x128xf32>
    %1156 = arith.addf %1065, %1155 : vector<8x128xf32>
    %1157 = arith.truncf %1156 : vector<8x128xf32> to vector<8x128xbf16>
    %cst_264 = arith.constant dense<0.000000e+00> : vector<8x256xf32>
    %1158 = tpu.matmul %1157, %4, %cst_264 {dimension_numbers = #tpu.dot_dimension_numbers<[1], [0], [0], [1], [0, 0, 1, 1], [], []>} : vector<8x128xbf16>, vector<128x256xbf16>, vector<8x256xf32> -> vector<8x256xf32>
    %1159 = vector.extract_strided_slice %1158 {offsets = [0, 0], sizes = [8, 128], strides = [1, 1]} : vector<8x256xf32> to vector<8x128xf32>
    %1160 = arith.addf %1069, %1159 : vector<8x128xf32>
    %1161 = vector.extract_strided_slice %1158 {offsets = [0, 128], sizes = [8, 128], strides = [1, 1]} : vector<8x256xf32> to vector<8x128xf32>
    %1162 = arith.negf %1161 : vector<8x128xf32>
    %1163 = math.exp %1162 : vector<8x128xf32>
    %cst_265 = arith.constant 1.000000e+00 : f32
    %1164 = vector.broadcast %cst_265 : f32 to vector<8x128xf32>
    %1165 = arith.addf %1164, %1163 : vector<8x128xf32>
    %1166 = arith.divf %1164, %1165 : vector<8x128xf32>
    %1167 = math.tanh %1160 : vector<8x128xf32>
    %1168 = arith.mulf %1166, %1167 : vector<8x128xf32>
    %1169 = arith.subf %1168, %1156 : vector<8x128xf32>
    %1170 = vector.broadcast %5 : vector<1x128xf32> to vector<8x128xf32>
    %1171 = arith.mulf %1169, %1170 : vector<8x128xf32>
    %cst_266 = arith.constant dense<0.000000e+00> : vector<8xf32>
    %1172 = vector.multi_reduction <add>, %1171, %cst_266 [1] : vector<8x128xf32> to vector<8xf32>
    %1173 = vector.shape_cast %1172 : vector<8xf32> to vector<8x1xf32>
    %cst_267 = arith.constant 1.562500e-02 : f32
    %1174 = vector.broadcast %cst_267 : f32 to vector<8x1xf32>
    %1175 = arith.mulf %1173, %1174 : vector<8x1xf32>
    %1176 = vector.broadcast %1175 : vector<8x1xf32> to vector<8x128xf32>
    %1177 = arith.subf %1171, %1176 : vector<8x128xf32>
    %1178 = vector.broadcast %8 : vector<1x128xf32> to vector<8x128xf32>
    %1179 = arith.mulf %1177, %1178 : vector<8x128xf32>
    %1180 = arith.mulf %1179, %1179 : vector<8x128xf32>
    %cst_268 = arith.constant dense<0.000000e+00> : vector<8xf32>
    %1181 = vector.multi_reduction <add>, %1180, %cst_268 [1] : vector<8x128xf32> to vector<8xf32>
    %1182 = vector.shape_cast %1181 : vector<8xf32> to vector<8x1xf32>
    %cst_269 = arith.constant 1.562500e-02 : f32
    %1183 = vector.broadcast %cst_269 : f32 to vector<8x1xf32>
    %1184 = arith.mulf %1182, %1183 : vector<8x1xf32>
    %cst_270 = arith.constant 9.99999974E-6 : f32
    %1185 = vector.broadcast %cst_270 : f32 to vector<8x1xf32>
    %1186 = arith.addf %1184, %1185 : vector<8x1xf32>
    %1187 = math.rsqrt %1186 : vector<8x1xf32>
    %1188 = vector.broadcast %1187 : vector<8x1xf32> to vector<8x128xf32>
    %1189 = arith.mulf %1179, %1188 : vector<8x128xf32>
    %1190 = vector.broadcast %6 : vector<1x128xf32> to vector<8x128xf32>
    %1191 = arith.mulf %1189, %1190 : vector<8x128xf32>
    %1192 = vector.broadcast %7 : vector<1x128xf32> to vector<8x128xf32>
    %1193 = arith.addf %1191, %1192 : vector<8x128xf32>
    %1194 = arith.subf %1112, %1152 : vector<8x128xf32>
    %1195 = arith.addf %1194, %1193 : vector<8x128xf32>
    %1196 = arith.addf %1065, %1195 : vector<8x128xf32>
    %1197 = arith.truncf %1196 : vector<8x128xf32> to vector<8x128xbf16>
    %cst_271 = arith.constant dense<0.000000e+00> : vector<8x256xf32>
    %1198 = tpu.matmul %1197, %4, %cst_271 {dimension_numbers = #tpu.dot_dimension_numbers<[1], [0], [0], [1], [0, 0, 1, 1], [], []>} : vector<8x128xbf16>, vector<128x256xbf16>, vector<8x256xf32> -> vector<8x256xf32>
    %1199 = vector.extract_strided_slice %1198 {offsets = [0, 0], sizes = [8, 128], strides = [1, 1]} : vector<8x256xf32> to vector<8x128xf32>
    %1200 = arith.addf %1075, %1199 : vector<8x128xf32>
    %1201 = vector.extract_strided_slice %1198 {offsets = [0, 128], sizes = [8, 128], strides = [1, 1]} : vector<8x256xf32> to vector<8x128xf32>
    %1202 = arith.negf %1201 : vector<8x128xf32>
    %1203 = math.exp %1202 : vector<8x128xf32>
    %cst_272 = arith.constant 1.000000e+00 : f32
    %1204 = vector.broadcast %cst_272 : f32 to vector<8x128xf32>
    %1205 = arith.addf %1204, %1203 : vector<8x128xf32>
    %1206 = arith.divf %1204, %1205 : vector<8x128xf32>
    %1207 = math.tanh %1200 : vector<8x128xf32>
    %1208 = arith.mulf %1206, %1207 : vector<8x128xf32>
    %1209 = arith.subf %1208, %1196 : vector<8x128xf32>
    %1210 = vector.broadcast %5 : vector<1x128xf32> to vector<8x128xf32>
    %1211 = arith.mulf %1209, %1210 : vector<8x128xf32>
    %cst_273 = arith.constant dense<0.000000e+00> : vector<8xf32>
    %1212 = vector.multi_reduction <add>, %1211, %cst_273 [1] : vector<8x128xf32> to vector<8xf32>
    %1213 = vector.shape_cast %1212 : vector<8xf32> to vector<8x1xf32>
    %cst_274 = arith.constant 1.562500e-02 : f32
    %1214 = vector.broadcast %cst_274 : f32 to vector<8x1xf32>
    %1215 = arith.mulf %1213, %1214 : vector<8x1xf32>
    %1216 = vector.broadcast %1215 : vector<8x1xf32> to vector<8x128xf32>
    %1217 = arith.subf %1211, %1216 : vector<8x128xf32>
    %1218 = vector.broadcast %8 : vector<1x128xf32> to vector<8x128xf32>
    %1219 = arith.mulf %1217, %1218 : vector<8x128xf32>
    %1220 = arith.mulf %1219, %1219 : vector<8x128xf32>
    %cst_275 = arith.constant dense<0.000000e+00> : vector<8xf32>
    %1221 = vector.multi_reduction <add>, %1220, %cst_275 [1] : vector<8x128xf32> to vector<8xf32>
    %1222 = vector.shape_cast %1221 : vector<8xf32> to vector<8x1xf32>
    %cst_276 = arith.constant 1.562500e-02 : f32
    %1223 = vector.broadcast %cst_276 : f32 to vector<8x1xf32>
    %1224 = arith.mulf %1222, %1223 : vector<8x1xf32>
    %cst_277 = arith.constant 9.99999974E-6 : f32
    %1225 = vector.broadcast %cst_277 : f32 to vector<8x1xf32>
    %1226 = arith.addf %1224, %1225 : vector<8x1xf32>
    %1227 = math.rsqrt %1226 : vector<8x1xf32>
    %1228 = vector.broadcast %1227 : vector<8x1xf32> to vector<8x128xf32>
    %1229 = arith.mulf %1219, %1228 : vector<8x128xf32>
    %1230 = vector.broadcast %6 : vector<1x128xf32> to vector<8x128xf32>
    %1231 = arith.mulf %1229, %1230 : vector<8x128xf32>
    %1232 = vector.broadcast %7 : vector<1x128xf32> to vector<8x128xf32>
    %1233 = arith.addf %1231, %1232 : vector<8x128xf32>
    %1234 = arith.addf %1152, %1193 : vector<8x128xf32>
    %cst_278 = arith.constant 3.000000e+00 : f32
    %1235 = vector.broadcast %cst_278 : f32 to vector<8x128xf32>
    %1236 = arith.mulf %1235, %1234 : vector<8x128xf32>
    %1237 = arith.addf %1112, %1236 : vector<8x128xf32>
    %1238 = arith.addf %1237, %1233 : vector<8x128xf32>
    %cst_279 = arith.constant 1.250000e-01 : f32
    %1239 = vector.broadcast %cst_279 : f32 to vector<8x128xf32>
    %1240 = arith.mulf %1238, %1239 : vector<8x128xf32>
    %1241 = arith.addf %1065, %1240 : vector<8x128xf32>
    %c7_i32_280 = arith.constant 7 : i32
    %c8_i32_281 = arith.constant 8 : i32
    %1242 = arith.muli %c7_i32_280, %c8_i32_281 : i32
    %1243 = tpu.assume_multiple %1242, 8 : i32
    %1244 = arith.index_cast %1243 : i32 to index
    %c0_282 = arith.constant 0 : index
    %1245 = vector.load %arg11[%1244, %c0_282] : memref<64x128xf32, #tpu.memory_space<vmem>>, vector<8x128xf32>
    %c1_i32_283 = arith.constant 1 : i32
    %1246 = arith.addi %c7_i32_280, %c1_i32_283 : i32
    %c7_i32_284 = arith.constant 7 : i32
    %1247 = arith.minsi %1246, %c7_i32_284 : i32
    %c8_i32_285 = arith.constant 8 : i32
    %1248 = arith.muli %1247, %c8_i32_285 : i32
    %1249 = tpu.assume_multiple %1248, 8 : i32
    %1250 = arith.index_cast %1249 : i32 to index
    %c0_286 = arith.constant 0 : index
    %1251 = vector.load %arg11[%1250, %c0_286] : memref<64x128xf32, #tpu.memory_space<vmem>>, vector<8x128xf32>
    %1252 = arith.truncf %1241 : vector<8x128xf32> to vector<8x128xbf16>
    %cst_287 = arith.constant dense<0.000000e+00> : vector<8x256xf32>
    %1253 = tpu.matmul %1252, %4, %cst_287 {dimension_numbers = #tpu.dot_dimension_numbers<[1], [0], [0], [1], [0, 0, 1, 1], [], []>} : vector<8x128xbf16>, vector<128x256xbf16>, vector<8x256xf32> -> vector<8x256xf32>
    %1254 = vector.extract_strided_slice %1253 {offsets = [0, 0], sizes = [8, 128], strides = [1, 1]} : vector<8x256xf32> to vector<8x128xf32>
    %1255 = arith.addf %1245, %1254 : vector<8x128xf32>
    %1256 = vector.extract_strided_slice %1253 {offsets = [0, 128], sizes = [8, 128], strides = [1, 1]} : vector<8x256xf32> to vector<8x128xf32>
    %1257 = arith.negf %1256 : vector<8x128xf32>
    %1258 = math.exp %1257 : vector<8x128xf32>
    %cst_288 = arith.constant 1.000000e+00 : f32
    %1259 = vector.broadcast %cst_288 : f32 to vector<8x128xf32>
    %1260 = arith.addf %1259, %1258 : vector<8x128xf32>
    %1261 = arith.divf %1259, %1260 : vector<8x128xf32>
    %1262 = math.tanh %1255 : vector<8x128xf32>
    %1263 = arith.mulf %1261, %1262 : vector<8x128xf32>
    %1264 = arith.subf %1263, %1241 : vector<8x128xf32>
    %1265 = vector.broadcast %5 : vector<1x128xf32> to vector<8x128xf32>
    %1266 = arith.mulf %1264, %1265 : vector<8x128xf32>
    %cst_289 = arith.constant dense<0.000000e+00> : vector<8xf32>
    %1267 = vector.multi_reduction <add>, %1266, %cst_289 [1] : vector<8x128xf32> to vector<8xf32>
    %1268 = vector.shape_cast %1267 : vector<8xf32> to vector<8x1xf32>
    %cst_290 = arith.constant 1.562500e-02 : f32
    %1269 = vector.broadcast %cst_290 : f32 to vector<8x1xf32>
    %1270 = arith.mulf %1268, %1269 : vector<8x1xf32>
    %1271 = vector.broadcast %1270 : vector<8x1xf32> to vector<8x128xf32>
    %1272 = arith.subf %1266, %1271 : vector<8x128xf32>
    %1273 = vector.broadcast %8 : vector<1x128xf32> to vector<8x128xf32>
    %1274 = arith.mulf %1272, %1273 : vector<8x128xf32>
    %1275 = arith.mulf %1274, %1274 : vector<8x128xf32>
    %cst_291 = arith.constant dense<0.000000e+00> : vector<8xf32>
    %1276 = vector.multi_reduction <add>, %1275, %cst_291 [1] : vector<8x128xf32> to vector<8xf32>
    %1277 = vector.shape_cast %1276 : vector<8xf32> to vector<8x1xf32>
    %cst_292 = arith.constant 1.562500e-02 : f32
    %1278 = vector.broadcast %cst_292 : f32 to vector<8x1xf32>
    %1279 = arith.mulf %1277, %1278 : vector<8x1xf32>
    %cst_293 = arith.constant 9.99999974E-6 : f32
    %1280 = vector.broadcast %cst_293 : f32 to vector<8x1xf32>
    %1281 = arith.addf %1279, %1280 : vector<8x1xf32>
    %1282 = math.rsqrt %1281 : vector<8x1xf32>
    %1283 = vector.broadcast %1282 : vector<8x1xf32> to vector<8x128xf32>
    %1284 = arith.mulf %1274, %1283 : vector<8x128xf32>
    %1285 = vector.broadcast %6 : vector<1x128xf32> to vector<8x128xf32>
    %1286 = arith.mulf %1284, %1285 : vector<8x128xf32>
    %1287 = vector.broadcast %7 : vector<1x128xf32> to vector<8x128xf32>
    %1288 = arith.addf %1286, %1287 : vector<8x128xf32>
    %cst_294 = arith.constant 0.333333343 : f32
    %1289 = vector.broadcast %cst_294 : f32 to vector<8x128xf32>
    %1290 = arith.mulf %1288, %1289 : vector<8x128xf32>
    %1291 = arith.addf %1241, %1290 : vector<8x128xf32>
    %1292 = arith.truncf %1291 : vector<8x128xf32> to vector<8x128xbf16>
    %cst_295 = arith.constant dense<0.000000e+00> : vector<8x256xf32>
    %1293 = tpu.matmul %1292, %4, %cst_295 {dimension_numbers = #tpu.dot_dimension_numbers<[1], [0], [0], [1], [0, 0, 1, 1], [], []>} : vector<8x128xbf16>, vector<128x256xbf16>, vector<8x256xf32> -> vector<8x256xf32>
    %1294 = vector.extract_strided_slice %1293 {offsets = [0, 0], sizes = [8, 128], strides = [1, 1]} : vector<8x256xf32> to vector<8x128xf32>
    %1295 = arith.addf %1245, %1294 : vector<8x128xf32>
    %1296 = vector.extract_strided_slice %1293 {offsets = [0, 128], sizes = [8, 128], strides = [1, 1]} : vector<8x256xf32> to vector<8x128xf32>
    %1297 = arith.negf %1296 : vector<8x128xf32>
    %1298 = math.exp %1297 : vector<8x128xf32>
    %cst_296 = arith.constant 1.000000e+00 : f32
    %1299 = vector.broadcast %cst_296 : f32 to vector<8x128xf32>
    %1300 = arith.addf %1299, %1298 : vector<8x128xf32>
    %1301 = arith.divf %1299, %1300 : vector<8x128xf32>
    %1302 = math.tanh %1295 : vector<8x128xf32>
    %1303 = arith.mulf %1301, %1302 : vector<8x128xf32>
    %1304 = arith.subf %1303, %1291 : vector<8x128xf32>
    %1305 = vector.broadcast %5 : vector<1x128xf32> to vector<8x128xf32>
    %1306 = arith.mulf %1304, %1305 : vector<8x128xf32>
    %cst_297 = arith.constant dense<0.000000e+00> : vector<8xf32>
    %1307 = vector.multi_reduction <add>, %1306, %cst_297 [1] : vector<8x128xf32> to vector<8xf32>
    %1308 = vector.shape_cast %1307 : vector<8xf32> to vector<8x1xf32>
    %cst_298 = arith.constant 1.562500e-02 : f32
    %1309 = vector.broadcast %cst_298 : f32 to vector<8x1xf32>
    %1310 = arith.mulf %1308, %1309 : vector<8x1xf32>
    %1311 = vector.broadcast %1310 : vector<8x1xf32> to vector<8x128xf32>
    %1312 = arith.subf %1306, %1311 : vector<8x128xf32>
    %1313 = vector.broadcast %8 : vector<1x128xf32> to vector<8x128xf32>
    %1314 = arith.mulf %1312, %1313 : vector<8x128xf32>
    %1315 = arith.mulf %1314, %1314 : vector<8x128xf32>
    %cst_299 = arith.constant dense<0.000000e+00> : vector<8xf32>
    %1316 = vector.multi_reduction <add>, %1315, %cst_299 [1] : vector<8x128xf32> to vector<8xf32>
    %1317 = vector.shape_cast %1316 : vector<8xf32> to vector<8x1xf32>
    %cst_300 = arith.constant 1.562500e-02 : f32
    %1318 = vector.broadcast %cst_300 : f32 to vector<8x1xf32>
    %1319 = arith.mulf %1317, %1318 : vector<8x1xf32>
    %cst_301 = arith.constant 9.99999974E-6 : f32
    %1320 = vector.broadcast %cst_301 : f32 to vector<8x1xf32>
    %1321 = arith.addf %1319, %1320 : vector<8x1xf32>
    %1322 = math.rsqrt %1321 : vector<8x1xf32>
    %1323 = vector.broadcast %1322 : vector<8x1xf32> to vector<8x128xf32>
    %1324 = arith.mulf %1314, %1323 : vector<8x128xf32>
    %1325 = vector.broadcast %6 : vector<1x128xf32> to vector<8x128xf32>
    %1326 = arith.mulf %1324, %1325 : vector<8x128xf32>
    %1327 = vector.broadcast %7 : vector<1x128xf32> to vector<8x128xf32>
    %1328 = arith.addf %1326, %1327 : vector<8x128xf32>
    %cst_302 = arith.constant 0.333333343 : f32
    %1329 = vector.broadcast %cst_302 : f32 to vector<8x128xf32>
    %1330 = arith.mulf %1288, %1329 : vector<8x128xf32>
    %1331 = arith.subf %1328, %1330 : vector<8x128xf32>
    %1332 = arith.addf %1241, %1331 : vector<8x128xf32>
    %1333 = arith.truncf %1332 : vector<8x128xf32> to vector<8x128xbf16>
    %cst_303 = arith.constant dense<0.000000e+00> : vector<8x256xf32>
    %1334 = tpu.matmul %1333, %4, %cst_303 {dimension_numbers = #tpu.dot_dimension_numbers<[1], [0], [0], [1], [0, 0, 1, 1], [], []>} : vector<8x128xbf16>, vector<128x256xbf16>, vector<8x256xf32> -> vector<8x256xf32>
    %1335 = vector.extract_strided_slice %1334 {offsets = [0, 0], sizes = [8, 128], strides = [1, 1]} : vector<8x256xf32> to vector<8x128xf32>
    %1336 = arith.addf %1245, %1335 : vector<8x128xf32>
    %1337 = vector.extract_strided_slice %1334 {offsets = [0, 128], sizes = [8, 128], strides = [1, 1]} : vector<8x256xf32> to vector<8x128xf32>
    %1338 = arith.negf %1337 : vector<8x128xf32>
    %1339 = math.exp %1338 : vector<8x128xf32>
    %cst_304 = arith.constant 1.000000e+00 : f32
    %1340 = vector.broadcast %cst_304 : f32 to vector<8x128xf32>
    %1341 = arith.addf %1340, %1339 : vector<8x128xf32>
    %1342 = arith.divf %1340, %1341 : vector<8x128xf32>
    %1343 = math.tanh %1336 : vector<8x128xf32>
    %1344 = arith.mulf %1342, %1343 : vector<8x128xf32>
    %1345 = arith.subf %1344, %1332 : vector<8x128xf32>
    %1346 = vector.broadcast %5 : vector<1x128xf32> to vector<8x128xf32>
    %1347 = arith.mulf %1345, %1346 : vector<8x128xf32>
    %cst_305 = arith.constant dense<0.000000e+00> : vector<8xf32>
    %1348 = vector.multi_reduction <add>, %1347, %cst_305 [1] : vector<8x128xf32> to vector<8xf32>
    %1349 = vector.shape_cast %1348 : vector<8xf32> to vector<8x1xf32>
    %cst_306 = arith.constant 1.562500e-02 : f32
    %1350 = vector.broadcast %cst_306 : f32 to vector<8x1xf32>
    %1351 = arith.mulf %1349, %1350 : vector<8x1xf32>
    %1352 = vector.broadcast %1351 : vector<8x1xf32> to vector<8x128xf32>
    %1353 = arith.subf %1347, %1352 : vector<8x128xf32>
    %1354 = vector.broadcast %8 : vector<1x128xf32> to vector<8x128xf32>
    %1355 = arith.mulf %1353, %1354 : vector<8x128xf32>
    %1356 = arith.mulf %1355, %1355 : vector<8x128xf32>
    %cst_307 = arith.constant dense<0.000000e+00> : vector<8xf32>
    %1357 = vector.multi_reduction <add>, %1356, %cst_307 [1] : vector<8x128xf32> to vector<8xf32>
    %1358 = vector.shape_cast %1357 : vector<8xf32> to vector<8x1xf32>
    %cst_308 = arith.constant 1.562500e-02 : f32
    %1359 = vector.broadcast %cst_308 : f32 to vector<8x1xf32>
    %1360 = arith.mulf %1358, %1359 : vector<8x1xf32>
    %cst_309 = arith.constant 9.99999974E-6 : f32
    %1361 = vector.broadcast %cst_309 : f32 to vector<8x1xf32>
    %1362 = arith.addf %1360, %1361 : vector<8x1xf32>
    %1363 = math.rsqrt %1362 : vector<8x1xf32>
    %1364 = vector.broadcast %1363 : vector<8x1xf32> to vector<8x128xf32>
    %1365 = arith.mulf %1355, %1364 : vector<8x128xf32>
    %1366 = vector.broadcast %6 : vector<1x128xf32> to vector<8x128xf32>
    %1367 = arith.mulf %1365, %1366 : vector<8x128xf32>
    %1368 = vector.broadcast %7 : vector<1x128xf32> to vector<8x128xf32>
    %1369 = arith.addf %1367, %1368 : vector<8x128xf32>
    %1370 = arith.subf %1288, %1328 : vector<8x128xf32>
    %1371 = arith.addf %1370, %1369 : vector<8x128xf32>
    %1372 = arith.addf %1241, %1371 : vector<8x128xf32>
    %1373 = arith.truncf %1372 : vector<8x128xf32> to vector<8x128xbf16>
    %cst_310 = arith.constant dense<0.000000e+00> : vector<8x256xf32>
    %1374 = tpu.matmul %1373, %4, %cst_310 {dimension_numbers = #tpu.dot_dimension_numbers<[1], [0], [0], [1], [0, 0, 1, 1], [], []>} : vector<8x128xbf16>, vector<128x256xbf16>, vector<8x256xf32> -> vector<8x256xf32>
    %1375 = vector.extract_strided_slice %1374 {offsets = [0, 0], sizes = [8, 128], strides = [1, 1]} : vector<8x256xf32> to vector<8x128xf32>
    %1376 = arith.addf %1251, %1375 : vector<8x128xf32>
    %1377 = vector.extract_strided_slice %1374 {offsets = [0, 128], sizes = [8, 128], strides = [1, 1]} : vector<8x256xf32> to vector<8x128xf32>
    %1378 = arith.negf %1377 : vector<8x128xf32>
    %1379 = math.exp %1378 : vector<8x128xf32>
    %cst_311 = arith.constant 1.000000e+00 : f32
    %1380 = vector.broadcast %cst_311 : f32 to vector<8x128xf32>
    %1381 = arith.addf %1380, %1379 : vector<8x128xf32>
    %1382 = arith.divf %1380, %1381 : vector<8x128xf32>
    %1383 = math.tanh %1376 : vector<8x128xf32>
    %1384 = arith.mulf %1382, %1383 : vector<8x128xf32>
    %1385 = arith.subf %1384, %1372 : vector<8x128xf32>
    %1386 = vector.broadcast %5 : vector<1x128xf32> to vector<8x128xf32>
    %1387 = arith.mulf %1385, %1386 : vector<8x128xf32>
    %cst_312 = arith.constant dense<0.000000e+00> : vector<8xf32>
    %1388 = vector.multi_reduction <add>, %1387, %cst_312 [1] : vector<8x128xf32> to vector<8xf32>
    %1389 = vector.shape_cast %1388 : vector<8xf32> to vector<8x1xf32>
    %cst_313 = arith.constant 1.562500e-02 : f32
    %1390 = vector.broadcast %cst_313 : f32 to vector<8x1xf32>
    %1391 = arith.mulf %1389, %1390 : vector<8x1xf32>
    %1392 = vector.broadcast %1391 : vector<8x1xf32> to vector<8x128xf32>
    %1393 = arith.subf %1387, %1392 : vector<8x128xf32>
    %1394 = vector.broadcast %8 : vector<1x128xf32> to vector<8x128xf32>
    %1395 = arith.mulf %1393, %1394 : vector<8x128xf32>
    %1396 = arith.mulf %1395, %1395 : vector<8x128xf32>
    %cst_314 = arith.constant dense<0.000000e+00> : vector<8xf32>
    %1397 = vector.multi_reduction <add>, %1396, %cst_314 [1] : vector<8x128xf32> to vector<8xf32>
    %1398 = vector.shape_cast %1397 : vector<8xf32> to vector<8x1xf32>
    %cst_315 = arith.constant 1.562500e-02 : f32
    %1399 = vector.broadcast %cst_315 : f32 to vector<8x1xf32>
    %1400 = arith.mulf %1398, %1399 : vector<8x1xf32>
    %cst_316 = arith.constant 9.99999974E-6 : f32
    %1401 = vector.broadcast %cst_316 : f32 to vector<8x1xf32>
    %1402 = arith.addf %1400, %1401 : vector<8x1xf32>
    %1403 = math.rsqrt %1402 : vector<8x1xf32>
    %1404 = vector.broadcast %1403 : vector<8x1xf32> to vector<8x128xf32>
    %1405 = arith.mulf %1395, %1404 : vector<8x128xf32>
    %1406 = vector.broadcast %6 : vector<1x128xf32> to vector<8x128xf32>
    %1407 = arith.mulf %1405, %1406 : vector<8x128xf32>
    %1408 = vector.broadcast %7 : vector<1x128xf32> to vector<8x128xf32>
    %1409 = arith.addf %1407, %1408 : vector<8x128xf32>
    %1410 = arith.addf %1328, %1369 : vector<8x128xf32>
    %cst_317 = arith.constant 3.000000e+00 : f32
    %1411 = vector.broadcast %cst_317 : f32 to vector<8x128xf32>
    %1412 = arith.mulf %1411, %1410 : vector<8x128xf32>
    %1413 = arith.addf %1288, %1412 : vector<8x128xf32>
    %1414 = arith.addf %1413, %1409 : vector<8x128xf32>
    %cst_318 = arith.constant 1.250000e-01 : f32
    %1415 = vector.broadcast %cst_318 : f32 to vector<8x128xf32>
    %1416 = arith.mulf %1414, %1415 : vector<8x128xf32>
    %1417 = arith.addf %1241, %1416 : vector<8x128xf32>
    %c8_i32_319 = arith.constant 8 : i32
    %c0_320 = arith.constant 0 : index
    %c0_321 = arith.constant 0 : index
    %1418 = vector.load %arg10[%c0_320, %c0_321] : memref<8x128xf32, #tpu.memory_space<vmem>>, vector<8x128xf32>
    tpu.vector_store %arg10[%c0_320, %c0_321], %1417 {strides = array<i32>} : memref<8x128xf32, #tpu.memory_space<vmem>>, vector<8x128xf32>,
    %1419 = arith.truncf %1417 : vector<8x128xf32> to vector<8x128xbf16>
    %c0_322 = arith.constant 0 : index
    %c0_323 = arith.constant 0 : index
    %1420 = vector.load %arg7[%c0_322, %c0_323] : memref<128x128xbf16, #tpu.memory_space<vmem>>, vector<128x128xbf16>
    %cst_324 = arith.constant dense<0.000000e+00> : vector<8x128xf32>
    %1421 = tpu.matmul %1419, %1420, %cst_324 {dimension_numbers = #tpu.dot_dimension_numbers<[1], [0], [0], [1], [0, 0, 1, 1], [], []>} : vector<8x128xbf16>, vector<128x128xbf16>, vector<8x128xf32> -> vector<8x128xf32>
    %c0_325 = arith.constant 0 : index
    %c0_326 = arith.constant 0 : index
    %1422 = vector.load %arg8[%c0_325, %c0_326] : memref<1x128xf32, #tpu.memory_space<vmem>>, vector<1x128xf32>
    %1423 = vector.broadcast %1422 : vector<1x128xf32> to vector<8x128xf32>
    %1424 = arith.addf %1421, %1423 : vector<8x128xf32>
    %c0_327 = arith.constant 0 : index
    %c0_328 = arith.constant 0 : index
    %1425 = vector.load %arg9[%c0_327, %c0_328] : memref<8x128xf32, #tpu.memory_space<vmem>>, vector<8x128xf32>
    tpu.vector_store %arg9[%c0_327, %c0_328], %1424 {strides = array<i32>} : memref<8x128xf32, #tpu.memory_space<vmem>>, vector<8x128xf32>,
    return
  }
}

</mosaic_0001>

<bundles_post_ra>
// kernel: mainmodel_forward.1
= control target key start
LH: loop header
LB: loop body
LE: loop exit
PB: predicated region body
PF: predicated region fallthrough
CT: control target
= control target key end

     0   :  { %vm44_vm0 = vcmask 64512   ;;  %v3245_v50 = vmov 0   ;;  %s4490_s2 = inlined_call_operand.vmem [shape: bf16[128,256], index: 2, kind: input, shape index: {}]   ;;  %s4491_s1 = inlined_call_operand.vmem [shape: f32[8,128], index: 1, kind: input, shape index: {}]   ;;  %s4492_s0 = inlined_call_operand.vmem [shape: f32[64,8], index: 0, kind: input, shape index: {}]   ;;  %s4493_s3 = inlined_call_operand.vmem [shape: f32[1,128], index: 3, kind: input, shape index: {}]   ;;  %s4494_s6 = inlined_call_operand.vmem [shape: f32[1,128], index: 6, kind: input, shape index: {}]   ;;  %s4495_s4 = inlined_call_operand.vmem [shape: f32[1,128], index: 4, kind: input, shape index: {}]   ;;  %s4496_s5 = inlined_call_operand.vmem [shape: f32[1,128], index: 5, kind: input, shape index: {}]   ;;  %s4497_s8 = inlined_call_operand.vmem [shape: f32[1,128], index: 8, kind: input, shape index: {}]   ;;  %s4498_s7 = inlined_call_operand.vmem [shape: bf16[128,128], index: 7, kind: input, shape index: {}]   ;;  %s4499_s10 = inlined_call_operand.vmem [shape: f32[8,128], index: 10, kind: output, shape index: {1}]   ;;  %s4500_s9 = inlined_call_operand.vmem [shape: f32[8,128], index: 9, kind: output, shape index: {0}]  }
   0x1   :  { %v2957_v0 = vld [vmem:[%s4490_s2 + $0x74] sm:$0xf]  ;;  %v2875_v1 = vld [vmem:[%s4490_s2 + $0x78] sm:$0xf0]  ;;  %v2955_v2 = vld [vmem:[%s4490_s2 + $0x64] sm:$0xf] }
   0x2   :  { %v3310_v3 = vor.u32 %v2957_v0, %v2875_v1  ;;  %v2867_v4 = vld [vmem:[%s4490_s2 + $0x68] sm:$0xf0]  ;;  %v2873_v6 = vld [vmem:[%s4490_s2 + $0x70] sm:$0xf]  ;;  %v2958_v7 = vld [vmem:[%s4490_s2 + $0x74] sm:$0xf0] }
   0x3   :  { %v3316_v5 = vor.u32 %v2955_v2, %v2867_v4  ;;  %v2953_v8 = vld [vmem:[%s4490_s2 + $0x54] sm:$0xf]  ;;  %v2859_v9 = vld [vmem:[%s4490_s2 + $0x58] sm:$0xf0]  ;;  %v3330_v10 = vor.u32 %v2958_v7, %v2873_v6  ;;  %v2865_v11 = vld [vmem:[%s4490_s2 + $0x60] sm:$0xf] }
   0x4   :  { %234 = vmatpush.bf16.msra.mxu2 %v3310_v3  ;;  %v2956_v12 = vld [vmem:[%s4490_s2 + $0x64] sm:$0xf0]  ;;  %v3343_v14 = vor.u32 %v2953_v8, %v2859_v9  ;;  %v2857_v15 = vld [vmem:[%s4490_s2 + $0x50] sm:$0xf]  ;;  %v2954_v16 = vld [vmem:[%s4490_s2 + $0x54] sm:$0xf0] }
   0x5   :  { %221 = vmatpush.bf16.msra.mxu1 %v3330_v10  ;;  %v3339_v13 = vor.u32 %v2956_v12, %v2865_v11  ;;  %308 = vmatpush.bf16.msra.mxu3 %v3330_v10  ;;  %v2951_v17 = vld [vmem:[%s4490_s2 + $0x44] sm:$0xf]  ;;  %v2851_v18 = vld [vmem:[%s4490_s2 + $0x48] sm:$0xf0]  ;;  %v3358_v19 = vor.u32 %v2954_v16, %v2857_v15  ;;  %v2849_v22 = vld [vmem:[%s4490_s2 + $0x40] sm:$0xf] }
   0x6   :  { %v43_v20 = vld [vmem:[%s4491_s1] sm:$0xff]  ;;  %v3365_v21 = vor.u32 %v2951_v17, %v2851_v18  ;;  %v2952_v23 = vld [vmem:[%s4490_s2 + $0x44] sm:$0xf0]  ;;  %v2949_v25 = vld [vmem:[%s4490_s2 + $0x34] sm:$0xf] }
   0x7   :  { %84 = vmatpush.msra.mxu0 %v43_v20  ;;  %v35_v24 = vld [vmem:[%s4492_s0] sm:$0xff]  ;;  %v2843_v26 = vld [vmem:[%s4490_s2 + $0x38] sm:$0xf0]  ;;  %v3385_v27 = vor.u32 %v2952_v23, %v2849_v22  ;;  %v2841_v29 = vld [vmem:[%s4490_s2 + $0x30] sm:$0xf] }
   0x8   :  { %235 = vmatpush.bf16.msra.mxu2 %v3316_v5  ;;  %2807 = vmatmul.msk.f32.vlgmr.msra.gmra.mxu0 %vm44_vm0, %v35_v24  ;;  %v3389_v28 = vor.u32 %v2949_v25, %v2843_v26  ;;  %v2950_v30 = vld [vmem:[%s4490_s2 + $0x34] sm:$0xf0]  ;;  %v2947_v31 = vld [vmem:[%s4490_s2 + $0x24] sm:$0xf]  ;;  %v2835_v32 = vld [vmem:[%s4490_s2 + $0x28] sm:$0xf0] }
   0x9   :  { %222 = vmatpush.bf16.msra.mxu1 %v3339_v13  ;;  %309 = vmatpush.bf16.msra.mxu3 %v3339_v13  ;;  %v3405_v33 = vor.u32 %v2950_v30, %v2841_v29  ;;  %v3409_v34 = vor.u32 %v2947_v31, %v2835_v32  ;;  %v2833_v35 = vld [vmem:[%s4490_s2 + $0x20] sm:$0xf]  ;;  %v2948_v36 = vld [vmem:[%s4490_s2 + $0x24] sm:$0xf0]  ;;  %v2945_v37 = vld [vmem:[%s4490_s2 + $0x14] sm:$0xf] }
   0xa   :  { %461 = vmatpush.bf16.msrb.mxu0 %v3330_v10  ;;  %v2827_v38 = vld [vmem:[%s4490_s2 + $0x18] sm:$0xf0]  ;;  %v3425_v39 = vor.u32 %v2948_v36, %v2833_v35  ;;  %v2825_v41 = vld [vmem:[%s4490_s2 + $0x10] sm:$0xf]  ;;  %v2946_v42 = vld [vmem:[%s4490_s2 + $0x14] sm:$0xf0] }
   0xb   :  { %v3429_v40 = vor.u32 %v2945_v37, %v2827_v38  ;;  %v2943_v43 = vld [vmem:[%s4490_s2 + $0x4] sm:$0xf]  ;;  %v2819_v44 = vld [vmem:[%s4490_s2 + $0x8] sm:$0xf0]  ;;  %v3445_v45 = vor.u32 %v2946_v42, %v2825_v41  ;;  %v2817_v47 = vld [vmem:[%s4490_s2] sm:$0xf] }
   0xc   :  { %236 = vmatpush.bf16.msra.mxu2 %v3343_v14  ;;  %v3449_v46 = vor.u32 %v2943_v43, %v2819_v44  ;;  %v2944_v48 = vld [vmem:[%s4490_s2 + $0x4] sm:$0xf0]  ;;  %v3522_v8 = vld [vmem:[%s4493_s3] ss:$0 sm:$0xff] }
   0xd   :  { %223 = vmatpush.bf16.msra.mxu1 %v3358_v19  ;;  %310 = vmatpush.bf16.msra.mxu3 %v3358_v19  ;;  %v3459_v49 = vor.u32 %v2944_v48, %v2817_v47  ;;  %v3528_v17 = vld [vmem:[%s4494_s6] ss:$0 sm:$0xff] }
   0xe   :  { %462 = vmatpush.bf16.msrb.mxu0 %v3339_v13  ;;  %v3534_v36 = vld [vmem:[%s4495_s4] ss:$0 sm:$0xff] }
   0xf   :  { %v3539_v41 = vld [vmem:[%s4496_s5] ss:$0 sm:$0xff] }
  0x10   :  { %237 = vmatpush.bf16.msra.mxu2 %v3365_v21 }
  0x11   :  { %224 = vmatpush.bf16.msra.mxu1 %v3385_v27  ;;  %311 = vmatpush.bf16.msra.mxu3 %v3385_v27 }
  0x12   :  { %463 = vmatpush.bf16.msrb.mxu0 %v3358_v19 }
  0x14   :  { %238 = vmatpush.bf16.msra.mxu2 %v3389_v28 }
  0x15   :  { %225 = vmatpush.bf16.msra.mxu1 %v3405_v33  ;;  %312 = vmatpush.bf16.msra.mxu3 %v3405_v33 }
  0x16   :  { %464 = vmatpush.bf16.msrb.mxu0 %v3385_v27 }
  0x18   :  { %239 = vmatpush.bf16.msra.mxu2 %v3409_v34 }
  0x19   :  { %226 = vmatpush.bf16.msra.mxu1 %v3425_v39  ;;  %313 = vmatpush.bf16.msra.mxu3 %v3425_v39 }
  0x1a   :  { %465 = vmatpush.bf16.msrb.mxu0 %v3405_v33 }
  0x1c   :  { %240 = vmatpush.bf16.msra.mxu2 %v3429_v40 }
  0x1d   :  { %227 = vmatpush.bf16.msra.mxu1 %v3445_v45  ;;  %314 = vmatpush.bf16.msra.mxu3 %v3445_v45 }
  0x1e   :  { %466 = vmatpush.bf16.msrb.mxu0 %v3425_v39 }
  0x20   :  { %241 = vmatpush.bf16.msra.mxu2 %v3449_v46 }
  0x21   :  { %228 = vmatpush.bf16.msra.mxu1 %v3459_v49  ;;  %315 = vmatpush.bf16.msra.mxu3 %v3459_v49 }
  0x22   :  { %467 = vmatpush.bf16.msrb.mxu0 %v3445_v45 }
  0x23   :  { %242 = vmatmul.bf16.vlgmr.msra.gmra.mxu2 %v3245_v50 }
  0x24   :  { %384 = vmatpush.bf16.msrb.mxu2 %v3330_v10  ;;  %229 = vmatmul.bf16.vlgmr.msra.gmra.mxu1 %v3245_v50 }
  0x25   :  { %321 = vmatpush.bf16.msrb.mxu1 %v3310_v3  ;;  %397 = vmatpush.bf16.msrb.mxu3 %v3310_v3 }
  0x26   :  { %468 = vmatpush.bf16.msrb.mxu0 %v3459_v49 }
  0x28   :  { %385 = vmatpush.bf16.msrb.mxu2 %v3339_v13 }
  0x29   :  { %322 = vmatpush.bf16.msrb.mxu1 %v3316_v5  ;;  %398 = vmatpush.bf16.msrb.mxu3 %v3316_v5 }
  0x2a   :  { %619 = vmatpush.bf16.msra.mxu0 %v3330_v10 }
  0x2c   :  { %386 = vmatpush.bf16.msrb.mxu2 %v3358_v19 }
  0x2d   :  { %323 = vmatpush.bf16.msrb.mxu1 %v3343_v14  ;;  %399 = vmatpush.bf16.msrb.mxu3 %v3343_v14 }
  0x2e   :  { %620 = vmatpush.bf16.msra.mxu0 %v3339_v13 }
  0x30   :  { %387 = vmatpush.bf16.msrb.mxu2 %v3385_v27 }
  0x31   :  { %324 = vmatpush.bf16.msrb.mxu1 %v3365_v21  ;;  %400 = vmatpush.bf16.msrb.mxu3 %v3365_v21 }
  0x32   :  { %621 = vmatpush.bf16.msra.mxu0 %v3358_v19 }
  0x34   :  { %388 = vmatpush.bf16.msrb.mxu2 %v3405_v33 }
  0x35   :  { %325 = vmatpush.bf16.msrb.mxu1 %v3389_v28  ;;  %401 = vmatpush.bf16.msrb.mxu3 %v3389_v28 }
  0x36   :  { %622 = vmatpush.bf16.msra.mxu0 %v3385_v27 }
  0x38   :  { %389 = vmatpush.bf16.msrb.mxu2 %v3425_v39 }
  0x39   :  { %326 = vmatpush.bf16.msrb.mxu1 %v3409_v34  ;;  %402 = vmatpush.bf16.msrb.mxu3 %v3409_v34 }
  0x3a   :  { %623 = vmatpush.bf16.msra.mxu0 %v3405_v33 }
  0x3c   :  { %390 = vmatpush.bf16.msrb.mxu2 %v3445_v45 }
  0x3d   :  { %327 = vmatpush.bf16.msrb.mxu1 %v3429_v40  ;;  %403 = vmatpush.bf16.msrb.mxu3 %v3429_v40 }
  0x3e   :  { %624 = vmatpush.bf16.msra.mxu0 %v3425_v39 }
  0x40   :  { %391 = vmatpush.bf16.msrb.mxu2 %v3459_v49 }
  0x41   :  { %328 = vmatpush.bf16.msrb.mxu1 %v3449_v46  ;;  %404 = vmatpush.bf16.msrb.mxu3 %v3449_v46 }
  0x42   :  { %625 = vmatpush.bf16.msra.mxu0 %v3445_v45 }
  0x44   :  { %543 = vmatpush.bf16.msra.mxu2 %v3330_v10 }
  0x45   :  { %474 = vmatpush.bf16.msra.mxu1 %v3310_v3 }
  0x46   :  { %626 = vmatpush.bf16.msra.mxu0 %v3459_v49 }
  0x48   :  { %544 = vmatpush.bf16.msra.mxu2 %v3339_v13 }
  0x49   :  { %475 = vmatpush.bf16.msra.mxu1 %v3316_v5 }
  0x4c   :  { %545 = vmatpush.bf16.msra.mxu2 %v3358_v19 }
  0x4d   :  { %476 = vmatpush.bf16.msra.mxu1 %v3343_v14 }
  0x50   :  { %546 = vmatpush.bf16.msra.mxu2 %v3385_v27 }
  0x51   :  { %477 = vmatpush.bf16.msra.mxu1 %v3365_v21 }
  0x54   :  { %547 = vmatpush.bf16.msra.mxu2 %v3405_v33 }
  0x55   :  { %478 = vmatpush.bf16.msra.mxu1 %v3389_v28 }
  0x58   :  { %548 = vmatpush.bf16.msra.mxu2 %v3425_v39 }
  0x59   :  { %479 = vmatpush.bf16.msra.mxu1 %v3409_v34 }
  0x5c   :  { %549 = vmatpush.bf16.msra.mxu2 %v3445_v45 }
  0x5d   :  { %480 = vmatpush.bf16.msra.mxu1 %v3429_v40 }
  0x60   :  { %550 = vmatpush.bf16.msra.mxu2 %v3459_v49 }
  0x61   :  { %481 = vmatpush.bf16.msra.mxu1 %v3449_v46 }
  0x85   :  { %v3516_v58 = vpop.f32.mrf.mxu0 }
  0xa1   :  { %v230_v51 = vpop.f32.mrf.mxu1 }
  0xa2   :  { %v247_v59 = vadd.f32 %v230_v51, %v3516_v58 }
  0xa6   :  { %v243_v52 = vpop.f32.mrf.mxu2 }
  0xa7   :  { %v2879_v53 = vmul.f32 -1.442695, %v243_v52 }
  0xa9   :  { %2973 = vpow2.f32 %v2879_v53  ;;  %v232_v54 = vpop.f32.mrf.mxu1 }
  0xae   :  { %v245_v55 = vpop.f32.mrf.mxu2 }
  0xaf   :  { %v2974_v56 = vpop.eup %2973 }
  0xb0   :  { %v251_v57 = vadd.f32 1.0, %v2974_v56 }
  0xb2   :  { %2975 = vrcp.f32 %v251_v57  ;;  %v263_v63 = vand.u32 2147483648, %v251_v57  ;;  %v261_v1 = vand.u32 2147483647, %v251_v57  ;;  %vm257_vm2 = vweird.f32 %v251_v57 }
  0xb3   :  { %2977 = vtanh.f32 %v247_v59 }
  0xb4   :  { %v264_v6 = vor.u32 1.1754944e-38, %v263_v63  ;;  %vm262_vm4 = vcmp.eq.f32.partialorder %v261_v1, 8.507059e+37 }
  0xb8   :  { %v2976_v60 = vpop.eup %2975 }
  0xb9   :  { %v253_v61 = vmul.f32 %v2976_v60, %v251_v57  ;;  %vm258_vm1 = vweird.f32 %v2976_v60  ;;  %v2978_v4 = vpop.eup %2977 }
  0xba   :  { %vm259_vm3 = vmor %vm257_vm2, %vm258_vm1 }
  0xbb   :  { %v254_v62 = vsub.f32 1.0, %v253_v61 }
  0xbd   :  { %v255_v0 = vmul.f32 %v2976_v60, %v254_v62 }
  0xbf   :  { %v256_v2 = vadd.f32 %v2976_v60, %v255_v0 }
  0xc1   :  { %v260_v7 = vsel %vm259_vm3, %v2976_v60, %v256_v2 }
  0xc2   :  { %v265_v9 = vsel %vm262_vm4, %v264_v6, %v260_v7 }
  0xc3   :  { %v268_v11 = vmul.f32 %v2978_v4, %v265_v9 }
  0xc5   :  { %v272_v12 = vmul.f32 %v3522_v8, %v268_v11 }
  0xc7   :  { %273 = vadd.xlane.f32.xlu0 %v272_v12 }
 0x13a   :  { %v274_v15 = vpop.xlane.xlu0 %273 }
 0x13b   :  { %v275_v16 = vmul.f32 0.015625, %v274_v15 }
 0x13d   :  { %v276_v18 = vsub.f32 %v272_v12, %v275_v16 }
 0x13f   :  { %v280_v20 = vmul.f32 %v3528_v17, %v276_v18 }
 0x141   :  { %v281_v22 = vmul.f32 %v280_v20, %v280_v20 }
 0x143   :  { %282 = vadd.xlane.f32.xlu0 %v281_v22 }
 0x1b6   :  { %v283_v23 = vpop.xlane.xlu0 %282 }
 0x1b7   :  { %v284_v24 = vmul.f32 0.015625, %v283_v23 }
 0x1b9   :  { %v285_v25 = vadd.f32 1e-05, %v284_v24 }
 0x1bb   :  { %2979 = vrsqrt.f32 %v285_v25  ;;  %vm292_vm6 = vweird.f32 %v285_v25 }
 0x1c1   :  { %v2980_v26 = vpop.eup %2979 }
 0x1c2   :  { %v287_v29 = vmul.f32 %v2980_v26, %v285_v25  ;;  %vm293_vm5 = vweird.f32 %v2980_v26 }
 0x1c3   :  { %vm294_vm7 = vmor %vm292_vm6, %vm293_vm5 }
 0x1c4   :  { %v288_v30 = vmul.f32 %v2980_v26, %v287_v29 }
 0x1c6   :  { %v289_v31 = vmul.f32 0.5, %v288_v30 }
 0x1c8   :  { %v290_v32 = vsub.f32 1.5, %v289_v31 }
 0x1ca   :  { %v291_v35 = vmul.f32 %v2980_v26, %v290_v32 }
 0x1cc   :  { %v295_v37 = vsel %vm294_vm7, %v2980_v26, %v291_v35 }
 0x1cd   :  { %v296_v38 = vmul.f32 %v295_v37, %v280_v20 }
 0x1cf   :  { %v300_v42 = vmul.f32 %v3534_v36, %v296_v38 }
 0x1d1   :  { %v3543_v43 = vadd.f32 %v3539_v41, %v300_v42 }
 0x1d3   :  { %v3546_v44 = vmul.f32 0.33333334, %v3543_v43 }
 0x1d5   :  { %v307_v47 = vpack.c.bf16 %v3546_v44, %v3546_v44 }
 0x1d7   :  { %316 = vmatmul.bf16.vlgmr.msra.gmra.mxu3 %v307_v47  ;;  %329 = vmatmul.bf16.vlgmr.msrb.gmra.mxu1 %v307_v47 }
 0x1d8   :  { %556 = vmatpush.bf16.msra.mxu3 %v3310_v3  ;;  %632 = vmatpush.bf16.msrb.mxu1 %v3310_v3 }
 0x1dc   :  { %557 = vmatpush.bf16.msra.mxu3 %v3316_v5  ;;  %633 = vmatpush.bf16.msrb.mxu1 %v3316_v5 }
 0x1e0   :  { %558 = vmatpush.bf16.msra.mxu3 %v3343_v14  ;;  %634 = vmatpush.bf16.msrb.mxu1 %v3343_v14 }
 0x1e4   :  { %559 = vmatpush.bf16.msra.mxu3 %v3365_v21  ;;  %635 = vmatpush.bf16.msrb.mxu1 %v3365_v21 }
 0x1e8   :  { %560 = vmatpush.bf16.msra.mxu3 %v3389_v28  ;;  %636 = vmatpush.bf16.msrb.mxu1 %v3389_v28 }
 0x1ec   :  { %561 = vmatpush.bf16.msra.mxu3 %v3409_v34  ;;  %637 = vmatpush.bf16.msrb.mxu1 %v3409_v34 }
 0x1f0   :  { %562 = vmatpush.bf16.msra.mxu3 %v3429_v40  ;;  %638 = vmatpush.bf16.msrb.mxu1 %v3429_v40 }
 0x1f4   :  { %563 = vmatpush.bf16.msra.mxu3 %v3449_v46  ;;  %639 = vmatpush.bf16.msrb.mxu1 %v3449_v46 }
 0x254   :  { %v330_v48 = vpop.f32.mrf.mxu1 }
 0x255   :  { %v2880_v50 = vmul.f32 -1.442695, %v330_v48 }
 0x257   :  { %2981 = vpow2.f32 %v2880_v50 }
 0x25a   :  { %v317_v51 = vpop.f32.mrf.mxu3 }
 0x25b   :  { %v334_v57 = vadd.f32 %v317_v51, %v3516_v58 }
 0x25c   :  { %v332_v52 = vpop.f32.mrf.mxu1 }
 0x25d   :  { %v2982_v53 = vpop.eup %2981 }
 0x25e   :  { %v338_v54 = vadd.f32 1.0, %v2982_v53 }
 0x260   :  { %2983 = vrcp.f32 %v338_v54  ;;  %v350_v61 = vand.u32 2147483648, %v338_v54  ;;  %v348_v63 = vand.u32 2147483647, %v338_v54  ;;  %vm344_vm9 = vweird.f32 %v338_v54 }
 0x261   :  { %2985 = vtanh.f32 %v334_v57 }
 0x262   :  { %v319_v55 = vpop.f32.mrf.mxu3  ;;  %v351_v1 = vor.u32 1.1754944e-38, %v350_v61  ;;  %vm349_vm11 = vcmp.eq.f32.partialorder %v348_v63, 8.507059e+37 }
 0x266   :  { %v2984_v56 = vpop.eup %2983 }
 0x267   :  { %v340_v59 = vmul.f32 %v2984_v56, %v338_v54  ;;  %vm345_vm8 = vweird.f32 %v2984_v56  ;;  %v2986_v4 = vpop.eup %2985 }
 0x268   :  { %vm346_vm10 = vmor %vm344_vm9, %vm345_vm8 }
 0x269   :  { %v341_v60 = vsub.f32 1.0, %v340_v59 }
 0x26b   :  { %v342_v62 = vmul.f32 %v2984_v56, %v341_v60 }
 0x26d   :  { %v343_v0 = vadd.f32 %v2984_v56, %v342_v62 }
 0x26f   :  { %v347_v2 = vsel %vm346_vm10, %v2984_v56, %v343_v0 }
 0x270   :  { %v352_v6 = vsel %vm349_vm11, %v351_v1, %v347_v2 }
 0x271   :  { %v355_v7 = vmul.f32 %v2986_v4, %v352_v6 }
 0x273   :  { %v356_v9 = vsub.f32 %v355_v7, %v3546_v44 }
 0x275   :  { %v357_v11 = vmul.f32 %v3522_v8, %v356_v9 }
 0x277   :  { %358 = vadd.xlane.f32.xlu1 %v357_v11 }
 0x2ea   :  { %v359_v12 = vpop.xlane.xlu1 %358 }
 0x2eb   :  { %v360_v15 = vmul.f32 0.015625, %v359_v12  ;;  %v37_v12 = vld [vmem:[%s4492_s0 + $0x10] sm:$0xff] }
 0x2ed   :  { %v361_v16 = vsub.f32 %v357_v11, %v360_v15  ;;  %v38_v15 = vld [vmem:[%s4492_s0 + $0x18] sm:$0xff] }
 0x2ef   :  { %v362_v18 = vmul.f32 %v3528_v17, %v361_v16 }
 0x2f1   :  { %v363_v20 = vmul.f32 %v362_v18, %v362_v18 }
 0x2f3   :  { %364 = vadd.xlane.f32.xlu1 %v363_v20 }
 0x366   :  { %v365_v22 = vpop.xlane.xlu1 %364 }
 0x367   :  { %v366_v23 = vmul.f32 0.015625, %v365_v22 }
 0x369   :  { %v367_v24 = vadd.f32 1e-05, %v366_v23 }
 0x36b   :  { %2987 = vrsqrt.f32 %v367_v24  ;;  %vm374_vm13 = vweird.f32 %v367_v24 }
 0x371   :  { %v2988_v25 = vpop.eup %2987 }
 0x372   :  { %v369_v26 = vmul.f32 %v2988_v25, %v367_v24  ;;  %vm375_vm12 = vweird.f32 %v2988_v25  ;;  %v39_v24 = vld [vmem:[%s4492_s0 + $0x20] sm:$0xff] }
 0x373   :  { %vm376_vm14 = vmor %vm374_vm13, %vm375_vm12 }
 0x374   :  { %v370_v29 = vmul.f32 %v2988_v25, %v369_v26  ;;  %v41_v26 = vld [vmem:[%s4492_s0 + $0x30] sm:$0xff] }
 0x376   :  { %v371_v30 = vmul.f32 0.5, %v370_v29  ;;  %v42_v29 = vld [vmem:[%s4492_s0 + $0x38] sm:$0xff] }
 0x378   :  { %v372_v31 = vsub.f32 1.5, %v371_v30 }
 0x37a   :  { %v373_v32 = vmul.f32 %v2988_v25, %v372_v31 }
 0x37c   :  { %v377_v35 = vsel %vm376_vm14, %v2988_v25, %v373_v32  ;;  %v40_v25 = vld [vmem:[%s4492_s0 + $0x28] sm:$0xff] }
 0x37d   :  { %v378_v37 = vmul.f32 %v377_v35, %v362_v18 }
 0x37f   :  { %v379_v38 = vmul.f32 %v3534_v36, %v378_v37 }
 0x381   :  { %v3572_v42 = vadd.f32 %v3539_v41, %v379_v38 }
 0x383   :  { %v381_v47 = vsub.f32 %v3572_v42, %v3546_v44 }
 0x385   :  { %v383_v48 = vpack.c.bf16 %v381_v47, %v381_v47 }
 0x387   :  { %392 = vmatmul.bf16.vlgmr.msrb.gmra.mxu2 %v383_v48  ;;  %405 = vmatmul.bf16.vlgmr.msrb.gmra.mxu3 %v383_v48 }
 0x388   :  { %695 = vmatpush.bf16.msrb.mxu2 %v3330_v10  ;;  %708 = vmatpush.bf16.msrb.mxu3 %v3310_v3 }
 0x38c   :  { %696 = vmatpush.bf16.msrb.mxu2 %v3339_v13  ;;  %709 = vmatpush.bf16.msrb.mxu3 %v3316_v5 }
 0x390   :  { %697 = vmatpush.bf16.msrb.mxu2 %v3358_v19  ;;  %710 = vmatpush.bf16.msrb.mxu3 %v3343_v14 }
 0x394   :  { %698 = vmatpush.bf16.msrb.mxu2 %v3385_v27  ;;  %711 = vmatpush.bf16.msrb.mxu3 %v3365_v21 }
 0x398   :  { %699 = vmatpush.bf16.msrb.mxu2 %v3405_v33  ;;  %712 = vmatpush.bf16.msrb.mxu3 %v3389_v28 }
 0x39c   :  { %700 = vmatpush.bf16.msrb.mxu2 %v3425_v39  ;;  %713 = vmatpush.bf16.msrb.mxu3 %v3409_v34 }
 0x3a0   :  { %701 = vmatpush.bf16.msrb.mxu2 %v3445_v45  ;;  %714 = vmatpush.bf16.msrb.mxu3 %v3429_v40 }
 0x3a4   :  { %702 = vmatpush.bf16.msrb.mxu2 %v3459_v49  ;;  %715 = vmatpush.bf16.msrb.mxu3 %v3449_v46 }
 0x40a   :  { %v393_v44 = vpop.f32.mrf.mxu2  ;;  %v406_v50 = vpop.f32.mrf.mxu3 }
 0x40b   :  { %v2881_v51 = vmul.f32 -1.442695, %v406_v50  ;;  %v410_v57 = vadd.f32 %v393_v44, %v3516_v58  ;;  %v36_v58 = vld [vmem:[%s4492_s0 + $0x8] sm:$0xff] }
 0x40c   :  { %2808 = vmatmul.msk.f32.gmra.mxu0 %vm44_vm0, %v36_v58 }
 0x40d   :  { %2989 = vpow2.f32 %v2881_v51 }
 0x412   :  { %v395_v52 = vpop.f32.mrf.mxu2  ;;  %v408_v53 = vpop.f32.mrf.mxu3 }
 0x413   :  { %v2990_v54 = vpop.eup %2989 }
 0x414   :  { %v414_v55 = vadd.f32 1.0, %v2990_v54  ;;  %2809 = vmatmul.msk.f32.gmra.mxu0 %vm44_vm0, %v37_v12  ;;  %v457_v54 = vsub.f32 %v3543_v43, %v3572_v42 }
 0x416   :  { %2991 = vrcp.f32 %v414_v55  ;;  %v426_v61 = vand.u32 2147483648, %v414_v55  ;;  %v424_v63 = vand.u32 2147483647, %v414_v55  ;;  %vm420_vm1 = vweird.f32 %v414_v55 }
 0x417   :  { %2993 = vtanh.f32 %v410_v57 }
 0x418   :  { %v427_v1 = vor.u32 1.1754944e-38, %v426_v61  ;;  %vm425_vm3 = vcmp.eq.f32.partialorder %v424_v63, 8.507059e+37 }
 0x41c   :  { %v2992_v56 = vpop.eup %2991  ;;  %2810 = vmatmul.msk.f32.gmra.mxu0 %vm44_vm0, %v38_v15 }
 0x41d   :  { %v416_v59 = vmul.f32 %v2992_v56, %v414_v55  ;;  %vm421_vm15 = vweird.f32 %v2992_v56  ;;  %v2994_v4 = vpop.eup %2993 }
 0x41e   :  { %vm422_vm2 = vmor %vm420_vm1, %vm421_vm15 }
 0x41f   :  { %v417_v60 = vsub.f32 1.0, %v416_v59 }
 0x421   :  { %v418_v62 = vmul.f32 %v2992_v56, %v417_v60 }
 0x423   :  { %v419_v0 = vadd.f32 %v2992_v56, %v418_v62 }
 0x424   :  { %2811 = vmatmul.msk.f32.gmra.mxu0 %vm44_vm0, %v39_v24 }
 0x425   :  { %v423_v2 = vsel %vm422_vm2, %v2992_v56, %v419_v0 }
 0x426   :  { %v428_v6 = vsel %vm425_vm3, %v427_v1, %v423_v2 }
 0x427   :  { %v431_v7 = vmul.f32 %v2994_v4, %v428_v6 }
 0x429   :  { %v432_v9 = vsub.f32 %v431_v7, %v381_v47 }
 0x42b   :  { %v433_v11 = vmul.f32 %v3522_v8, %v432_v9 }
 0x42c   :  { %2812 = vmatmul.msk.f32.gmra.mxu0 %vm44_vm0, %v40_v25 }
 0x42d   :  { %434 = vadd.xlane.f32.xlu2 %v433_v11 }
 0x434   :  { %2813 = vmatmul.msk.f32.gmra.mxu0 %vm44_vm0, %v41_v26 }
 0x43c   :  { %2814 = vmatmul.msk.f32.gmra.mxu0 %vm44_vm0, %v42_v29 }
 0x489   :  { %v3646_v57 = vpop.f32.mrf.mxu0 }
 0x491   :  { %v3648_v59 = vpop.f32.mrf.mxu0 }
 0x499   :  { %v3650_v60 = vpop.f32.mrf.mxu0 }
 0x4a0   :  { %v435_v16 = vpop.xlane.xlu2 %434 }
 0x4a1   :  { %v436_v18 = vmul.f32 0.015625, %v435_v16  ;;  %v3652_v61 = vpop.f32.mrf.mxu0 }
 0x4a3   :  { %v437_v20 = vsub.f32 %v433_v11, %v436_v18 }
 0x4a5   :  { %v438_v22 = vmul.f32 %v3528_v17, %v437_v20 }
 0x4a7   :  { %v439_v23 = vmul.f32 %v438_v22, %v438_v22 }
 0x4a9   :  { %440 = vadd.xlane.f32.xlu2 %v439_v23  ;;  %v3654_v62 = vpop.f32.mrf.mxu0 }
 0x4b1   :  { %v3656_v63 = vpop.f32.mrf.mxu0 }
 0x4b9   :  { %v3658_v0 = vpop.f32.mrf.mxu0 }
 0x51c   :  { %v441_v30 = vpop.xlane.xlu2 %440 }
 0x51d   :  { %v442_v31 = vmul.f32 0.015625, %v441_v30 }
 0x51f   :  { %v443_v32 = vadd.f32 1e-05, %v442_v31 }
 0x521   :  { %2995 = vrsqrt.f32 %v443_v32  ;;  %vm450_vm5 = vweird.f32 %v443_v32 }
 0x527   :  { %v2996_v35 = vpop.eup %2995 }
 0x528   :  { %v445_v37 = vmul.f32 %v2996_v35, %v443_v32  ;;  %vm451_vm4 = vweird.f32 %v2996_v35 }
 0x529   :  { %vm452_vm6 = vmor %vm450_vm5, %vm451_vm4 }
 0x52a   :  { %v446_v38 = vmul.f32 %v2996_v35, %v445_v37 }
 0x52c   :  { %v447_v47 = vmul.f32 0.5, %v446_v38 }
 0x52e   :  { %v448_v48 = vsub.f32 1.5, %v447_v47 }
 0x530   :  { %v449_v44 = vmul.f32 %v2996_v35, %v448_v48 }
 0x532   :  { %v453_v50 = vsel %vm452_vm6, %v2996_v35, %v449_v44 }
 0x533   :  { %v454_v51 = vmul.f32 %v453_v50, %v438_v22 }
 0x535   :  { %v455_v52 = vmul.f32 %v3534_v36, %v454_v51 }
 0x537   :  { %v3625_v53 = vadd.f32 %v3539_v41, %v455_v52 }
 0x539   :  { %v458_v55 = vadd.f32 %v457_v54, %v3625_v53 }
 0x53b   :  { %v460_v56 = vpack.c.bf16 %v458_v55, %v458_v55 }
 0x53d   :  { %469 = vmatmul.bf16.vlgmr.msrb.gmra.mxu0 %v460_v56  ;;  %482 = vmatmul.bf16.vlgmr.msra.gmra.mxu1 %v460_v56 }
 0x53e   :  { %772 = vmatpush.bf16.msrb.mxu0 %v3330_v10  ;;  %785 = vmatpush.bf16.msra.mxu1 %v3310_v3 }
 0x542   :  { %773 = vmatpush.bf16.msrb.mxu0 %v3339_v13  ;;  %786 = vmatpush.bf16.msra.mxu1 %v3316_v5 }
 0x546   :  { %774 = vmatpush.bf16.msrb.mxu0 %v3358_v19  ;;  %787 = vmatpush.bf16.msra.mxu1 %v3343_v14 }
 0x54a   :  { %775 = vmatpush.bf16.msrb.mxu0 %v3385_v27  ;;  %788 = vmatpush.bf16.msra.mxu1 %v3365_v21 }
 0x54e   :  { %776 = vmatpush.bf16.msrb.mxu0 %v3405_v33  ;;  %789 = vmatpush.bf16.msra.mxu1 %v3389_v28 }
 0x552   :  { %777 = vmatpush.bf16.msrb.mxu0 %v3425_v39  ;;  %790 = vmatpush.bf16.msra.mxu1 %v3409_v34 }
 0x556   :  { %778 = vmatpush.bf16.msrb.mxu0 %v3445_v45  ;;  %791 = vmatpush.bf16.msra.mxu1 %v3429_v40 }
 0x55a   :  { %779 = vmatpush.bf16.msrb.mxu0 %v3459_v49  ;;  %792 = vmatpush.bf16.msra.mxu1 %v3449_v46 }
 0x5ba   :  { %v470_v1 = vpop.f32.mrf.mxu0  ;;  %v483_v2 = vpop.f32.mrf.mxu1 }
 0x5bb   :  { %v2882_v4 = vmul.f32 -1.442695, %v483_v2  ;;  %v487_v12 = vadd.f32 %v470_v1, %v3646_v57 }
 0x5bd   :  { %2997 = vpow2.f32 %v2882_v4 }
 0x5c2   :  { %v472_v6 = vpop.f32.mrf.mxu0  ;;  %v485_v7 = vpop.f32.mrf.mxu1 }
 0x5c3   :  { %v2998_v9 = vpop.eup %2997 }
 0x5c4   :  { %v491_v11 = vadd.f32 1.0, %v2998_v9 }
 0x5c6   :  { %2999 = vrcp.f32 %v491_v11  ;;  %v503_v18 = vand.u32 2147483648, %v491_v11  ;;  %v501_v22 = vand.u32 2147483647, %v491_v11  ;;  %vm497_vm7 = vweird.f32 %v491_v11 }
 0x5c7   :  { %3001 = vtanh.f32 %v487_v12 }
 0x5c8   :  { %v504_v24 = vor.u32 1.1754944e-38, %v503_v18  ;;  %vm502_vm9 = vcmp.eq.f32.partialorder %v501_v22, 8.507059e+37 }
 0x5cc   :  { %v3000_v58 = vpop.eup %2999 }
 0x5cd   :  { %v493_v15 = vmul.f32 %v3000_v58, %v491_v11  ;;  %vm498_vm0 = vweird.f32 %v3000_v58  ;;  %v3002_v26 = vpop.eup %3001 }
 0x5ce   :  { %vm499_vm8 = vmor %vm497_vm7, %vm498_vm0 }
 0x5cf   :  { %v494_v16 = vsub.f32 1.0, %v493_v15 }
 0x5d1   :  { %v495_v20 = vmul.f32 %v3000_v58, %v494_v16 }
 0x5d3   :  { %v496_v23 = vadd.f32 %v3000_v58, %v495_v20 }
 0x5d5   :  { %v500_v25 = vsel %vm499_vm8, %v3000_v58, %v496_v23 }
 0x5d6   :  { %v505_v29 = vsel %vm502_vm9, %v504_v24, %v500_v25 }
 0x5d7   :  { %v508_v30 = vmul.f32 %v3002_v26, %v505_v29 }
 0x5d9   :  { %v509_v31 = vsub.f32 %v508_v30, %v458_v55  ;;  %v534_v55 = vadd.f32 %v3625_v53, %v3572_v42 }
 0x5db   :  { %v510_v32 = vmul.f32 %v3522_v8, %v509_v31  ;;  %v535_v7 = vmul.f32 3.0, %v534_v55 }
 0x5dd   :  { %511 = vadd.xlane.f32.xlu0 %v510_v32  ;;  %v536_v58 = vadd.f32 %v535_v7, %v3543_v43 }
 0x650   :  { %v512_v35 = vpop.xlane.xlu0 %511 }
 0x651   :  { %v513_v37 = vmul.f32 0.015625, %v512_v35 }
 0x653   :  { %v514_v38 = vsub.f32 %v510_v32, %v513_v37 }
 0x655   :  { %v515_v47 = vmul.f32 %v3528_v17, %v514_v38 }
 0x657   :  { %v516_v48 = vmul.f32 %v515_v47, %v515_v47 }
 0x659   :  { %517 = vadd.xlane.f32.xlu1 %v516_v48 }
 0x6cc   :  { %v518_v44 = vpop.xlane.xlu1 %517 }
 0x6cd   :  { %v519_v50 = vmul.f32 0.015625, %v518_v44 }
 0x6cf   :  { %v520_v51 = vadd.f32 1e-05, %v519_v50 }
 0x6d1   :  { %3003 = vrsqrt.f32 %v520_v51  ;;  %vm527_vm11 = vweird.f32 %v520_v51 }
 0x6d7   :  { %v3004_v52 = vpop.eup %3003 }
 0x6d8   :  { %v522_v54 = vmul.f32 %v3004_v52, %v520_v51  ;;  %vm528_vm10 = vweird.f32 %v3004_v52 }
 0x6d9   :  { %vm529_vm12 = vmor %vm527_vm11, %vm528_vm10 }
 0x6da   :  { %v523_v56 = vmul.f32 %v3004_v52, %v522_v54 }
 0x6dc   :  { %v524_v1 = vmul.f32 0.5, %v523_v56 }
 0x6de   :  { %v525_v2 = vsub.f32 1.5, %v524_v1 }
 0x6e0   :  { %v526_v4 = vmul.f32 %v3004_v52, %v525_v2 }
 0x6e2   :  { %v530_v6 = vsel %vm529_vm12, %v3004_v52, %v526_v4 }
 0x6e3   :  { %v531_v9 = vmul.f32 %v530_v6, %v515_v47 }
 0x6e5   :  { %v532_v11 = vmul.f32 %v3534_v36, %v531_v9 }
 0x6e7   :  { %v533_v12 = vadd.f32 %v3539_v41, %v532_v11 }
 0x6e9   :  { %v537_v15 = vadd.f32 %v536_v58, %v533_v12 }
 0x6eb   :  { %v3668_v16 = vmul.f32 0.125, %v537_v15 }
 0x6ed   :  { %v542_v18 = vpack.c.bf16 %v3668_v16, %v3668_v16 }
 0x6ef   :  { %551 = vmatmul.bf16.vlgmr.msra.gmra.mxu2 %v542_v18  ;;  %564 = vmatmul.bf16.vlgmr.msra.gmra.mxu3 %v542_v18 }
 0x6f0   :  { %854 = vmatpush.bf16.msra.mxu2 %v3330_v10  ;;  %867 = vmatpush.bf16.msra.mxu3 %v3310_v3 }
 0x6f4   :  { %855 = vmatpush.bf16.msra.mxu2 %v3339_v13  ;;  %868 = vmatpush.bf16.msra.mxu3 %v3316_v5 }
 0x6f8   :  { %856 = vmatpush.bf16.msra.mxu2 %v3358_v19  ;;  %869 = vmatpush.bf16.msra.mxu3 %v3343_v14 }
 0x6fc   :  { %857 = vmatpush.bf16.msra.mxu2 %v3385_v27  ;;  %870 = vmatpush.bf16.msra.mxu3 %v3365_v21 }
 0x700   :  { %858 = vmatpush.bf16.msra.mxu2 %v3405_v33  ;;  %871 = vmatpush.bf16.msra.mxu3 %v3389_v28 }
 0x704   :  { %859 = vmatpush.bf16.msra.mxu2 %v3425_v39  ;;  %872 = vmatpush.bf16.msra.mxu3 %v3409_v34 }
 0x708   :  { %860 = vmatpush.bf16.msra.mxu2 %v3445_v45  ;;  %873 = vmatpush.bf16.msra.mxu3 %v3429_v40 }
 0x70c   :  { %861 = vmatpush.bf16.msra.mxu2 %v3459_v49  ;;  %874 = vmatpush.bf16.msra.mxu3 %v3449_v46 }
 0x772   :  { %v552_v43 = vpop.f32.mrf.mxu2  ;;  %v565_v42 = vpop.f32.mrf.mxu3 }
 0x773   :  { %v2883_v53 = vmul.f32 -1.442695, %v565_v42  ;;  %v569_v26 = vadd.f32 %v552_v43, %v3646_v57 }
 0x775   :  { %3005 = vpow2.f32 %v2883_v53 }
 0x77a   :  { %v554_v20 = vpop.f32.mrf.mxu2  ;;  %v567_v22 = vpop.f32.mrf.mxu3 }
 0x77b   :  { %v3006_v23 = vpop.eup %3005 }
 0x77c   :  { %v573_v24 = vadd.f32 1.0, %v3006_v23 }
 0x77e   :  { %3007 = vrcp.f32 %v573_v24  ;;  %v585_v31 = vand.u32 2147483648, %v573_v24  ;;  %v583_v35 = vand.u32 2147483647, %v573_v24  ;;  %vm579_vm14 = vweird.f32 %v573_v24 }
 0x77f   :  { %3009 = vtanh.f32 %v569_v26 }
 0x780   :  { %v586_v38 = vor.u32 1.1754944e-38, %v585_v31  ;;  %vm584_vm1 = vcmp.eq.f32.partialorder %v583_v35, 8.507059e+37 }
 0x784   :  { %v3008_v25 = vpop.eup %3007 }
 0x785   :  { %v575_v29 = vmul.f32 %v3008_v25, %v573_v24  ;;  %vm580_vm13 = vweird.f32 %v3008_v25  ;;  %v3010_v48 = vpop.eup %3009 }
 0x786   :  { %vm581_vm15 = vmor %vm579_vm14, %vm580_vm13 }
 0x787   :  { %v576_v30 = vsub.f32 1.0, %v575_v29 }
 0x789   :  { %v577_v32 = vmul.f32 %v3008_v25, %v576_v30 }
 0x78b   :  { %v578_v37 = vadd.f32 %v3008_v25, %v577_v32 }
 0x78d   :  { %v582_v47 = vsel %vm581_vm15, %v3008_v25, %v578_v37 }
 0x78e   :  { %v587_v44 = vsel %vm584_vm1, %v586_v38, %v582_v47 }
 0x78f   :  { %v590_v50 = vmul.f32 %v3010_v48, %v587_v44 }
 0x791   :  { %v591_v51 = vsub.f32 %v590_v50, %v3668_v16 }
 0x793   :  { %v592_v52 = vmul.f32 %v3522_v8, %v591_v51 }
 0x795   :  { %593 = vadd.xlane.f32.xlu2 %v592_v52 }
 0x808   :  { %v594_v54 = vpop.xlane.xlu2 %593 }
 0x809   :  { %v595_v56 = vmul.f32 0.015625, %v594_v54 }
 0x80b   :  { %v596_v1 = vsub.f32 %v592_v52, %v595_v56 }
 0x80d   :  { %v597_v2 = vmul.f32 %v3528_v17, %v596_v1 }
 0x80f   :  { %v598_v55 = vmul.f32 %v597_v2, %v597_v2 }
 0x811   :  { %599 = vadd.xlane.f32.xlu0 %v598_v55 }
 0x884   :  { %v600_v4 = vpop.xlane.xlu0 %599 }
 0x885   :  { %v601_v6 = vmul.f32 0.015625, %v600_v4 }
 0x887   :  { %v602_v7 = vadd.f32 1e-05, %v601_v6 }
 0x889   :  { %3011 = vrsqrt.f32 %v602_v7  ;;  %vm609_vm3 = vweird.f32 %v602_v7 }
 0x88f   :  { %v3012_v9 = vpop.eup %3011 }
 0x890   :  { %v604_v11 = vmul.f32 %v3012_v9, %v602_v7  ;;  %vm610_vm2 = vweird.f32 %v3012_v9 }
 0x891   :  { %vm611_vm4 = vmor %vm609_vm3, %vm610_vm2 }
 0x892   :  { %v605_v58 = vmul.f32 %v3012_v9, %v604_v11 }
 0x894   :  { %v606_v12 = vmul.f32 0.5, %v605_v58 }
 0x896   :  { %v607_v15 = vsub.f32 1.5, %v606_v12 }
 0x898   :  { %v608_v18 = vmul.f32 %v3012_v9, %v607_v15 }
 0x89a   :  { %v612_v43 = vsel %vm611_vm4, %v3012_v9, %v608_v18 }
 0x89b   :  { %v613_v42 = vmul.f32 %v612_v43, %v597_v2 }
 0x89d   :  { %v614_v53 = vmul.f32 %v3534_v36, %v613_v42 }
 0x89f   :  { %v3694_v20 = vadd.f32 %v3539_v41, %v614_v53 }
 0x8a1   :  { %v3697_v22 = vmul.f32 0.33333334, %v3694_v20 }
 0x8a3   :  { %v617_v23 = vadd.f32 %v3697_v22, %v3668_v16 }
 0x8a5   :  { %v618_v24 = vpack.c.bf16 %v617_v23, %v617_v23 }
 0x8a7   :  { %627 = vmatmul.bf16.vlgmr.msra.gmra.mxu0 %v618_v24  ;;  %640 = vmatmul.bf16.vlgmr.msrb.gmra.mxu1 %v618_v24 }
 0x8a8   :  { %930 = vmatpush.bf16.msra.mxu0 %v3330_v10  ;;  %943 = vmatpush.bf16.msrb.mxu1 %v3310_v3 }
 0x8ac   :  { %931 = vmatpush.bf16.msra.mxu0 %v3339_v13  ;;  %944 = vmatpush.bf16.msrb.mxu1 %v3316_v5 }
 0x8b0   :  { %932 = vmatpush.bf16.msra.mxu0 %v3358_v19  ;;  %945 = vmatpush.bf16.msrb.mxu1 %v3343_v14 }
 0x8b4   :  { %933 = vmatpush.bf16.msra.mxu0 %v3385_v27  ;;  %946 = vmatpush.bf16.msrb.mxu1 %v3365_v21 }
 0x8b8   :  { %934 = vmatpush.bf16.msra.mxu0 %v3405_v33  ;;  %947 = vmatpush.bf16.msrb.mxu1 %v3389_v28 }
 0x8bc   :  { %935 = vmatpush.bf16.msra.mxu0 %v3425_v39  ;;  %948 = vmatpush.bf16.msrb.mxu1 %v3409_v34 }
 0x8c0   :  { %936 = vmatpush.bf16.msra.mxu0 %v3445_v45  ;;  %949 = vmatpush.bf16.msrb.mxu1 %v3429_v40 }
 0x8c4   :  { %937 = vmatpush.bf16.msra.mxu0 %v3459_v49  ;;  %950 = vmatpush.bf16.msrb.mxu1 %v3449_v46 }
 0x924   :  { %v628_v25 = vpop.f32.mrf.mxu0  ;;  %v641_v26 = vpop.f32.mrf.mxu1 }
 0x925   :  { %v2884_v29 = vmul.f32 -1.442695, %v641_v26  ;;  %v645_v38 = vadd.f32 %v628_v25, %v3646_v57 }
 0x927   :  { %3013 = vpow2.f32 %v2884_v29 }
 0x92c   :  { %v630_v30 = vpop.f32.mrf.mxu0  ;;  %v643_v31 = vpop.f32.mrf.mxu1 }
 0x92d   :  { %v3014_v32 = vpop.eup %3013 }
 0x92e   :  { %v649_v35 = vadd.f32 1.0, %v3014_v32 }
 0x930   :  { %3015 = vrcp.f32 %v649_v35  ;;  %v661_v44 = vand.u32 2147483648, %v649_v35  ;;  %v659_v51 = vand.u32 2147483647, %v649_v35  ;;  %vm655_vm6 = vweird.f32 %v649_v35 }
 0x931   :  { %3017 = vtanh.f32 %v645_v38 }
 0x932   :  { %v662_v54 = vor.u32 1.1754944e-38, %v661_v44  ;;  %vm660_vm7 = vcmp.eq.f32.partialorder %v659_v51, 8.507059e+37 }
 0x936   :  { %v3016_v37 = vpop.eup %3015 }
 0x937   :  { %v651_v47 = vmul.f32 %v3016_v37, %v649_v35  ;;  %vm656_vm5 = vweird.f32 %v3016_v37  ;;  %v3018_v1 = vpop.eup %3017 }
 0x938   :  { %vm657_vm0 = vmor %vm655_vm6, %vm656_vm5 }
 0x939   :  { %v652_v48 = vsub.f32 1.0, %v651_v47 }
 0x93b   :  { %v653_v50 = vmul.f32 %v3016_v37, %v652_v48 }
 0x93d   :  { %v654_v52 = vadd.f32 %v3016_v37, %v653_v50 }
 0x93f   :  { %v658_v56 = vsel %vm657_vm0, %v3016_v37, %v654_v52 }
 0x940   :  { %v663_v2 = vsel %vm660_vm7, %v662_v54, %v658_v56 }
 0x941   :  { %v666_v55 = vmul.f32 %v3018_v1, %v663_v2 }
 0x943   :  { %v667_v4 = vsub.f32 %v666_v55, %v617_v23 }
 0x945   :  { %v668_v6 = vmul.f32 %v3522_v8, %v667_v4 }
 0x947   :  { %669 = vadd.xlane.f32.xlu1 %v668_v6 }
 0x9ba   :  { %v670_v7 = vpop.xlane.xlu1 %669 }
 0x9bb   :  { %v671_v9 = vmul.f32 0.015625, %v670_v7 }
 0x9bd   :  { %v672_v11 = vsub.f32 %v668_v6, %v671_v9 }
 0x9bf   :  { %v673_v58 = vmul.f32 %v3528_v17, %v672_v11 }
 0x9c1   :  { %v674_v12 = vmul.f32 %v673_v58, %v673_v58 }
 0x9c3   :  { %675 = vadd.xlane.f32.xlu2 %v674_v12 }
 0xa36   :  { %v676_v15 = vpop.xlane.xlu2 %675 }
 0xa37   :  { %v677_v18 = vmul.f32 0.015625, %v676_v15 }
 0xa39   :  { %v678_v43 = vadd.f32 1e-05, %v677_v18 }
 0xa3b   :  { %3019 = vrsqrt.f32 %v678_v43  ;;  %vm685_vm9 = vweird.f32 %v678_v43 }
 0xa41   :  { %v3020_v42 = vpop.eup %3019 }
 0xa42   :  { %v680_v53 = vmul.f32 %v3020_v42, %v678_v43  ;;  %vm686_vm8 = vweird.f32 %v3020_v42 }
 0xa43   :  { %vm687_vm10 = vmor %vm685_vm9, %vm686_vm8 }
 0xa44   :  { %v681_v24 = vmul.f32 %v3020_v42, %v680_v53 }
 0xa46   :  { %v682_v25 = vmul.f32 0.5, %v681_v24 }
 0xa48   :  { %v683_v26 = vsub.f32 1.5, %v682_v25 }
 0xa4a   :  { %v684_v23 = vmul.f32 %v3020_v42, %v683_v26 }
 0xa4c   :  { %v688_v29 = vsel %vm687_vm10, %v3020_v42, %v684_v23 }
 0xa4d   :  { %v689_v30 = vmul.f32 %v688_v29, %v673_v58 }
 0xa4f   :  { %v690_v31 = vmul.f32 %v3534_v36, %v689_v30 }
 0xa51   :  { %v3722_v32 = vadd.f32 %v3539_v41, %v690_v31 }
 0xa53   :  { %v692_v35 = vsub.f32 %v3722_v32, %v3697_v22 }
 0xa55   :  { %v693_v37 = vadd.f32 %v692_v35, %v3668_v16 }
 0xa57   :  { %v694_v38 = vpack.c.bf16 %v693_v37, %v693_v37 }
 0xa59   :  { %703 = vmatmul.bf16.vlgmr.msrb.gmra.mxu2 %v694_v38  ;;  %716 = vmatmul.bf16.vlgmr.msrb.gmra.mxu3 %v694_v38 }
 0xa5a   :  { %1006 = vmatpush.bf16.msrb.mxu2 %v3330_v10  ;;  %1019 = vmatpush.bf16.msrb.mxu3 %v3310_v3 }
 0xa5e   :  { %1007 = vmatpush.bf16.msrb.mxu2 %v3339_v13  ;;  %1020 = vmatpush.bf16.msrb.mxu3 %v3316_v5 }
 0xa62   :  { %1008 = vmatpush.bf16.msrb.mxu2 %v3358_v19  ;;  %1021 = vmatpush.bf16.msrb.mxu3 %v3343_v14 }
 0xa66   :  { %1009 = vmatpush.bf16.msrb.mxu2 %v3385_v27  ;;  %1022 = vmatpush.bf16.msrb.mxu3 %v3365_v21 }
 0xa6a   :  { %1010 = vmatpush.bf16.msrb.mxu2 %v3405_v33  ;;  %1023 = vmatpush.bf16.msrb.mxu3 %v3389_v28 }
 0xa6e   :  { %1011 = vmatpush.bf16.msrb.mxu2 %v3425_v39  ;;  %1024 = vmatpush.bf16.msrb.mxu3 %v3409_v34 }
 0xa72   :  { %1012 = vmatpush.bf16.msrb.mxu2 %v3445_v45  ;;  %1025 = vmatpush.bf16.msrb.mxu3 %v3429_v40 }
 0xa76   :  { %1013 = vmatpush.bf16.msrb.mxu2 %v3459_v49  ;;  %1026 = vmatpush.bf16.msrb.mxu3 %v3449_v46 }
 0xadc   :  { %v704_v22 = vpop.f32.mrf.mxu2  ;;  %v717_v47 = vpop.f32.mrf.mxu3 }
 0xadd   :  { %v2885_v48 = vmul.f32 -1.442695, %v717_v47  ;;  %v721_v56 = vadd.f32 %v704_v22, %v3646_v57 }
 0xadf   :  { %3021 = vpow2.f32 %v2885_v48 }
 0xae4   :  { %v706_v44 = vpop.f32.mrf.mxu2  ;;  %v719_v50 = vpop.f32.mrf.mxu3 }
 0xae5   :  { %v3022_v51 = vpop.eup %3021  ;;  %v768_v44 = vsub.f32 %v3694_v20, %v3722_v32 }
 0xae6   :  { %v725_v52 = vadd.f32 1.0, %v3022_v51 }
 0xae8   :  { %3023 = vrcp.f32 %v725_v52  ;;  %v737_v55 = vand.u32 2147483648, %v725_v52  ;;  %v735_v6 = vand.u32 2147483647, %v725_v52  ;;  %vm731_vm12 = vweird.f32 %v725_v52 }
 0xae9   :  { %3025 = vtanh.f32 %v721_v56 }
 0xaea   :  { %v738_v9 = vor.u32 1.1754944e-38, %v737_v55  ;;  %vm736_vm14 = vcmp.eq.f32.partialorder %v735_v6, 8.507059e+37 }
 0xaee   :  { %v3024_v54 = vpop.eup %3023 }
 0xaef   :  { %v727_v1 = vmul.f32 %v3024_v54, %v725_v52  ;;  %vm732_vm11 = vweird.f32 %v3024_v54  ;;  %v3026_v58 = vpop.eup %3025 }
 0xaf0   :  { %vm733_vm13 = vmor %vm731_vm12, %vm732_vm11 }
 0xaf1   :  { %v728_v2 = vsub.f32 1.0, %v727_v1 }
 0xaf3   :  { %v729_v4 = vmul.f32 %v3024_v54, %v728_v2 }
 0xaf5   :  { %v730_v7 = vadd.f32 %v3024_v54, %v729_v4 }
 0xaf7   :  { %v734_v11 = vsel %vm733_vm13, %v3024_v54, %v730_v7 }
 0xaf8   :  { %v739_v12 = vsel %vm736_vm14, %v738_v9, %v734_v11 }
 0xaf9   :  { %v742_v15 = vmul.f32 %v3026_v58, %v739_v12 }
 0xafb   :  { %v743_v18 = vsub.f32 %v742_v15, %v693_v37 }
 0xafd   :  { %v744_v43 = vmul.f32 %v3522_v8, %v743_v18 }
 0xaff   :  { %745 = vadd.xlane.f32.xlu0 %v744_v43 }
 0xb72   :  { %v746_v57 = vpop.xlane.xlu0 %745 }
 0xb73   :  { %v747_v42 = vmul.f32 0.015625, %v746_v57 }
 0xb75   :  { %v748_v53 = vsub.f32 %v744_v43, %v747_v42 }
 0xb77   :  { %v749_v24 = vmul.f32 %v3528_v17, %v748_v53 }
 0xb79   :  { %v750_v25 = vmul.f32 %v749_v24, %v749_v24 }
 0xb7b   :  { %751 = vadd.xlane.f32.xlu1 %v750_v25  ;;  %v3774_v25 = vld [vmem:[%s4493_s3] ss:$0 sm:$0xff] }
 0xbee   :  { %v752_v26 = vpop.xlane.xlu1 %751 }
 0xbef   :  { %v753_v23 = vmul.f32 0.015625, %v752_v26 }
 0xbf1   :  { %v754_v29 = vadd.f32 1e-05, %v753_v23 }
 0xbf3   :  { %3027 = vrsqrt.f32 %v754_v29  ;;  %vm761_vm1 = vweird.f32 %v754_v29 }
 0xbf9   :  { %v3028_v30 = vpop.eup %3027 }
 0xbfa   :  { %v756_v31 = vmul.f32 %v3028_v30, %v754_v29  ;;  %vm762_vm15 = vweird.f32 %v3028_v30 }
 0xbfb   :  { %vm763_vm2 = vmor %vm761_vm1, %vm762_vm15 }
 0xbfc   :  { %v757_v35 = vmul.f32 %v3028_v30, %v756_v31  ;;  %v3780_v31 = vld [vmem:[%s4494_s6] ss:$0 sm:$0xff] }
 0xbfe   :  { %v758_v38 = vmul.f32 0.5, %v757_v35 }
 0xc00   :  { %v759_v22 = vsub.f32 1.5, %v758_v38 }
 0xc02   :  { %v760_v37 = vmul.f32 %v3028_v30, %v759_v22 }
 0xc04   :  { %v764_v8 = vsel %vm763_vm2, %v3028_v30, %v760_v37 }
 0xc05   :  { %v765_v47 = vmul.f32 %v764_v8, %v749_v24 }
 0xc07   :  { %v766_v48 = vmul.f32 %v3534_v36, %v765_v47 }
 0xc09   :  { %v3748_v17 = vadd.f32 %v3539_v41, %v766_v48 }
 0xc0b   :  { %v769_v50 = vadd.f32 %v768_v44, %v3748_v17 }
 0xc0d   :  { %v770_v51 = vadd.f32 %v769_v50, %v3668_v16 }
 0xc0f   :  { %v771_v52 = vpack.c.bf16 %v770_v51, %v770_v51 }
 0xc11   :  { %780 = vmatmul.bf16.vlgmr.msrb.gmra.mxu0 %v771_v52  ;;  %793 = vmatmul.bf16.vlgmr.msra.gmra.mxu1 %v771_v52  ;;  %v845_v52 = vadd.f32 %v3748_v17, %v3722_v32 }
 0xc12   :  { %1083 = vmatpush.bf16.msrb.mxu0 %v3330_v10  ;;  %1096 = vmatpush.bf16.msra.mxu1 %v3310_v3 }
 0xc16   :  { %1084 = vmatpush.bf16.msrb.mxu0 %v3339_v13  ;;  %1097 = vmatpush.bf16.msra.mxu1 %v3316_v5 }
 0xc1a   :  { %1085 = vmatpush.bf16.msrb.mxu0 %v3358_v19  ;;  %1098 = vmatpush.bf16.msra.mxu1 %v3343_v14 }
 0xc1e   :  { %1086 = vmatpush.bf16.msrb.mxu0 %v3385_v27  ;;  %1099 = vmatpush.bf16.msra.mxu1 %v3365_v21 }
 0xc22   :  { %1087 = vmatpush.bf16.msrb.mxu0 %v3405_v33  ;;  %1100 = vmatpush.bf16.msra.mxu1 %v3389_v28 }
 0xc26   :  { %1088 = vmatpush.bf16.msrb.mxu0 %v3425_v39  ;;  %1101 = vmatpush.bf16.msra.mxu1 %v3409_v34 }
 0xc2a   :  { %1089 = vmatpush.bf16.msrb.mxu0 %v3445_v45  ;;  %1102 = vmatpush.bf16.msra.mxu1 %v3429_v40 }
 0xc2e   :  { %1090 = vmatpush.bf16.msrb.mxu0 %v3459_v49  ;;  %1103 = vmatpush.bf16.msra.mxu1 %v3449_v46 }
 0xc8e   :  { %v781_v36 = vpop.f32.mrf.mxu0  ;;  %v794_v41 = vpop.f32.mrf.mxu1 }
 0xc8f   :  { %v2886_v54 = vmul.f32 -1.442695, %v794_v41  ;;  %v798_v6 = vadd.f32 %v781_v36, %v3648_v59 }
 0xc91   :  { %3029 = vpow2.f32 %v2886_v54  ;;  %v846_v54 = vmul.f32 3.0, %v845_v52 }
 0xc96   :  { %v783_v56 = vpop.f32.mrf.mxu0  ;;  %v796_v1 = vpop.f32.mrf.mxu1 }
 0xc97   :  { %v3030_v2 = vpop.eup %3029  ;;  %v3788_v1 = vld [vmem:[%s4495_s4] ss:$0 sm:$0xff] }
 0xc98   :  { %v802_v55 = vadd.f32 1.0, %v3030_v2 }
 0xc9a   :  { %3031 = vrcp.f32 %v802_v55  ;;  %v814_v11 = vand.u32 2147483648, %v802_v55  ;;  %v812_v12 = vand.u32 2147483647, %v802_v55  ;;  %vm808_vm4 = vweird.f32 %v802_v55 }
 0xc9b   :  { %3033 = vtanh.f32 %v798_v6 }
 0xc9c   :  { %v815_v18 = vor.u32 1.1754944e-38, %v814_v11  ;;  %vm813_vm6 = vcmp.eq.f32.partialorder %v812_v12, 8.507059e+37 }
 0xca0   :  { %v3032_v4 = vpop.eup %3031 }
 0xca1   :  { %v804_v7 = vmul.f32 %v3032_v4, %v802_v55  ;;  %vm809_vm3 = vweird.f32 %v3032_v4  ;;  %v3034_v57 = vpop.eup %3033  ;;  %v847_v55 = vadd.f32 %v846_v54, %v3694_v20 }
 0xca2   :  { %vm810_vm5 = vmor %vm808_vm4, %vm809_vm3 }
 0xca3   :  { %v805_v9 = vsub.f32 1.0, %v804_v7 }
 0xca5   :  { %v806_v58 = vmul.f32 %v3032_v4, %v805_v9 }
 0xca7   :  { %v807_v15 = vadd.f32 %v3032_v4, %v806_v58 }
 0xca9   :  { %v811_v43 = vsel %vm810_vm5, %v3032_v4, %v807_v15  ;;  %v3795_v4 = vld [vmem:[%s4496_s5] ss:$0 sm:$0xff] }
 0xcaa   :  { %v816_v42 = vsel %vm813_vm6, %v815_v18, %v811_v43 }
 0xcab   :  { %v819_v53 = vmul.f32 %v3034_v57, %v816_v42 }
 0xcad   :  { %v820_v24 = vsub.f32 %v819_v53, %v770_v51 }
 0xcaf   :  { %v821_v26 = vmul.f32 %v3774_v25, %v820_v24 }
 0xcb1   :  { %822 = vadd.xlane.f32.xlu2 %v821_v26 }
 0xd24   :  { %v823_v23 = vpop.xlane.xlu2 %822 }
 0xd25   :  { %v824_v29 = vmul.f32 0.015625, %v823_v23 }
 0xd27   :  { %v825_v30 = vsub.f32 %v821_v26, %v824_v29 }
 0xd29   :  { %v826_v35 = vmul.f32 %v3780_v31, %v825_v30 }
 0xd2b   :  { %v827_v38 = vmul.f32 %v826_v35, %v826_v35 }
 0xd2d   :  { %828 = vadd.xlane.f32.xlu0 %v827_v38 }
 0xda0   :  { %v829_v22 = vpop.xlane.xlu0 %828 }
 0xda1   :  { %v830_v37 = vmul.f32 0.015625, %v829_v22 }
 0xda3   :  { %v831_v8 = vadd.f32 1e-05, %v830_v37 }
 0xda5   :  { %3035 = vrsqrt.f32 %v831_v8  ;;  %vm838_vm7 = vweird.f32 %v831_v8 }
 0xdab   :  { %v3036_v47 = vpop.eup %3035 }
 0xdac   :  { %v833_v48 = vmul.f32 %v3036_v47, %v831_v8  ;;  %vm839_vm0 = vweird.f32 %v3036_v47 }
 0xdad   :  { %vm840_vm8 = vmor %vm838_vm7, %vm839_vm0 }
 0xdae   :  { %v834_v44 = vmul.f32 %v3036_v47, %v833_v48 }
 0xdb0   :  { %v835_v50 = vmul.f32 0.5, %v834_v44 }
 0xdb2   :  { %v836_v51 = vsub.f32 1.5, %v835_v50 }
 0xdb4   :  { %v837_v36 = vmul.f32 %v3036_v47, %v836_v51 }
 0xdb6   :  { %v841_v41 = vsel %vm840_vm8, %v3036_v47, %v837_v36 }
 0xdb7   :  { %v842_v56 = vmul.f32 %v841_v41, %v826_v35 }
 0xdb9   :  { %v843_v2 = vmul.f32 %v3788_v1, %v842_v56 }
 0xdbb   :  { %v844_v32 = vadd.f32 %v3795_v4, %v843_v2 }
 0xdbd   :  { %v848_v17 = vadd.f32 %v847_v55, %v844_v32 }
 0xdbf   :  { %v849_v6 = vmul.f32 0.125, %v848_v17 }
 0xdc1   :  { %v3799_v7 = vadd.f32 %v849_v6, %v3668_v16 }
 0xdc3   :  { %v853_v9 = vpack.c.bf16 %v3799_v7, %v3799_v7 }
 0xdc5   :  { %862 = vmatmul.bf16.vlgmr.msra.gmra.mxu2 %v853_v9  ;;  %875 = vmatmul.bf16.vlgmr.msra.gmra.mxu3 %v853_v9 }
 0xdc6   :  { %1165 = vmatpush.bf16.msra.mxu2 %v3330_v10  ;;  %1178 = vmatpush.bf16.msra.mxu3 %v3310_v3 }
 0xdca   :  { %1166 = vmatpush.bf16.msra.mxu2 %v3339_v13  ;;  %1179 = vmatpush.bf16.msra.mxu3 %v3316_v5 }
 0xdce   :  { %1167 = vmatpush.bf16.msra.mxu2 %v3358_v19  ;;  %1180 = vmatpush.bf16.msra.mxu3 %v3343_v14 }
 0xdd2   :  { %1168 = vmatpush.bf16.msra.mxu2 %v3385_v27  ;;  %1181 = vmatpush.bf16.msra.mxu3 %v3365_v21 }
 0xdd6   :  { %1169 = vmatpush.bf16.msra.mxu2 %v3405_v33  ;;  %1182 = vmatpush.bf16.msra.mxu3 %v3389_v28 }
 0xdda   :  { %1170 = vmatpush.bf16.msra.mxu2 %v3425_v39  ;;  %1183 = vmatpush.bf16.msra.mxu3 %v3409_v34 }
 0xdde   :  { %1171 = vmatpush.bf16.msra.mxu2 %v3445_v45  ;;  %1184 = vmatpush.bf16.msra.mxu3 %v3429_v40 }
 0xde2   :  { %1172 = vmatpush.bf16.msra.mxu2 %v3459_v49  ;;  %1185 = vmatpush.bf16.msra.mxu3 %v3449_v46 }
 0xe48   :  { %v863_v16 = vpop.f32.mrf.mxu2  ;;  %v876_v20 = vpop.f32.mrf.mxu3 }
 0xe49   :  { %v2887_v11 = vmul.f32 -1.442695, %v876_v20  ;;  %v880_v57 = vadd.f32 %v863_v16, %v3648_v59 }
 0xe4b   :  { %3037 = vpow2.f32 %v2887_v11 }
 0xe50   :  { %v865_v58 = vpop.f32.mrf.mxu2  ;;  %v878_v12 = vpop.f32.mrf.mxu3 }
 0xe51   :  { %v3038_v15 = vpop.eup %3037 }
 0xe52   :  { %v884_v18 = vadd.f32 1.0, %v3038_v15 }
 0xe54   :  { %3039 = vrcp.f32 %v884_v18  ;;  %v896_v24 = vand.u32 2147483648, %v884_v18  ;;  %v894_v23 = vand.u32 2147483647, %v884_v18  ;;  %vm890_vm10 = vweird.f32 %v884_v18 }
 0xe55   :  { %3041 = vtanh.f32 %v880_v57 }
 0xe56   :  { %v897_v30 = vor.u32 1.1754944e-38, %v896_v24  ;;  %vm895_vm12 = vcmp.eq.f32.partialorder %v894_v23, 8.507059e+37 }
 0xe5a   :  { %v3040_v43 = vpop.eup %3039 }
 0xe5b   :  { %v886_v42 = vmul.f32 %v3040_v43, %v884_v18  ;;  %vm891_vm9 = vweird.f32 %v3040_v43  ;;  %v3042_v38 = vpop.eup %3041 }
 0xe5c   :  { %vm892_vm11 = vmor %vm890_vm10, %vm891_vm9 }
 0xe5d   :  { %v887_v53 = vsub.f32 1.0, %v886_v42 }
 0xe5f   :  { %v888_v26 = vmul.f32 %v3040_v43, %v887_v53 }
 0xe61   :  { %v889_v29 = vadd.f32 %v3040_v43, %v888_v26 }
 0xe63   :  { %v893_v35 = vsel %vm892_vm11, %v3040_v43, %v889_v29 }
 0xe64   :  { %v898_v22 = vsel %vm895_vm12, %v897_v30, %v893_v35 }
 0xe65   :  { %v901_v37 = vmul.f32 %v3042_v38, %v898_v22 }
 0xe67   :  { %v902_v8 = vsub.f32 %v901_v37, %v3799_v7 }
 0xe69   :  { %v903_v47 = vmul.f32 %v3774_v25, %v902_v8 }
 0xe6b   :  { %904 = vadd.xlane.f32.xlu1 %v903_v47 }
 0xede   :  { %v905_v48 = vpop.xlane.xlu1 %904 }
 0xedf   :  { %v906_v44 = vmul.f32 0.015625, %v905_v48 }
 0xee1   :  { %v907_v50 = vsub.f32 %v903_v47, %v906_v44 }
 0xee3   :  { %v908_v51 = vmul.f32 %v3780_v31, %v907_v50 }
 0xee5   :  { %v909_v52 = vmul.f32 %v908_v51, %v908_v51 }
 0xee7   :  { %910 = vadd.xlane.f32.xlu2 %v909_v52 }
 0xf5a   :  { %v911_v36 = vpop.xlane.xlu2 %910 }
 0xf5b   :  { %v912_v41 = vmul.f32 0.015625, %v911_v36 }
 0xf5d   :  { %v913_v54 = vadd.f32 1e-05, %v912_v41 }
 0xf5f   :  { %3043 = vrsqrt.f32 %v913_v54  ;;  %vm920_vm14 = vweird.f32 %v913_v54 }
 0xf65   :  { %v3044_v56 = vpop.eup %3043 }
 0xf66   :  { %v915_v2 = vmul.f32 %v3044_v56, %v913_v54  ;;  %vm921_vm13 = vweird.f32 %v3044_v56 }
 0xf67   :  { %vm922_vm15 = vmor %vm920_vm14, %vm921_vm13 }
 0xf68   :  { %v916_v55 = vmul.f32 %v3044_v56, %v915_v2 }
 0xf6a   :  { %v917_v32 = vmul.f32 0.5, %v916_v55 }
 0xf6c   :  { %v918_v17 = vsub.f32 1.5, %v917_v32 }
 0xf6e   :  { %v919_v6 = vmul.f32 %v3044_v56, %v918_v17 }
 0xf70   :  { %v923_v9 = vsel %vm922_vm15, %v3044_v56, %v919_v6 }
 0xf71   :  { %v924_v16 = vmul.f32 %v923_v9, %v908_v51 }
 0xf73   :  { %v925_v20 = vmul.f32 %v3788_v1, %v924_v16 }
 0xf75   :  { %v3825_v11 = vadd.f32 %v3795_v4, %v925_v20 }
 0xf77   :  { %v3828_v58 = vmul.f32 0.33333334, %v3825_v11 }
 0xf79   :  { %v928_v12 = vadd.f32 %v3828_v58, %v3799_v7 }
 0xf7b   :  { %v929_v15 = vpack.c.bf16 %v928_v12, %v928_v12 }
 0xf7d   :  { %938 = vmatmul.bf16.vlgmr.msra.gmra.mxu0 %v929_v15  ;;  %951 = vmatmul.bf16.vlgmr.msrb.gmra.mxu1 %v929_v15 }
 0xf7e   :  { %1241 = vmatpush.bf16.msra.mxu0 %v3330_v10  ;;  %1254 = vmatpush.bf16.msrb.mxu1 %v3310_v3 }
 0xf82   :  { %1242 = vmatpush.bf16.msra.mxu0 %v3339_v13  ;;  %1255 = vmatpush.bf16.msrb.mxu1 %v3316_v5 }
 0xf86   :  { %1243 = vmatpush.bf16.msra.mxu0 %v3358_v19  ;;  %1256 = vmatpush.bf16.msrb.mxu1 %v3343_v14 }
 0xf8a   :  { %1244 = vmatpush.bf16.msra.mxu0 %v3385_v27  ;;  %1257 = vmatpush.bf16.msrb.mxu1 %v3365_v21 }
 0xf8e   :  { %1245 = vmatpush.bf16.msra.mxu0 %v3405_v33  ;;  %1258 = vmatpush.bf16.msrb.mxu1 %v3389_v28 }
 0xf92   :  { %1246 = vmatpush.bf16.msra.mxu0 %v3425_v39  ;;  %1259 = vmatpush.bf16.msrb.mxu1 %v3409_v34 }
 0xf96   :  { %1247 = vmatpush.bf16.msra.mxu0 %v3445_v45  ;;  %1260 = vmatpush.bf16.msrb.mxu1 %v3429_v40 }
 0xf9a   :  { %1248 = vmatpush.bf16.msra.mxu0 %v3459_v49  ;;  %1261 = vmatpush.bf16.msrb.mxu1 %v3449_v46 }
 0xffa   :  { %v939_v18 = vpop.f32.mrf.mxu0  ;;  %v952_v43 = vpop.f32.mrf.mxu1 }
 0xffb   :  { %v2888_v57 = vmul.f32 -1.442695, %v952_v43  ;;  %v956_v29 = vadd.f32 %v939_v18, %v3648_v59 }
 0xffd   :  { %3045 = vpow2.f32 %v2888_v57 }
0x1002   :  { %v941_v42 = vpop.f32.mrf.mxu0  ;;  %v954_v53 = vpop.f32.mrf.mxu1 }
0x1003   :  { %v3046_v24 = vpop.eup %3045 }
0x1004   :  { %v960_v26 = vadd.f32 1.0, %v3046_v24 }
0x1006   :  { %3047 = vrcp.f32 %v960_v26  ;;  %v972_v38 = vand.u32 2147483648, %v960_v26  ;;  %v970_v37 = vand.u32 2147483647, %v960_v26  ;;  %vm966_vm2 = vweird.f32 %v960_v26 }
0x1007   :  { %3049 = vtanh.f32 %v956_v29 }
0x1008   :  { %v973_v47 = vor.u32 1.1754944e-38, %v972_v38  ;;  %vm971_vm4 = vcmp.eq.f32.partialorder %v970_v37, 8.507059e+37 }
0x100c   :  { %v3048_v23 = vpop.eup %3047 }
0x100d   :  { %v962_v30 = vmul.f32 %v3048_v23, %v960_v26  ;;  %vm967_vm1 = vweird.f32 %v3048_v23  ;;  %v3050_v44 = vpop.eup %3049 }
0x100e   :  { %vm968_vm3 = vmor %vm966_vm2, %vm967_vm1 }
0x100f   :  { %v963_v35 = vsub.f32 1.0, %v962_v30 }
0x1011   :  { %v964_v22 = vmul.f32 %v3048_v23, %v963_v35 }
0x1013   :  { %v965_v8 = vadd.f32 %v3048_v23, %v964_v22 }
0x1015   :  { %v969_v48 = vsel %vm968_vm3, %v3048_v23, %v965_v8 }
0x1016   :  { %v974_v50 = vsel %vm971_vm4, %v973_v47, %v969_v48 }
0x1017   :  { %v977_v51 = vmul.f32 %v3050_v44, %v974_v50 }
0x1019   :  { %v978_v52 = vsub.f32 %v977_v51, %v928_v12 }
0x101b   :  { %v979_v36 = vmul.f32 %v3774_v25, %v978_v52 }
0x101d   :  { %980 = vadd.xlane.f32.xlu0 %v979_v36 }
0x1090   :  { %v981_v41 = vpop.xlane.xlu0 %980 }
0x1091   :  { %v982_v54 = vmul.f32 0.015625, %v981_v41 }
0x1093   :  { %v983_v56 = vsub.f32 %v979_v36, %v982_v54 }
0x1095   :  { %v984_v2 = vmul.f32 %v3780_v31, %v983_v56 }
0x1097   :  { %v985_v55 = vmul.f32 %v984_v2, %v984_v2 }
0x1099   :  { %986 = vadd.xlane.f32.xlu1 %v985_v55 }
0x110c   :  { %v987_v32 = vpop.xlane.xlu1 %986 }
0x110d   :  { %v988_v17 = vmul.f32 0.015625, %v987_v32 }
0x110f   :  { %v989_v6 = vadd.f32 1e-05, %v988_v17 }
0x1111   :  { %3051 = vrsqrt.f32 %v989_v6  ;;  %vm996_vm6 = vweird.f32 %v989_v6 }
0x1117   :  { %v3052_v9 = vpop.eup %3051 }
0x1118   :  { %v991_v16 = vmul.f32 %v3052_v9, %v989_v6  ;;  %vm997_vm5 = vweird.f32 %v3052_v9 }
0x1119   :  { %vm998_vm0 = vmor %vm996_vm6, %vm997_vm5 }
0x111a   :  { %v992_v20 = vmul.f32 %v3052_v9, %v991_v16 }
0x111c   :  { %v993_v15 = vmul.f32 0.5, %v992_v20 }
0x111e   :  { %v994_v18 = vsub.f32 1.5, %v993_v15 }
0x1120   :  { %v995_v12 = vmul.f32 %v3052_v9, %v994_v18 }
0x1122   :  { %v999_v43 = vsel %vm998_vm0, %v3052_v9, %v995_v12 }
0x1123   :  { %v1000_v57 = vmul.f32 %v999_v43, %v984_v2 }
0x1125   :  { %v1001_v42 = vmul.f32 %v3788_v1, %v1000_v57 }
0x1127   :  { %v3853_v53 = vadd.f32 %v3795_v4, %v1001_v42 }
0x1129   :  { %v1003_v24 = vsub.f32 %v3853_v53, %v3828_v58 }
0x112b   :  { %v1004_v26 = vadd.f32 %v1003_v24, %v3799_v7 }
0x112d   :  { %v1005_v23 = vpack.c.bf16 %v1004_v26, %v1004_v26 }
0x112f   :  { %1014 = vmatmul.bf16.vlgmr.msrb.gmra.mxu2 %v1005_v23  ;;  %1027 = vmatmul.bf16.vlgmr.msrb.gmra.mxu3 %v1005_v23 }
0x1130   :  { %1317 = vmatpush.bf16.msrb.mxu2 %v3330_v10  ;;  %1330 = vmatpush.bf16.msrb.mxu3 %v3310_v3 }
0x1134   :  { %1318 = vmatpush.bf16.msrb.mxu2 %v3339_v13  ;;  %1331 = vmatpush.bf16.msrb.mxu3 %v3316_v5 }
0x1138   :  { %1319 = vmatpush.bf16.msrb.mxu2 %v3358_v19  ;;  %1332 = vmatpush.bf16.msrb.mxu3 %v3343_v14 }
0x113c   :  { %1320 = vmatpush.bf16.msrb.mxu2 %v3385_v27  ;;  %1333 = vmatpush.bf16.msrb.mxu3 %v3365_v21 }
0x1140   :  { %1321 = vmatpush.bf16.msrb.mxu2 %v3405_v33  ;;  %1334 = vmatpush.bf16.msrb.mxu3 %v3389_v28 }
0x1144   :  { %1322 = vmatpush.bf16.msrb.mxu2 %v3425_v39  ;;  %1335 = vmatpush.bf16.msrb.mxu3 %v3409_v34 }
0x1148   :  { %1323 = vmatpush.bf16.msrb.mxu2 %v3445_v45  ;;  %1336 = vmatpush.bf16.msrb.mxu3 %v3429_v40 }
0x114c   :  { %1324 = vmatpush.bf16.msrb.mxu2 %v3459_v49  ;;  %1337 = vmatpush.bf16.msrb.mxu3 %v3449_v46 }
0x11b2   :  { %v1015_v58 = vpop.f32.mrf.mxu2  ;;  %v1028_v29 = vpop.f32.mrf.mxu3 }
0x11b3   :  { %v2889_v30 = vmul.f32 -1.442695, %v1028_v29  ;;  %v1032_v47 = vadd.f32 %v1015_v58, %v3648_v59 }
0x11b5   :  { %3053 = vpow2.f32 %v2889_v30 }
0x11ba   :  { %v1017_v35 = vpop.f32.mrf.mxu2  ;;  %v1030_v38 = vpop.f32.mrf.mxu3 }
0x11bb   :  { %v3054_v22 = vpop.eup %3053  ;;  %v1079_v38 = vsub.f32 %v3825_v11, %v3853_v53 }
0x11bc   :  { %v1036_v37 = vadd.f32 1.0, %v3054_v22 }
0x11be   :  { %3055 = vrcp.f32 %v1036_v37  ;;  %v1048_v50 = vand.u32 2147483648, %v1036_v37  ;;  %v1046_v52 = vand.u32 2147483647, %v1036_v37  ;;  %vm1042_vm8 = vweird.f32 %v1036_v37 }
0x11bf   :  { %3057 = vtanh.f32 %v1032_v47 }
0x11c0   :  { %v1049_v41 = vor.u32 1.1754944e-38, %v1048_v50  ;;  %vm1047_vm10 = vcmp.eq.f32.partialorder %v1046_v52, 8.507059e+37 }
0x11c4   :  { %v3056_v8 = vpop.eup %3055 }
0x11c5   :  { %v1038_v48 = vmul.f32 %v3056_v8, %v1036_v37  ;;  %vm1043_vm7 = vweird.f32 %v3056_v8  ;;  %v3058_v56 = vpop.eup %3057 }
0x11c6   :  { %vm1044_vm9 = vmor %vm1042_vm8, %vm1043_vm7 }
0x11c7   :  { %v1039_v44 = vsub.f32 1.0, %v1038_v48 }
0x11c9   :  { %v1040_v51 = vmul.f32 %v3056_v8, %v1039_v44 }
0x11cb   :  { %v1041_v36 = vadd.f32 %v3056_v8, %v1040_v51 }
0x11cd   :  { %v1045_v54 = vsel %vm1044_vm9, %v3056_v8, %v1041_v36 }
0x11ce   :  { %v1050_v2 = vsel %vm1047_vm10, %v1049_v41, %v1045_v54 }
0x11cf   :  { %v1053_v55 = vmul.f32 %v3058_v56, %v1050_v2 }
0x11d1   :  { %v1054_v32 = vsub.f32 %v1053_v55, %v1004_v26 }
0x11d3   :  { %v1055_v17 = vmul.f32 %v3774_v25, %v1054_v32 }
0x11d5   :  { %1056 = vadd.xlane.f32.xlu2 %v1055_v17 }
0x1248   :  { %v1057_v59 = vpop.xlane.xlu2 %1056 }
0x1249   :  { %v1058_v6 = vmul.f32 0.015625, %v1057_v59 }
0x124b   :  { %v1059_v9 = vsub.f32 %v1055_v17, %v1058_v6 }
0x124d   :  { %v1060_v16 = vmul.f32 %v3780_v31, %v1059_v9 }
0x124f   :  { %v1061_v20 = vmul.f32 %v1060_v16, %v1060_v16 }
0x1251   :  { %1062 = vadd.xlane.f32.xlu0 %v1061_v20 }
0x12c4   :  { %v1063_v15 = vpop.xlane.xlu0 %1062 }
0x12c5   :  { %v1064_v18 = vmul.f32 0.015625, %v1063_v15 }
0x12c7   :  { %v1065_v12 = vadd.f32 1e-05, %v1064_v18 }
0x12c9   :  { %3059 = vrsqrt.f32 %v1065_v12  ;;  %vm1072_vm12 = vweird.f32 %v1065_v12 }
0x12cf   :  { %v3060_v43 = vpop.eup %3059 }
0x12d0   :  { %v1067_v57 = vmul.f32 %v3060_v43, %v1065_v12  ;;  %vm1073_vm11 = vweird.f32 %v3060_v43 }
0x12d1   :  { %vm1074_vm13 = vmor %vm1072_vm12, %vm1073_vm11 }
0x12d2   :  { %v1068_v42 = vmul.f32 %v3060_v43, %v1067_v57 }
0x12d4   :  { %v1069_v24 = vmul.f32 0.5, %v1068_v42 }
0x12d6   :  { %v1070_v23 = vsub.f32 1.5, %v1069_v24 }
0x12d8   :  { %v1071_v26 = vmul.f32 %v3060_v43, %v1070_v23 }
0x12da   :  { %v1075_v58 = vsel %vm1074_vm13, %v3060_v43, %v1071_v26 }
0x12db   :  { %v1076_v29 = vmul.f32 %v1075_v58, %v1060_v16 }
0x12dd   :  { %v1077_v30 = vmul.f32 %v3788_v1, %v1076_v29 }
0x12df   :  { %v3879_v35 = vadd.f32 %v3795_v4, %v1077_v30 }
0x12e1   :  { %v1080_v22 = vadd.f32 %v1079_v38, %v3879_v35 }
0x12e3   :  { %v1081_v37 = vadd.f32 %v1080_v22, %v3799_v7 }
0x12e5   :  { %v1082_v8 = vpack.c.bf16 %v1081_v37, %v1081_v37 }
0x12e7   :  { %1091 = vmatmul.bf16.vlgmr.msrb.gmra.mxu0 %v1082_v8  ;;  %1104 = vmatmul.bf16.vlgmr.msra.gmra.mxu1 %v1082_v8 }
0x12e8   :  { %1394 = vmatpush.bf16.msrb.mxu0 %v3330_v10  ;;  %1407 = vmatpush.bf16.msra.mxu1 %v3310_v3 }
0x12ec   :  { %1395 = vmatpush.bf16.msrb.mxu0 %v3339_v13  ;;  %1408 = vmatpush.bf16.msra.mxu1 %v3316_v5 }
0x12f0   :  { %1396 = vmatpush.bf16.msrb.mxu0 %v3358_v19  ;;  %1409 = vmatpush.bf16.msra.mxu1 %v3343_v14 }
0x12f4   :  { %1397 = vmatpush.bf16.msrb.mxu0 %v3385_v27  ;;  %1410 = vmatpush.bf16.msra.mxu1 %v3365_v21 }
0x12f8   :  { %1398 = vmatpush.bf16.msrb.mxu0 %v3405_v33  ;;  %1411 = vmatpush.bf16.msra.mxu1 %v3389_v28 }
0x12fc   :  { %1399 = vmatpush.bf16.msrb.mxu0 %v3425_v39  ;;  %1412 = vmatpush.bf16.msra.mxu1 %v3409_v34 }
0x1300   :  { %1400 = vmatpush.bf16.msrb.mxu0 %v3445_v45  ;;  %1413 = vmatpush.bf16.msra.mxu1 %v3429_v40 }
0x1304   :  { %1401 = vmatpush.bf16.msrb.mxu0 %v3459_v49  ;;  %1414 = vmatpush.bf16.msra.mxu1 %v3449_v46 }
0x1364   :  { %v1092_v47 = vpop.f32.mrf.mxu0  ;;  %v1105_v48 = vpop.f32.mrf.mxu1 }
0x1365   :  { %v2890_v44 = vmul.f32 -1.442695, %v1105_v48  ;;  %v1109_v54 = vadd.f32 %v1092_v47, %v3650_v60 }
0x1367   :  { %3061 = vpow2.f32 %v2890_v44 }
0x136c   :  { %v1094_v50 = vpop.f32.mrf.mxu0  ;;  %v1107_v51 = vpop.f32.mrf.mxu1 }
0x136d   :  { %v3062_v52 = vpop.eup %3061 }
0x136e   :  { %v1113_v36 = vadd.f32 1.0, %v3062_v52 }
0x1370   :  { %3063 = vrcp.f32 %v1113_v36  ;;  %v1125_v55 = vand.u32 2147483648, %v1113_v36  ;;  %v1123_v17 = vand.u32 2147483647, %v1113_v36  ;;  %vm1119_vm15 = vweird.f32 %v1113_v36 }
0x1371   :  { %3065 = vtanh.f32 %v1109_v54 }
0x1372   :  { %v1126_v6 = vor.u32 1.1754944e-38, %v1125_v55  ;;  %vm1124_vm2 = vcmp.eq.f32.partialorder %v1123_v17, 8.507059e+37 }
0x1376   :  { %v3064_v41 = vpop.eup %3063 }
0x1377   :  { %v1115_v56 = vmul.f32 %v3064_v41, %v1113_v36  ;;  %vm1120_vm14 = vweird.f32 %v3064_v41  ;;  %v3066_v16 = vpop.eup %3065 }
0x1378   :  { %vm1121_vm1 = vmor %vm1119_vm15, %vm1120_vm14 }
0x1379   :  { %v1116_v2 = vsub.f32 1.0, %v1115_v56 }
0x137b   :  { %v1117_v32 = vmul.f32 %v3064_v41, %v1116_v2 }
0x137d   :  { %v1118_v59 = vadd.f32 %v3064_v41, %v1117_v32 }
0x137f   :  { %v1122_v9 = vsel %vm1121_vm1, %v3064_v41, %v1118_v59 }
0x1380   :  { %v1127_v20 = vsel %vm1124_vm2, %v1126_v6, %v1122_v9 }
0x1381   :  { %v1130_v15 = vmul.f32 %v3066_v16, %v1127_v20 }
0x1383   :  { %v1131_v18 = vsub.f32 %v1130_v15, %v1081_v37  ;;  %v1156_v37 = vadd.f32 %v3879_v35, %v3853_v53 }
0x1385   :  { %v1132_v12 = vmul.f32 %v3774_v25, %v1131_v18  ;;  %v1157_v50 = vmul.f32 3.0, %v1156_v37 }
0x1387   :  { %1133 = vadd.xlane.f32.xlu1 %v1132_v12  ;;  %v1158_v36 = vadd.f32 %v1157_v50, %v3825_v11 }
0x13fa   :  { %v1134_v43 = vpop.xlane.xlu1 %1133 }
0x13fb   :  { %v1135_v57 = vmul.f32 0.015625, %v1134_v43 }
0x13fd   :  { %v1136_v42 = vsub.f32 %v1132_v12, %v1135_v57 }
0x13ff   :  { %v1137_v24 = vmul.f32 %v3780_v31, %v1136_v42 }
0x1401   :  { %v1138_v23 = vmul.f32 %v1137_v24, %v1137_v24 }
0x1403   :  { %1139 = vadd.xlane.f32.xlu2 %v1138_v23 }
0x1476   :  { %v1140_v26 = vpop.xlane.xlu2 %1139 }
0x1477   :  { %v1141_v58 = vmul.f32 0.015625, %v1140_v26 }
0x1479   :  { %v1142_v29 = vadd.f32 1e-05, %v1141_v58 }
0x147b   :  { %3067 = vrsqrt.f32 %v1142_v29  ;;  %vm1149_vm4 = vweird.f32 %v1142_v29 }
0x1481   :  { %v3068_v30 = vpop.eup %3067 }
0x1482   :  { %v1144_v38 = vmul.f32 %v3068_v30, %v1142_v29  ;;  %vm1150_vm3 = vweird.f32 %v3068_v30 }
0x1483   :  { %vm1151_vm5 = vmor %vm1149_vm4, %vm1150_vm3 }
0x1484   :  { %v1145_v22 = vmul.f32 %v3068_v30, %v1144_v38 }
0x1486   :  { %v1146_v8 = vmul.f32 0.5, %v1145_v22 }
0x1488   :  { %v1147_v47 = vsub.f32 1.5, %v1146_v8 }
0x148a   :  { %v1148_v48 = vmul.f32 %v3068_v30, %v1147_v47 }
0x148c   :  { %v1152_v44 = vsel %vm1151_vm5, %v3068_v30, %v1148_v48 }
0x148d   :  { %v1153_v51 = vmul.f32 %v1152_v44, %v1137_v24 }
0x148f   :  { %v1154_v52 = vmul.f32 %v3788_v1, %v1153_v51 }
0x1491   :  { %v1155_v41 = vadd.f32 %v3795_v4, %v1154_v52 }
0x1493   :  { %v1159_v54 = vadd.f32 %v1158_v36, %v1155_v41 }
0x1495   :  { %v1160_v56 = vmul.f32 0.125, %v1159_v54 }
0x1497   :  { %v3910_v2 = vadd.f32 %v1160_v56, %v3799_v7 }
0x1499   :  { %v1164_v53 = vpack.c.bf16 %v3910_v2, %v3910_v2 }
0x149b   :  { %1173 = vmatmul.bf16.vlgmr.msra.gmra.mxu2 %v1164_v53  ;;  %1186 = vmatmul.bf16.vlgmr.msra.gmra.mxu3 %v1164_v53 }
0x149c   :  { %1476 = vmatpush.bf16.msra.mxu2 %v3330_v10  ;;  %1489 = vmatpush.bf16.msra.mxu3 %v3310_v3 }
0x14a0   :  { %1477 = vmatpush.bf16.msra.mxu2 %v3339_v13  ;;  %1490 = vmatpush.bf16.msra.mxu3 %v3316_v5 }
0x14a4   :  { %1478 = vmatpush.bf16.msra.mxu2 %v3358_v19  ;;  %1491 = vmatpush.bf16.msra.mxu3 %v3343_v14 }
0x14a8   :  { %1479 = vmatpush.bf16.msra.mxu2 %v3385_v27  ;;  %1492 = vmatpush.bf16.msra.mxu3 %v3365_v21 }
0x14ac   :  { %1480 = vmatpush.bf16.msra.mxu2 %v3405_v33  ;;  %1493 = vmatpush.bf16.msra.mxu3 %v3389_v28 }
0x14b0   :  { %1481 = vmatpush.bf16.msra.mxu2 %v3425_v39  ;;  %1494 = vmatpush.bf16.msra.mxu3 %v3409_v34 }
0x14b4   :  { %1482 = vmatpush.bf16.msra.mxu2 %v3445_v45  ;;  %1495 = vmatpush.bf16.msra.mxu3 %v3429_v40 }
0x14b8   :  { %1483 = vmatpush.bf16.msra.mxu2 %v3459_v49  ;;  %1496 = vmatpush.bf16.msra.mxu3 %v3449_v46 }
0x151e   :  { %v1174_v7 = vpop.f32.mrf.mxu2  ;;  %v1187_v11 = vpop.f32.mrf.mxu3 }
0x151f   :  { %v2891_v35 = vmul.f32 -1.442695, %v1187_v11  ;;  %v1191_v9 = vadd.f32 %v1174_v7, %v3650_v60 }
0x1521   :  { %3069 = vpow2.f32 %v2891_v35 }
0x1526   :  { %v1176_v55 = vpop.f32.mrf.mxu2  ;;  %v1189_v32 = vpop.f32.mrf.mxu3 }
0x1527   :  { %v3070_v17 = vpop.eup %3069 }
0x1528   :  { %v1195_v59 = vadd.f32 1.0, %v3070_v17 }
0x152a   :  { %3071 = vrcp.f32 %v1195_v59  ;;  %v1207_v15 = vand.u32 2147483648, %v1195_v59  ;;  %v1205_v12 = vand.u32 2147483647, %v1195_v59  ;;  %vm1201_vm0 = vweird.f32 %v1195_v59 }
0x152b   :  { %3073 = vtanh.f32 %v1191_v9 }
0x152c   :  { %v1208_v57 = vor.u32 1.1754944e-38, %v1207_v15  ;;  %vm1206_vm8 = vcmp.eq.f32.partialorder %v1205_v12, 8.507059e+37 }
0x1530   :  { %v3072_v6 = vpop.eup %3071 }
0x1531   :  { %v1197_v16 = vmul.f32 %v3072_v6, %v1195_v59  ;;  %vm1202_vm6 = vweird.f32 %v3072_v6  ;;  %v3074_v24 = vpop.eup %3073 }
0x1532   :  { %vm1203_vm7 = vmor %vm1201_vm0, %vm1202_vm6 }
0x1533   :  { %v1198_v20 = vsub.f32 1.0, %v1197_v16 }
0x1535   :  { %v1199_v18 = vmul.f32 %v3072_v6, %v1198_v20 }
0x1537   :  { %v1200_v43 = vadd.f32 %v3072_v6, %v1199_v18 }
0x1539   :  { %v1204_v42 = vsel %vm1203_vm7, %v3072_v6, %v1200_v43 }
0x153a   :  { %v1209_v23 = vsel %vm1206_vm8, %v1208_v57, %v1204_v42 }
0x153b   :  { %v1212_v26 = vmul.f32 %v3074_v24, %v1209_v23 }
0x153d   :  { %v1213_v58 = vsub.f32 %v1212_v26, %v3910_v2 }
0x153f   :  { %v1214_v29 = vmul.f32 %v3774_v25, %v1213_v58 }
0x1541   :  { %1215 = vadd.xlane.f32.xlu0 %v1214_v29 }
0x15b4   :  { %v1216_v30 = vpop.xlane.xlu0 %1215 }
0x15b5   :  { %v1217_v38 = vmul.f32 0.015625, %v1216_v30 }
0x15b7   :  { %v1218_v22 = vsub.f32 %v1214_v29, %v1217_v38 }
0x15b9   :  { %v1219_v8 = vmul.f32 %v3780_v31, %v1218_v22 }
0x15bb   :  { %v1220_v47 = vmul.f32 %v1219_v8, %v1219_v8 }
0x15bd   :  { %1221 = vadd.xlane.f32.xlu1 %v1220_v47 }
0x1630   :  { %v1222_v37 = vpop.xlane.xlu1 %1221 }
0x1631   :  { %v1223_v48 = vmul.f32 0.015625, %v1222_v37 }
0x1633   :  { %v1224_v44 = vadd.f32 1e-05, %v1223_v48 }
0x1635   :  { %3075 = vrsqrt.f32 %v1224_v44  ;;  %vm1231_vm10 = vweird.f32 %v1224_v44 }
0x163b   :  { %v3076_v50 = vpop.eup %3075 }
0x163c   :  { %v1226_v51 = vmul.f32 %v3076_v50, %v1224_v44  ;;  %vm1232_vm9 = vweird.f32 %v3076_v50 }
0x163d   :  { %vm1233_vm11 = vmor %vm1231_vm10, %vm1232_vm9 }
0x163e   :  { %v1227_v52 = vmul.f32 %v3076_v50, %v1226_v51 }
0x1640   :  { %v1228_v36 = vmul.f32 0.5, %v1227_v52 }
0x1642   :  { %v1229_v41 = vsub.f32 1.5, %v1228_v36 }
0x1644   :  { %v1230_v54 = vmul.f32 %v3076_v50, %v1229_v41 }
0x1646   :  { %v1234_v56 = vsel %vm1233_vm11, %v3076_v50, %v1230_v54 }
0x1647   :  { %v1235_v53 = vmul.f32 %v1234_v56, %v1219_v8 }
0x1649   :  { %v1236_v7 = vmul.f32 %v3788_v1, %v1235_v53 }
0x164b   :  { %v3936_v11 = vadd.f32 %v3795_v4, %v1236_v7 }
0x164d   :  { %v3939_v35 = vmul.f32 0.33333334, %v3936_v11 }
0x164f   :  { %v1239_v55 = vadd.f32 %v3939_v35, %v3910_v2 }
0x1651   :  { %v1240_v32 = vpack.c.bf16 %v1239_v55, %v1239_v55 }
0x1653   :  { %1249 = vmatmul.bf16.vlgmr.msra.gmra.mxu0 %v1240_v32  ;;  %1262 = vmatmul.bf16.vlgmr.msrb.gmra.mxu1 %v1240_v32 }
0x1654   :  { %1552 = vmatpush.bf16.msra.mxu0 %v3330_v10  ;;  %1565 = vmatpush.bf16.msrb.mxu1 %v3310_v3 }
0x1658   :  { %1553 = vmatpush.bf16.msra.mxu0 %v3339_v13  ;;  %1566 = vmatpush.bf16.msrb.mxu1 %v3316_v5 }
0x165c   :  { %1554 = vmatpush.bf16.msra.mxu0 %v3358_v19  ;;  %1567 = vmatpush.bf16.msrb.mxu1 %v3343_v14 }
0x1660   :  { %1555 = vmatpush.bf16.msra.mxu0 %v3385_v27  ;;  %1568 = vmatpush.bf16.msrb.mxu1 %v3365_v21 }
0x1664   :  { %1556 = vmatpush.bf16.msra.mxu0 %v3405_v33  ;;  %1569 = vmatpush.bf16.msrb.mxu1 %v3389_v28 }
0x1668   :  { %1557 = vmatpush.bf16.msra.mxu0 %v3425_v39  ;;  %1570 = vmatpush.bf16.msrb.mxu1 %v3409_v34 }
0x166c   :  { %1558 = vmatpush.bf16.msra.mxu0 %v3445_v45  ;;  %1571 = vmatpush.bf16.msrb.mxu1 %v3429_v40 }
0x1670   :  { %1559 = vmatpush.bf16.msra.mxu0 %v3459_v49  ;;  %1572 = vmatpush.bf16.msrb.mxu1 %v3449_v46 }
0x16d0   :  { %v1250_v17 = vpop.f32.mrf.mxu0  ;;  %v1263_v59 = vpop.f32.mrf.mxu1 }
0x16d1   :  { %v2892_v6 = vmul.f32 -1.442695, %v1263_v59  ;;  %v1267_v12 = vadd.f32 %v1250_v17, %v3650_v60 }
0x16d3   :  { %3077 = vpow2.f32 %v2892_v6 }
0x16d8   :  { %v1252_v9 = vpop.f32.mrf.mxu0  ;;  %v1265_v16 = vpop.f32.mrf.mxu1 }
0x16d9   :  { %v3078_v20 = vpop.eup %3077 }
0x16da   :  { %v1271_v15 = vadd.f32 1.0, %v3078_v20 }
0x16dc   :  { %3079 = vrcp.f32 %v1271_v15  ;;  %v1283_v42 = vand.u32 2147483648, %v1271_v15  ;;  %v1281_v23 = vand.u32 2147483647, %v1271_v15  ;;  %vm1277_vm13 = vweird.f32 %v1271_v15 }
0x16dd   :  { %3081 = vtanh.f32 %v1267_v12 }
0x16de   :  { %v1284_v58 = vor.u32 1.1754944e-38, %v1283_v42  ;;  %vm1282_vm15 = vcmp.eq.f32.partialorder %v1281_v23, 8.507059e+37 }
0x16e2   :  { %v3080_v18 = vpop.eup %3079 }
0x16e3   :  { %v1273_v43 = vmul.f32 %v3080_v18, %v1271_v15  ;;  %vm1278_vm12 = vweird.f32 %v3080_v18  ;;  %v3082_v30 = vpop.eup %3081 }
0x16e4   :  { %vm1279_vm14 = vmor %vm1277_vm13, %vm1278_vm12 }
0x16e5   :  { %v1274_v57 = vsub.f32 1.0, %v1273_v43 }
0x16e7   :  { %v1275_v24 = vmul.f32 %v3080_v18, %v1274_v57 }
0x16e9   :  { %v1276_v26 = vadd.f32 %v3080_v18, %v1275_v24 }
0x16eb   :  { %v1280_v29 = vsel %vm1279_vm14, %v3080_v18, %v1276_v26 }
0x16ec   :  { %v1285_v38 = vsel %vm1282_vm15, %v1284_v58, %v1280_v29 }
0x16ed   :  { %v1288_v22 = vmul.f32 %v3082_v30, %v1285_v38 }
0x16ef   :  { %v1289_v8 = vsub.f32 %v1288_v22, %v1239_v55 }
0x16f1   :  { %v1290_v47 = vmul.f32 %v3774_v25, %v1289_v8 }
0x16f3   :  { %1291 = vadd.xlane.f32.xlu2 %v1290_v47 }
0x1766   :  { %v1292_v37 = vpop.xlane.xlu2 %1291 }
0x1767   :  { %v1293_v48 = vmul.f32 0.015625, %v1292_v37 }
0x1769   :  { %v1294_v44 = vsub.f32 %v1290_v47, %v1293_v48 }
0x176b   :  { %v1295_v50 = vmul.f32 %v3780_v31, %v1294_v44 }
0x176d   :  { %v1296_v51 = vmul.f32 %v1295_v50, %v1295_v50 }
0x176f   :  { %1297 = vadd.xlane.f32.xlu0 %v1296_v51 }
0x17e2   :  { %v1298_v52 = vpop.xlane.xlu0 %1297 }
0x17e3   :  { %v1299_v36 = vmul.f32 0.015625, %v1298_v52  ;;  %v3995_v52 = vld [vmem:[%s4494_s6] ss:$0 sm:$0xff] }
0x17e5   :  { %v1300_v41 = vadd.f32 1e-05, %v1299_v36 }
0x17e7   :  { %3083 = vrsqrt.f32 %v1300_v41  ;;  %vm1307_vm2 = vweird.f32 %v1300_v41 }
0x17ed   :  { %v3084_v54 = vpop.eup %3083 }
0x17ee   :  { %v1302_v56 = vmul.f32 %v3084_v54, %v1300_v41  ;;  %vm1308_vm1 = vweird.f32 %v3084_v54 }
0x17ef   :  { %vm1309_vm3 = vmor %vm1307_vm2, %vm1308_vm1 }
0x17f0   :  { %v1303_v53 = vmul.f32 %v3084_v54, %v1302_v56 }
0x17f2   :  { %v1304_v7 = vmul.f32 0.5, %v1303_v53 }
0x17f4   :  { %v1305_v32 = vsub.f32 1.5, %v1304_v7 }
0x17f6   :  { %v1306_v55 = vmul.f32 %v3084_v54, %v1305_v32 }
0x17f8   :  { %v1310_v25 = vsel %vm1309_vm3, %v3084_v54, %v1306_v55 }
0x17f9   :  { %v1311_v17 = vmul.f32 %v1310_v25, %v1295_v50 }
0x17fb   :  { %v1312_v59 = vmul.f32 %v3788_v1, %v1311_v17 }
0x17fd   :  { %v3964_v31 = vadd.f32 %v3795_v4, %v1312_v59 }
0x17ff   :  { %v1314_v6 = vsub.f32 %v3964_v31, %v3939_v35 }
0x1801   :  { %v1315_v9 = vadd.f32 %v1314_v6, %v3910_v2 }
0x1803   :  { %v1316_v16 = vpack.c.bf16 %v1315_v9, %v1315_v9 }
0x1805   :  { %1325 = vmatmul.bf16.vlgmr.msrb.gmra.mxu2 %v1316_v16  ;;  %1338 = vmatmul.bf16.vlgmr.msrb.gmra.mxu3 %v1316_v16  ;;  %v4001_v16 = vld [vmem:[%s4495_s4] ss:$0 sm:$0xff] }
0x1806   :  { %1628 = vmatpush.bf16.msrb.mxu2 %v3330_v10  ;;  %1641 = vmatpush.bf16.msrb.mxu3 %v3310_v3 }
0x180a   :  { %1629 = vmatpush.bf16.msrb.mxu2 %v3339_v13  ;;  %1642 = vmatpush.bf16.msrb.mxu3 %v3316_v5 }
0x180e   :  { %1630 = vmatpush.bf16.msrb.mxu2 %v3358_v19  ;;  %1643 = vmatpush.bf16.msrb.mxu3 %v3343_v14 }
0x1812   :  { %1631 = vmatpush.bf16.msrb.mxu2 %v3385_v27  ;;  %1644 = vmatpush.bf16.msrb.mxu3 %v3365_v21 }
0x1816   :  { %1632 = vmatpush.bf16.msrb.mxu2 %v3405_v33  ;;  %1645 = vmatpush.bf16.msrb.mxu3 %v3389_v28 }
0x181a   :  { %1633 = vmatpush.bf16.msrb.mxu2 %v3425_v39  ;;  %1646 = vmatpush.bf16.msrb.mxu3 %v3409_v34 }
0x181e   :  { %1634 = vmatpush.bf16.msrb.mxu2 %v3445_v45  ;;  %1647 = vmatpush.bf16.msrb.mxu3 %v3429_v40 }
0x1822   :  { %1635 = vmatpush.bf16.msrb.mxu2 %v3459_v49  ;;  %1648 = vmatpush.bf16.msrb.mxu3 %v3449_v46 }
0x1888   :  { %v1326_v1 = vpop.f32.mrf.mxu2  ;;  %v1339_v4 = vpop.f32.mrf.mxu3 }
0x1889   :  { %v2893_v35 = vmul.f32 -1.442695, %v1339_v4  ;;  %v1343_v57 = vadd.f32 %v1326_v1, %v3650_v60  ;;  %v3989_v60 = vld [vmem:[%s4493_s3] ss:$0 sm:$0xff] }
0x188a   :  { %v4007_v4 = vld [vmem:[%s4496_s5] ss:$0 sm:$0xff] }
0x188b   :  { %3085 = vpow2.f32 %v2893_v35 }
0x1890   :  { %v1328_v20 = vpop.f32.mrf.mxu2  ;;  %v1341_v15 = vpop.f32.mrf.mxu3 }
0x1891   :  { %v3086_v18 = vpop.eup %3085  ;;  %v1390_v20 = vsub.f32 %v3936_v11, %v3964_v31 }
0x1892   :  { %v1347_v12 = vadd.f32 1.0, %v3086_v18 }
0x1894   :  { %3087 = vrcp.f32 %v1347_v12  ;;  %v1359_v23 = vand.u32 2147483648, %v1347_v12  ;;  %v1357_v58 = vand.u32 2147483647, %v1347_v12  ;;  %vm1353_vm5 = vweird.f32 %v1347_v12 }
0x1895   :  { %3089 = vtanh.f32 %v1343_v57 }
0x1896   :  { %v1360_v30 = vor.u32 1.1754944e-38, %v1359_v23  ;;  %vm1358_vm0 = vcmp.eq.f32.partialorder %v1357_v58, 8.507059e+37 }
0x189a   :  { %v3088_v43 = vpop.eup %3087 }
0x189b   :  { %v1349_v42 = vmul.f32 %v3088_v43, %v1347_v12  ;;  %vm1354_vm4 = vweird.f32 %v3088_v43  ;;  %v3090_v22 = vpop.eup %3089 }
0x189c   :  { %vm1355_vm6 = vmor %vm1353_vm5, %vm1354_vm4 }
0x189d   :  { %v1350_v24 = vsub.f32 1.0, %v1349_v42 }
0x189f   :  { %v1351_v26 = vmul.f32 %v3088_v43, %v1350_v24 }
0x18a1   :  { %v1352_v29 = vadd.f32 %v3088_v43, %v1351_v26 }
0x18a3   :  { %v1356_v38 = vsel %vm1355_vm6, %v3088_v43, %v1352_v29 }
0x18a4   :  { %v1361_v8 = vsel %vm1358_vm0, %v1360_v30, %v1356_v38 }
0x18a5   :  { %v1364_v47 = vmul.f32 %v3090_v22, %v1361_v8 }
0x18a7   :  { %v1365_v37 = vsub.f32 %v1364_v47, %v1315_v9 }
0x18a9   :  { %v1366_v48 = vmul.f32 %v3989_v60, %v1365_v37 }
0x18ab   :  { %1367 = vadd.xlane.f32.xlu1 %v1366_v48 }
0x191e   :  { %v1368_v44 = vpop.xlane.xlu1 %1367 }
0x191f   :  { %v1369_v50 = vmul.f32 0.015625, %v1368_v44 }
0x1921   :  { %v1370_v51 = vsub.f32 %v1366_v48, %v1369_v50 }
0x1923   :  { %v1371_v36 = vmul.f32 %v3995_v52, %v1370_v51 }
0x1925   :  { %v1372_v41 = vmul.f32 %v1371_v36, %v1371_v36 }
0x1927   :  { %1373 = vadd.xlane.f32.xlu2 %v1372_v41 }
0x199a   :  { %v1374_v54 = vpop.xlane.xlu2 %1373 }
0x199b   :  { %v1375_v56 = vmul.f32 0.015625, %v1374_v54 }
0x199d   :  { %v1376_v53 = vadd.f32 1e-05, %v1375_v56 }
0x199f   :  { %3091 = vrsqrt.f32 %v1376_v53  ;;  %vm1383_vm8 = vweird.f32 %v1376_v53 }
0x19a5   :  { %v3092_v7 = vpop.eup %3091 }
0x19a6   :  { %v1378_v32 = vmul.f32 %v3092_v7, %v1376_v53  ;;  %vm1384_vm7 = vweird.f32 %v3092_v7 }
0x19a7   :  { %vm1385_vm9 = vmor %vm1383_vm8, %vm1384_vm7 }
0x19a8   :  { %v1379_v55 = vmul.f32 %v3092_v7, %v1378_v32 }
0x19aa   :  { %v1380_v25 = vmul.f32 0.5, %v1379_v55 }
0x19ac   :  { %v1381_v17 = vsub.f32 1.5, %v1380_v25 }
0x19ae   :  { %v1382_v59 = vmul.f32 %v3092_v7, %v1381_v17 }
0x19b0   :  { %v1386_v6 = vsel %vm1385_vm9, %v3092_v7, %v1382_v59 }
0x19b1   :  { %v1387_v9 = vmul.f32 %v1386_v6, %v1371_v36 }
0x19b3   :  { %v1388_v1 = vmul.f32 %v4001_v16, %v1387_v9 }
0x19b5   :  { %v4010_v35 = vadd.f32 %v4007_v4, %v1388_v1 }
0x19b7   :  { %v1391_v15 = vadd.f32 %v1390_v20, %v4010_v35 }
0x19b9   :  { %v1392_v18 = vadd.f32 %v1391_v15, %v3910_v2 }
0x19bb   :  { %v1393_v12 = vpack.c.bf16 %v1392_v18, %v1392_v18 }
0x19bd   :  { %1402 = vmatmul.bf16.vlgmr.msrb.gmra.mxu0 %v1393_v12  ;;  %1415 = vmatmul.bf16.vlgmr.msra.gmra.mxu1 %v1393_v12 }
0x19be   :  { %1705 = vmatpush.bf16.msrb.mxu0 %v3330_v10  ;;  %1718 = vmatpush.bf16.msra.mxu1 %v3310_v3 }
0x19c2   :  { %1706 = vmatpush.bf16.msrb.mxu0 %v3339_v13  ;;  %1719 = vmatpush.bf16.msra.mxu1 %v3316_v5 }
0x19c6   :  { %1707 = vmatpush.bf16.msrb.mxu0 %v3358_v19  ;;  %1720 = vmatpush.bf16.msra.mxu1 %v3343_v14 }
0x19ca   :  { %1708 = vmatpush.bf16.msrb.mxu0 %v3385_v27  ;;  %1721 = vmatpush.bf16.msra.mxu1 %v3365_v21 }
0x19ce   :  { %1709 = vmatpush.bf16.msrb.mxu0 %v3405_v33  ;;  %1722 = vmatpush.bf16.msra.mxu1 %v3389_v28 }
0x19d2   :  { %1710 = vmatpush.bf16.msrb.mxu0 %v3425_v39  ;;  %1723 = vmatpush.bf16.msra.mxu1 %v3409_v34 }
0x19d6   :  { %1711 = vmatpush.bf16.msrb.mxu0 %v3445_v45  ;;  %1724 = vmatpush.bf16.msra.mxu1 %v3429_v40 }
0x19da   :  { %1712 = vmatpush.bf16.msrb.mxu0 %v3459_v49  ;;  %1725 = vmatpush.bf16.msra.mxu1 %v3449_v46 }
0x1a3a   :  { %v1403_v43 = vpop.f32.mrf.mxu0  ;;  %v1416_v57 = vpop.f32.mrf.mxu1 }
0x1a3b   :  { %v2894_v42 = vmul.f32 -1.442695, %v1416_v57  ;;  %v1420_v30 = vadd.f32 %v1403_v43, %v3652_v61 }
0x1a3d   :  { %3093 = vpow2.f32 %v2894_v42 }
0x1a42   :  { %v1405_v24 = vpop.f32.mrf.mxu0  ;;  %v1418_v23 = vpop.f32.mrf.mxu1 }
0x1a43   :  { %v3094_v26 = vpop.eup %3093 }
0x1a44   :  { %v1424_v58 = vadd.f32 1.0, %v3094_v26 }
0x1a46   :  { %3095 = vrcp.f32 %v1424_v58  ;;  %v1436_v8 = vand.u32 2147483648, %v1424_v58  ;;  %v1434_v37 = vand.u32 2147483647, %v1424_v58  ;;  %vm1430_vm11 = vweird.f32 %v1424_v58 }
0x1a47   :  { %3097 = vtanh.f32 %v1420_v30 }
0x1a48   :  { %v1437_v44 = vor.u32 1.1754944e-38, %v1436_v8  ;;  %vm1435_vm13 = vcmp.eq.f32.partialorder %v1434_v37, 8.507059e+37 }
0x1a4c   :  { %v3096_v29 = vpop.eup %3095 }
0x1a4d   :  { %v1426_v38 = vmul.f32 %v3096_v29, %v1424_v58  ;;  %vm1431_vm10 = vweird.f32 %v3096_v29  ;;  %v3098_v51 = vpop.eup %3097 }
0x1a4e   :  { %vm1432_vm12 = vmor %vm1430_vm11, %vm1431_vm10 }
0x1a4f   :  { %v1427_v22 = vsub.f32 1.0, %v1426_v38 }
0x1a51   :  { %v1428_v47 = vmul.f32 %v3096_v29, %v1427_v22 }
0x1a53   :  { %v1429_v48 = vadd.f32 %v3096_v29, %v1428_v47 }
0x1a55   :  { %v1433_v50 = vsel %vm1432_vm12, %v3096_v29, %v1429_v48 }
0x1a56   :  { %v1438_v36 = vsel %vm1435_vm13, %v1437_v44, %v1433_v50 }
0x1a57   :  { %v1441_v41 = vmul.f32 %v3098_v51, %v1438_v36 }
0x1a59   :  { %v1442_v54 = vsub.f32 %v1441_v41, %v1392_v18  ;;  %v1467_v18 = vadd.f32 %v4010_v35, %v3964_v31 }
0x1a5b   :  { %v1443_v56 = vmul.f32 %v3989_v60, %v1442_v54  ;;  %v1468_v42 = vmul.f32 3.0, %v1467_v18 }
0x1a5d   :  { %1444 = vadd.xlane.f32.xlu0 %v1443_v56  ;;  %v1469_v26 = vadd.f32 %v1468_v42, %v3936_v11 }
0x1ad0   :  { %v1445_v53 = vpop.xlane.xlu0 %1444 }
0x1ad1   :  { %v1446_v7 = vmul.f32 0.015625, %v1445_v53 }
0x1ad3   :  { %v1447_v32 = vsub.f32 %v1443_v56, %v1446_v7 }
0x1ad5   :  { %v1448_v55 = vmul.f32 %v3995_v52, %v1447_v32 }
0x1ad7   :  { %v1449_v25 = vmul.f32 %v1448_v55, %v1448_v55 }
0x1ad9   :  { %1450 = vadd.xlane.f32.xlu1 %v1449_v25 }
0x1b4c   :  { %v1451_v17 = vpop.xlane.xlu1 %1450 }
0x1b4d   :  { %v1452_v59 = vmul.f32 0.015625, %v1451_v17 }
0x1b4f   :  { %v1453_v6 = vadd.f32 1e-05, %v1452_v59 }
0x1b51   :  { %3099 = vrsqrt.f32 %v1453_v6  ;;  %vm1460_vm15 = vweird.f32 %v1453_v6 }
0x1b57   :  { %v3100_v9 = vpop.eup %3099 }
0x1b58   :  { %v1455_v1 = vmul.f32 %v3100_v9, %v1453_v6  ;;  %vm1461_vm14 = vweird.f32 %v3100_v9 }
0x1b59   :  { %vm1462_vm1 = vmor %vm1460_vm15, %vm1461_vm14 }
0x1b5a   :  { %v1456_v20 = vmul.f32 %v3100_v9, %v1455_v1 }
0x1b5c   :  { %v1457_v15 = vmul.f32 0.5, %v1456_v20 }
0x1b5e   :  { %v1458_v12 = vsub.f32 1.5, %v1457_v15 }
0x1b60   :  { %v1459_v43 = vmul.f32 %v3100_v9, %v1458_v12 }
0x1b62   :  { %v1463_v57 = vsel %vm1462_vm1, %v3100_v9, %v1459_v43 }
0x1b63   :  { %v1464_v24 = vmul.f32 %v1463_v57, %v1448_v55 }
0x1b65   :  { %v1465_v23 = vmul.f32 %v4001_v16, %v1464_v24 }
0x1b67   :  { %v1466_v58 = vadd.f32 %v4007_v4, %v1465_v23 }
0x1b69   :  { %v1470_v29 = vadd.f32 %v1469_v26, %v1466_v58 }
0x1b6b   :  { %v1471_v30 = vmul.f32 0.125, %v1470_v29 }
0x1b6d   :  { %v4041_v38 = vadd.f32 %v1471_v30, %v3910_v2 }
0x1b6f   :  { %v1475_v31 = vpack.c.bf16 %v4041_v38, %v4041_v38 }
0x1b71   :  { %1484 = vmatmul.bf16.vlgmr.msra.gmra.mxu2 %v1475_v31  ;;  %1497 = vmatmul.bf16.vlgmr.msra.gmra.mxu3 %v1475_v31 }
0x1b72   :  { %1787 = vmatpush.bf16.msra.mxu2 %v3330_v10  ;;  %1800 = vmatpush.bf16.msra.mxu3 %v3310_v3 }
0x1b76   :  { %1788 = vmatpush.bf16.msra.mxu2 %v3339_v13  ;;  %1801 = vmatpush.bf16.msra.mxu3 %v3316_v5 }
0x1b7a   :  { %1789 = vmatpush.bf16.msra.mxu2 %v3358_v19  ;;  %1802 = vmatpush.bf16.msra.mxu3 %v3343_v14 }
0x1b7e   :  { %1790 = vmatpush.bf16.msra.mxu2 %v3385_v27  ;;  %1803 = vmatpush.bf16.msra.mxu3 %v3365_v21 }
0x1b82   :  { %1791 = vmatpush.bf16.msra.mxu2 %v3405_v33  ;;  %1804 = vmatpush.bf16.msra.mxu3 %v3389_v28 }
0x1b86   :  { %1792 = vmatpush.bf16.msra.mxu2 %v3425_v39  ;;  %1805 = vmatpush.bf16.msra.mxu3 %v3409_v34 }
0x1b8a   :  { %1793 = vmatpush.bf16.msra.mxu2 %v3445_v45  ;;  %1806 = vmatpush.bf16.msra.mxu3 %v3429_v40 }
0x1b8e   :  { %1794 = vmatpush.bf16.msra.mxu2 %v3459_v49  ;;  %1807 = vmatpush.bf16.msra.mxu3 %v3449_v46 }
0x1bf4   :  { %v1485_v2 = vpop.f32.mrf.mxu2  ;;  %v1498_v11 = vpop.f32.mrf.mxu3 }
0x1bf5   :  { %v2895_v35 = vmul.f32 -1.442695, %v1498_v11  ;;  %v1502_v44 = vadd.f32 %v1485_v2, %v3652_v61 }
0x1bf7   :  { %3101 = vpow2.f32 %v2895_v35 }
0x1bfc   :  { %v1487_v22 = vpop.f32.mrf.mxu2  ;;  %v1500_v8 = vpop.f32.mrf.mxu3 }
0x1bfd   :  { %v3102_v47 = vpop.eup %3101 }
0x1bfe   :  { %v1506_v37 = vadd.f32 1.0, %v3102_v47 }
0x1c00   :  { %3103 = vrcp.f32 %v1506_v37  ;;  %v1518_v36 = vand.u32 2147483648, %v1506_v37  ;;  %v1516_v54 = vand.u32 2147483647, %v1506_v37  ;;  %vm1512_vm3 = vweird.f32 %v1506_v37 }
0x1c01   :  { %3105 = vtanh.f32 %v1502_v44 }
0x1c02   :  { %v1519_v53 = vor.u32 1.1754944e-38, %v1518_v36  ;;  %vm1517_vm5 = vcmp.eq.f32.partialorder %v1516_v54, 8.507059e+37 }
0x1c06   :  { %v3104_v48 = vpop.eup %3103 }
0x1c07   :  { %v1508_v50 = vmul.f32 %v3104_v48, %v1506_v37  ;;  %vm1513_vm2 = vweird.f32 %v3104_v48  ;;  %v3106_v32 = vpop.eup %3105 }
0x1c08   :  { %vm1514_vm4 = vmor %vm1512_vm3, %vm1513_vm2 }
0x1c09   :  { %v1509_v51 = vsub.f32 1.0, %v1508_v50 }
0x1c0b   :  { %v1510_v41 = vmul.f32 %v3104_v48, %v1509_v51 }
0x1c0d   :  { %v1511_v56 = vadd.f32 %v3104_v48, %v1510_v41 }
0x1c0f   :  { %v1515_v7 = vsel %vm1514_vm4, %v3104_v48, %v1511_v56 }
0x1c10   :  { %v1520_v55 = vsel %vm1517_vm5, %v1519_v53, %v1515_v7 }
0x1c11   :  { %v1523_v25 = vmul.f32 %v3106_v32, %v1520_v55 }
0x1c13   :  { %v1524_v17 = vsub.f32 %v1523_v25, %v4041_v38 }
0x1c15   :  { %v1525_v59 = vmul.f32 %v3989_v60, %v1524_v17 }
0x1c17   :  { %1526 = vadd.xlane.f32.xlu2 %v1525_v59 }
0x1c8a   :  { %v1527_v6 = vpop.xlane.xlu2 %1526 }
0x1c8b   :  { %v1528_v9 = vmul.f32 0.015625, %v1527_v6 }
0x1c8d   :  { %v1529_v1 = vsub.f32 %v1525_v59, %v1528_v9 }
0x1c8f   :  { %v1530_v20 = vmul.f32 %v3995_v52, %v1529_v1 }
0x1c91   :  { %v1531_v15 = vmul.f32 %v1530_v20, %v1530_v20 }
0x1c93   :  { %1532 = vadd.xlane.f32.xlu0 %v1531_v15 }
0x1d06   :  { %v1533_v12 = vpop.xlane.xlu0 %1532 }
0x1d07   :  { %v1534_v18 = vmul.f32 0.015625, %v1533_v12 }
0x1d09   :  { %v1535_v43 = vadd.f32 1e-05, %v1534_v18 }
0x1d0b   :  { %3107 = vrsqrt.f32 %v1535_v43  ;;  %vm1542_vm0 = vweird.f32 %v1535_v43 }
0x1d11   :  { %v3108_v57 = vpop.eup %3107 }
0x1d12   :  { %v1537_v42 = vmul.f32 %v3108_v57, %v1535_v43  ;;  %vm1543_vm6 = vweird.f32 %v3108_v57 }
0x1d13   :  { %vm1544_vm7 = vmor %vm1542_vm0, %vm1543_vm6 }
0x1d14   :  { %v1538_v24 = vmul.f32 %v3108_v57, %v1537_v42 }
0x1d16   :  { %v1539_v23 = vmul.f32 0.5, %v1538_v24 }
0x1d18   :  { %v1540_v26 = vsub.f32 1.5, %v1539_v23 }
0x1d1a   :  { %v1541_v58 = vmul.f32 %v3108_v57, %v1540_v26 }
0x1d1c   :  { %v1545_v29 = vsel %vm1544_vm7, %v3108_v57, %v1541_v58 }
0x1d1d   :  { %v1546_v30 = vmul.f32 %v1545_v29, %v1530_v20 }
0x1d1f   :  { %v1547_v31 = vmul.f32 %v4001_v16, %v1546_v30 }
0x1d21   :  { %v4067_v2 = vadd.f32 %v4007_v4, %v1547_v31 }
0x1d23   :  { %v4070_v11 = vmul.f32 0.33333334, %v4067_v2 }
0x1d25   :  { %v1550_v35 = vadd.f32 %v4070_v11, %v4041_v38 }
0x1d27   :  { %v1551_v22 = vpack.c.bf16 %v1550_v35, %v1550_v35 }
0x1d29   :  { %1560 = vmatmul.bf16.vlgmr.msra.gmra.mxu0 %v1551_v22  ;;  %1573 = vmatmul.bf16.vlgmr.msrb.gmra.mxu1 %v1551_v22 }
0x1d2a   :  { %1863 = vmatpush.bf16.msra.mxu0 %v3330_v10  ;;  %1876 = vmatpush.bf16.msrb.mxu1 %v3310_v3 }
0x1d2e   :  { %1864 = vmatpush.bf16.msra.mxu0 %v3339_v13  ;;  %1877 = vmatpush.bf16.msrb.mxu1 %v3316_v5 }
0x1d32   :  { %1865 = vmatpush.bf16.msra.mxu0 %v3358_v19  ;;  %1878 = vmatpush.bf16.msrb.mxu1 %v3343_v14 }
0x1d36   :  { %1866 = vmatpush.bf16.msra.mxu0 %v3385_v27  ;;  %1879 = vmatpush.bf16.msrb.mxu1 %v3365_v21 }
0x1d3a   :  { %1867 = vmatpush.bf16.msra.mxu0 %v3405_v33  ;;  %1880 = vmatpush.bf16.msrb.mxu1 %v3389_v28 }
0x1d3e   :  { %1868 = vmatpush.bf16.msra.mxu0 %v3425_v39  ;;  %1881 = vmatpush.bf16.msrb.mxu1 %v3409_v34 }
0x1d42   :  { %1869 = vmatpush.bf16.msra.mxu0 %v3445_v45  ;;  %1882 = vmatpush.bf16.msrb.mxu1 %v3429_v40 }
0x1d46   :  { %1870 = vmatpush.bf16.msra.mxu0 %v3459_v49  ;;  %1883 = vmatpush.bf16.msrb.mxu1 %v3449_v46 }
0x1da6   :  { %v1561_v8 = vpop.f32.mrf.mxu0  ;;  %v1574_v47 = vpop.f32.mrf.mxu1 }
0x1da7   :  { %v2896_v37 = vmul.f32 -1.442695, %v1574_v47  ;;  %v1578_v41 = vadd.f32 %v1561_v8, %v3652_v61 }
0x1da9   :  { %3109 = vpow2.f32 %v2896_v37 }
0x1dae   :  { %v1563_v48 = vpop.f32.mrf.mxu0  ;;  %v1576_v44 = vpop.f32.mrf.mxu1 }
0x1daf   :  { %v3110_v50 = vpop.eup %3109 }
0x1db0   :  { %v1582_v51 = vadd.f32 1.0, %v3110_v50 }
0x1db2   :  { %3111 = vrcp.f32 %v1582_v51  ;;  %v1594_v53 = vand.u32 2147483648, %v1582_v51  ;;  %v1592_v32 = vand.u32 2147483647, %v1582_v51  ;;  %vm1588_vm9 = vweird.f32 %v1582_v51 }
0x1db3   :  { %3113 = vtanh.f32 %v1578_v41 }
0x1db4   :  { %v1595_v25 = vor.u32 1.1754944e-38, %v1594_v53  ;;  %vm1593_vm11 = vcmp.eq.f32.partialorder %v1592_v32, 8.507059e+37 }
0x1db8   :  { %v3112_v36 = vpop.eup %3111 }
0x1db9   :  { %v1584_v54 = vmul.f32 %v3112_v36, %v1582_v51  ;;  %vm1589_vm8 = vweird.f32 %v3112_v36  ;;  %v3114_v59 = vpop.eup %3113 }
0x1dba   :  { %vm1590_vm10 = vmor %vm1588_vm9, %vm1589_vm8 }
0x1dbb   :  { %v1585_v56 = vsub.f32 1.0, %v1584_v54 }
0x1dbd   :  { %v1586_v7 = vmul.f32 %v3112_v36, %v1585_v56 }
0x1dbf   :  { %v1587_v55 = vadd.f32 %v3112_v36, %v1586_v7 }
0x1dc1   :  { %v1591_v17 = vsel %vm1590_vm10, %v3112_v36, %v1587_v55 }
0x1dc2   :  { %v1596_v6 = vsel %vm1593_vm11, %v1595_v25, %v1591_v17 }
0x1dc3   :  { %v1599_v9 = vmul.f32 %v3114_v59, %v1596_v6 }
0x1dc5   :  { %v1600_v1 = vsub.f32 %v1599_v9, %v1550_v35 }
0x1dc7   :  { %v1601_v20 = vmul.f32 %v3989_v60, %v1600_v1 }
0x1dc9   :  { %1602 = vadd.xlane.f32.xlu1 %v1601_v20 }
0x1e3c   :  { %v1603_v15 = vpop.xlane.xlu1 %1602 }
0x1e3d   :  { %v1604_v12 = vmul.f32 0.015625, %v1603_v15 }
0x1e3f   :  { %v1605_v18 = vsub.f32 %v1601_v20, %v1604_v12 }
0x1e41   :  { %v1606_v43 = vmul.f32 %v3995_v52, %v1605_v18 }
0x1e43   :  { %v1607_v57 = vmul.f32 %v1606_v43, %v1606_v43 }
0x1e45   :  { %1608 = vadd.xlane.f32.xlu2 %v1607_v57 }
0x1eb8   :  { %v1609_v42 = vpop.xlane.xlu2 %1608 }
0x1eb9   :  { %v1610_v24 = vmul.f32 0.015625, %v1609_v42 }
0x1ebb   :  { %v1611_v23 = vadd.f32 1e-05, %v1610_v24 }
0x1ebd   :  { %3115 = vrsqrt.f32 %v1611_v23  ;;  %vm1618_vm13 = vweird.f32 %v1611_v23 }
0x1ec3   :  { %v3116_v26 = vpop.eup %3115 }
0x1ec4   :  { %v1613_v58 = vmul.f32 %v3116_v26, %v1611_v23  ;;  %vm1619_vm12 = vweird.f32 %v3116_v26 }
0x1ec5   :  { %vm1620_vm14 = vmor %vm1618_vm13, %vm1619_vm12 }
0x1ec6   :  { %v1614_v29 = vmul.f32 %v3116_v26, %v1613_v58 }
0x1ec8   :  { %v1615_v30 = vmul.f32 0.5, %v1614_v29 }
0x1eca   :  { %v1616_v31 = vsub.f32 1.5, %v1615_v30 }
0x1ecc   :  { %v1617_v35 = vmul.f32 %v3116_v26, %v1616_v31 }
0x1ece   :  { %v1621_v22 = vsel %vm1620_vm14, %v3116_v26, %v1617_v35 }
0x1ecf   :  { %v1622_v8 = vmul.f32 %v1621_v22, %v1606_v43 }
0x1ed1   :  { %v1623_v47 = vmul.f32 %v4001_v16, %v1622_v8 }
0x1ed3   :  { %v4095_v37 = vadd.f32 %v4007_v4, %v1623_v47 }
0x1ed5   :  { %v1625_v48 = vsub.f32 %v4095_v37, %v4070_v11 }
0x1ed7   :  { %v1626_v44 = vadd.f32 %v1625_v48, %v4041_v38 }
0x1ed9   :  { %v1627_v50 = vpack.c.bf16 %v1626_v44, %v1626_v44 }
0x1edb   :  { %1636 = vmatmul.bf16.vlgmr.msrb.gmra.mxu2 %v1627_v50  ;;  %1649 = vmatmul.bf16.vlgmr.msrb.gmra.mxu3 %v1627_v50 }
0x1edc   :  { %1939 = vmatpush.bf16.msrb.mxu2 %v3330_v10  ;;  %1952 = vmatpush.bf16.msrb.mxu3 %v3310_v3 }
0x1ee0   :  { %1940 = vmatpush.bf16.msrb.mxu2 %v3339_v13  ;;  %1953 = vmatpush.bf16.msrb.mxu3 %v3316_v5 }
0x1ee4   :  { %1941 = vmatpush.bf16.msrb.mxu2 %v3358_v19  ;;  %1954 = vmatpush.bf16.msrb.mxu3 %v3343_v14 }
0x1ee8   :  { %1942 = vmatpush.bf16.msrb.mxu2 %v3385_v27  ;;  %1955 = vmatpush.bf16.msrb.mxu3 %v3365_v21 }
0x1eec   :  { %1943 = vmatpush.bf16.msrb.mxu2 %v3405_v33  ;;  %1956 = vmatpush.bf16.msrb.mxu3 %v3389_v28 }
0x1ef0   :  { %1944 = vmatpush.bf16.msrb.mxu2 %v3425_v39  ;;  %1957 = vmatpush.bf16.msrb.mxu3 %v3409_v34 }
0x1ef4   :  { %1945 = vmatpush.bf16.msrb.mxu2 %v3445_v45  ;;  %1958 = vmatpush.bf16.msrb.mxu3 %v3429_v40 }
0x1ef8   :  { %1946 = vmatpush.bf16.msrb.mxu2 %v3459_v49  ;;  %1959 = vmatpush.bf16.msrb.mxu3 %v3449_v46 }
0x1f5e   :  { %v1637_v11 = vpop.f32.mrf.mxu2  ;;  %v1650_v51 = vpop.f32.mrf.mxu3 }
0x1f5f   :  { %v2897_v36 = vmul.f32 -1.442695, %v1650_v51  ;;  %v1654_v32 = vadd.f32 %v1637_v11, %v3652_v61  ;;  %v1701_v51 = vsub.f32 %v4067_v2, %v4095_v37 }
0x1f61   :  { %3117 = vpow2.f32 %v2897_v36 }
0x1f66   :  { %v1639_v41 = vpop.f32.mrf.mxu2  ;;  %v1652_v54 = vpop.f32.mrf.mxu3 }
0x1f67   :  { %v3118_v56 = vpop.eup %3117 }
0x1f68   :  { %v1658_v53 = vadd.f32 1.0, %v3118_v56 }
0x1f6a   :  { %3119 = vrcp.f32 %v1658_v53  ;;  %v1670_v17 = vand.u32 2147483648, %v1658_v53  ;;  %v1668_v6 = vand.u32 2147483647, %v1658_v53  ;;  %vm1664_vm1 = vweird.f32 %v1658_v53 }
0x1f6b   :  { %3121 = vtanh.f32 %v1654_v32 }
0x1f6c   :  { %v1671_v1 = vor.u32 1.1754944e-38, %v1670_v17  ;;  %vm1669_vm3 = vcmp.eq.f32.partialorder %v1668_v6, 8.507059e+37 }
0x1f70   :  { %v3120_v7 = vpop.eup %3119 }
0x1f71   :  { %v1660_v55 = vmul.f32 %v3120_v7, %v1658_v53  ;;  %vm1665_vm15 = vweird.f32 %v3120_v7  ;;  %v3122_v15 = vpop.eup %3121 }
0x1f72   :  { %vm1666_vm2 = vmor %vm1664_vm1, %vm1665_vm15 }
0x1f73   :  { %v1661_v25 = vsub.f32 1.0, %v1660_v55 }
0x1f75   :  { %v1662_v59 = vmul.f32 %v3120_v7, %v1661_v25 }
0x1f77   :  { %v1663_v9 = vadd.f32 %v3120_v7, %v1662_v59 }
0x1f79   :  { %v1667_v20 = vsel %vm1666_vm2, %v3120_v7, %v1663_v9 }
0x1f7a   :  { %v1672_v12 = vsel %vm1669_vm3, %v1671_v1, %v1667_v20 }
0x1f7b   :  { %v1675_v18 = vmul.f32 %v3122_v15, %v1672_v12 }
0x1f7d   :  { %v1676_v43 = vsub.f32 %v1675_v18, %v1626_v44 }
0x1f7f   :  { %v1677_v57 = vmul.f32 %v3989_v60, %v1676_v43 }
0x1f81   :  { %1678 = vadd.xlane.f32.xlu0 %v1677_v57 }
0x1ff4   :  { %v1679_v61 = vpop.xlane.xlu0 %1678 }
0x1ff5   :  { %v1680_v42 = vmul.f32 0.015625, %v1679_v61 }
0x1ff7   :  { %v1681_v24 = vsub.f32 %v1677_v57, %v1680_v42 }
0x1ff9   :  { %v1682_v23 = vmul.f32 %v3995_v52, %v1681_v24 }
0x1ffb   :  { %v1683_v26 = vmul.f32 %v1682_v23, %v1682_v23 }
0x1ffd   :  { %1684 = vadd.xlane.f32.xlu1 %v1683_v26 }
0x2070   :  { %v1685_v58 = vpop.xlane.xlu1 %1684 }
0x2071   :  { %v1686_v29 = vmul.f32 0.015625, %v1685_v58 }
0x2073   :  { %v1687_v30 = vadd.f32 1e-05, %v1686_v29 }
0x2075   :  { %3123 = vrsqrt.f32 %v1687_v30  ;;  %vm1694_vm5 = vweird.f32 %v1687_v30 }
0x207b   :  { %v3124_v31 = vpop.eup %3123 }
0x207c   :  { %v1689_v35 = vmul.f32 %v3124_v31, %v1687_v30  ;;  %vm1695_vm4 = vweird.f32 %v3124_v31 }
0x207d   :  { %vm1696_vm6 = vmor %vm1694_vm5, %vm1695_vm4 }
0x207e   :  { %v1690_v22 = vmul.f32 %v3124_v31, %v1689_v35 }
0x2080   :  { %v1691_v8 = vmul.f32 0.5, %v1690_v22 }
0x2082   :  { %v1692_v47 = vsub.f32 1.5, %v1691_v8 }
0x2084   :  { %v1693_v48 = vmul.f32 %v3124_v31, %v1692_v47 }
0x2086   :  { %v1697_v44 = vsel %vm1696_vm6, %v3124_v31, %v1693_v48 }
0x2087   :  { %v1698_v50 = vmul.f32 %v1697_v44, %v1682_v23 }
0x2089   :  { %v1699_v11 = vmul.f32 %v4001_v16, %v1698_v50 }
0x208b   :  { %v4123_v36 = vadd.f32 %v4007_v4, %v1699_v11 }
0x208d   :  { %v1702_v41 = vadd.f32 %v1701_v51, %v4123_v36 }
0x208f   :  { %v1703_v54 = vadd.f32 %v1702_v41, %v4041_v38 }
0x2091   :  { %v1704_v56 = vpack.c.bf16 %v1703_v54, %v1703_v54 }
0x2093   :  { %1713 = vmatmul.bf16.vlgmr.msrb.gmra.mxu0 %v1704_v56  ;;  %1726 = vmatmul.bf16.vlgmr.msra.gmra.mxu1 %v1704_v56 }
0x2094   :  { %2016 = vmatpush.bf16.msrb.mxu0 %v3330_v10  ;;  %2029 = vmatpush.bf16.msra.mxu1 %v3310_v3 }
0x2098   :  { %2017 = vmatpush.bf16.msrb.mxu0 %v3339_v13  ;;  %2030 = vmatpush.bf16.msra.mxu1 %v3316_v5 }
0x209c   :  { %2018 = vmatpush.bf16.msrb.mxu0 %v3358_v19  ;;  %2031 = vmatpush.bf16.msra.mxu1 %v3343_v14 }
0x20a0   :  { %2019 = vmatpush.bf16.msrb.mxu0 %v3385_v27  ;;  %2032 = vmatpush.bf16.msra.mxu1 %v3365_v21 }
0x20a4   :  { %2020 = vmatpush.bf16.msrb.mxu0 %v3405_v33  ;;  %2033 = vmatpush.bf16.msra.mxu1 %v3389_v28 }
0x20a8   :  { %2021 = vmatpush.bf16.msrb.mxu0 %v3425_v39  ;;  %2034 = vmatpush.bf16.msra.mxu1 %v3409_v34 }
0x20ac   :  { %2022 = vmatpush.bf16.msrb.mxu0 %v3445_v45  ;;  %2035 = vmatpush.bf16.msra.mxu1 %v3429_v40 }
0x20b0   :  { %2023 = vmatpush.bf16.msrb.mxu0 %v3459_v49  ;;  %2036 = vmatpush.bf16.msra.mxu1 %v3449_v46 }
0x2110   :  { %v1714_v53 = vpop.f32.mrf.mxu0  ;;  %v1727_v7 = vpop.f32.mrf.mxu1 }
0x2111   :  { %v2898_v32 = vmul.f32 -1.442695, %v1727_v7  ;;  %v1731_v9 = vadd.f32 %v1714_v53, %v3654_v62 }
0x2113   :  { %3125 = vpow2.f32 %v2898_v32 }
0x2118   :  { %v1716_v55 = vpop.f32.mrf.mxu0  ;;  %v1729_v25 = vpop.f32.mrf.mxu1 }
0x2119   :  { %v3126_v17 = vpop.eup %3125 }
0x211a   :  { %v1735_v59 = vadd.f32 1.0, %v3126_v17 }
0x211c   :  { %3127 = vrcp.f32 %v1735_v59  ;;  %v1747_v15 = vand.u32 2147483648, %v1735_v59  ;;  %v1745_v18 = vand.u32 2147483647, %v1735_v59  ;;  %vm1741_vm7 = vweird.f32 %v1735_v59 }
0x211d   :  { %3129 = vtanh.f32 %v1731_v9 }
0x211e   :  { %v1748_v57 = vor.u32 1.1754944e-38, %v1747_v15  ;;  %vm1746_vm9 = vcmp.eq.f32.partialorder %v1745_v18, 8.507059e+37 }
0x2122   :  { %v3128_v6 = vpop.eup %3127 }
0x2123   :  { %v1737_v1 = vmul.f32 %v3128_v6, %v1735_v59  ;;  %vm1742_vm0 = vweird.f32 %v3128_v6  ;;  %v3130_v42 = vpop.eup %3129 }
0x2124   :  { %vm1743_vm8 = vmor %vm1741_vm7, %vm1742_vm0 }
0x2125   :  { %v1738_v20 = vsub.f32 1.0, %v1737_v1 }
0x2127   :  { %v1739_v12 = vmul.f32 %v3128_v6, %v1738_v20 }
0x2129   :  { %v1740_v43 = vadd.f32 %v3128_v6, %v1739_v12 }
0x212b   :  { %v1744_v61 = vsel %vm1743_vm8, %v3128_v6, %v1740_v43 }
0x212c   :  { %v1749_v24 = vsel %vm1746_vm9, %v1748_v57, %v1744_v61 }
0x212d   :  { %v1752_v23 = vmul.f32 %v3130_v42, %v1749_v24 }
0x212f   :  { %v1753_v26 = vsub.f32 %v1752_v23, %v1703_v54  ;;  %v1778_v54 = vadd.f32 %v4123_v36, %v4095_v37 }
0x2131   :  { %v1754_v58 = vmul.f32 %v3989_v60, %v1753_v26  ;;  %v1779_v7 = vmul.f32 3.0, %v1778_v54 }
0x2133   :  { %1755 = vadd.xlane.f32.xlu2 %v1754_v58  ;;  %v1780_v25 = vadd.f32 %v1779_v7, %v4067_v2 }
0x21a6   :  { %v1756_v29 = vpop.xlane.xlu2 %1755 }
0x21a7   :  { %v1757_v30 = vmul.f32 0.015625, %v1756_v29 }
0x21a9   :  { %v1758_v31 = vsub.f32 %v1754_v58, %v1757_v30 }
0x21ab   :  { %v1759_v35 = vmul.f32 %v3995_v52, %v1758_v31 }
0x21ad   :  { %v1760_v22 = vmul.f32 %v1759_v35, %v1759_v35 }
0x21af   :  { %1761 = vadd.xlane.f32.xlu0 %v1760_v22 }
0x2222   :  { %v1762_v8 = vpop.xlane.xlu0 %1761 }
0x2223   :  { %v1763_v47 = vmul.f32 0.015625, %v1762_v8 }
0x2225   :  { %v1764_v48 = vadd.f32 1e-05, %v1763_v47 }
0x2227   :  { %3131 = vrsqrt.f32 %v1764_v48  ;;  %vm1771_vm11 = vweird.f32 %v1764_v48 }
0x222d   :  { %v3132_v44 = vpop.eup %3131 }
0x222e   :  { %v1766_v50 = vmul.f32 %v3132_v44, %v1764_v48  ;;  %vm1772_vm10 = vweird.f32 %v3132_v44 }
0x222f   :  { %vm1773_vm12 = vmor %vm1771_vm11, %vm1772_vm10 }
0x2230   :  { %v1767_v11 = vmul.f32 %v3132_v44, %v1766_v50 }
0x2232   :  { %v1768_v51 = vmul.f32 0.5, %v1767_v11 }
0x2234   :  { %v1769_v41 = vsub.f32 1.5, %v1768_v51 }
0x2236   :  { %v1770_v56 = vmul.f32 %v3132_v44, %v1769_v41 }
0x2238   :  { %v1774_v53 = vsel %vm1773_vm12, %v3132_v44, %v1770_v56 }
0x2239   :  { %v1775_v32 = vmul.f32 %v1774_v53, %v1759_v35 }
0x223b   :  { %v1776_v55 = vmul.f32 %v4001_v16, %v1775_v32 }
0x223d   :  { %v1777_v17 = vadd.f32 %v4007_v4, %v1776_v55 }
0x223f   :  { %v1781_v59 = vadd.f32 %v1780_v25, %v1777_v17 }
0x2241   :  { %v1782_v6 = vmul.f32 0.125, %v1781_v59 }
0x2243   :  { %v4152_v9 = vadd.f32 %v1782_v6, %v4041_v38 }
0x2245   :  { %v1786_v37 = vpack.c.bf16 %v4152_v9, %v4152_v9 }
0x2247   :  { %1795 = vmatmul.bf16.vlgmr.msra.gmra.mxu2 %v1786_v37  ;;  %1808 = vmatmul.bf16.vlgmr.msra.gmra.mxu3 %v1786_v37 }
0x2248   :  { %2098 = vmatpush.bf16.msra.mxu2 %v3330_v10  ;;  %2111 = vmatpush.bf16.msra.mxu3 %v3310_v3 }
0x224c   :  { %2099 = vmatpush.bf16.msra.mxu2 %v3339_v13  ;;  %2112 = vmatpush.bf16.msra.mxu3 %v3316_v5 }
0x2250   :  { %2100 = vmatpush.bf16.msra.mxu2 %v3358_v19  ;;  %2113 = vmatpush.bf16.msra.mxu3 %v3343_v14 }
0x2254   :  { %2101 = vmatpush.bf16.msra.mxu2 %v3385_v27  ;;  %2114 = vmatpush.bf16.msra.mxu3 %v3365_v21 }
0x2258   :  { %2102 = vmatpush.bf16.msra.mxu2 %v3405_v33  ;;  %2115 = vmatpush.bf16.msra.mxu3 %v3389_v28 }
0x225c   :  { %2103 = vmatpush.bf16.msra.mxu2 %v3425_v39  ;;  %2116 = vmatpush.bf16.msra.mxu3 %v3409_v34 }
0x2260   :  { %2104 = vmatpush.bf16.msra.mxu2 %v3445_v45  ;;  %2117 = vmatpush.bf16.msra.mxu3 %v3429_v40 }
0x2264   :  { %2105 = vmatpush.bf16.msra.mxu2 %v3459_v49  ;;  %2118 = vmatpush.bf16.msra.mxu3 %v3449_v46 }
0x22ca   :  { %v1796_v38 = vpop.f32.mrf.mxu2  ;;  %v1809_v2 = vpop.f32.mrf.mxu3 }
0x22cb   :  { %v2899_v36 = vmul.f32 -1.442695, %v1809_v2  ;;  %v1813_v43 = vadd.f32 %v1796_v38, %v3654_v62 }
0x22cd   :  { %3133 = vpow2.f32 %v2899_v36 }
0x22d2   :  { %v1798_v1 = vpop.f32.mrf.mxu2  ;;  %v1811_v20 = vpop.f32.mrf.mxu3 }
0x22d3   :  { %v3134_v15 = vpop.eup %3133 }
0x22d4   :  { %v1817_v12 = vadd.f32 1.0, %v3134_v15 }
0x22d6   :  { %3135 = vrcp.f32 %v1817_v12  ;;  %v1829_v42 = vand.u32 2147483648, %v1817_v12  ;;  %v1827_v23 = vand.u32 2147483647, %v1817_v12  ;;  %vm1823_vm14 = vweird.f32 %v1817_v12 }
0x22d7   :  { %3137 = vtanh.f32 %v1813_v43 }
0x22d8   :  { %v1830_v58 = vor.u32 1.1754944e-38, %v1829_v42  ;;  %vm1828_vm1 = vcmp.eq.f32.partialorder %v1827_v23, 8.507059e+37 }
0x22dc   :  { %v3136_v18 = vpop.eup %3135 }
0x22dd   :  { %v1819_v57 = vmul.f32 %v3136_v18, %v1817_v12  ;;  %vm1824_vm13 = vweird.f32 %v3136_v18  ;;  %v3138_v30 = vpop.eup %3137 }
0x22de   :  { %vm1825_vm15 = vmor %vm1823_vm14, %vm1824_vm13 }
0x22df   :  { %v1820_v61 = vsub.f32 1.0, %v1819_v57 }
0x22e1   :  { %v1821_v24 = vmul.f32 %v3136_v18, %v1820_v61 }
0x22e3   :  { %v1822_v26 = vadd.f32 %v3136_v18, %v1821_v24 }
0x22e5   :  { %v1826_v29 = vsel %vm1825_vm15, %v3136_v18, %v1822_v26 }
0x22e6   :  { %v1831_v31 = vsel %vm1828_vm1, %v1830_v58, %v1826_v29 }
0x22e7   :  { %v1834_v35 = vmul.f32 %v3138_v30, %v1831_v31 }
0x22e9   :  { %v1835_v22 = vsub.f32 %v1834_v35, %v4152_v9 }
0x22eb   :  { %v1836_v8 = vmul.f32 %v3989_v60, %v1835_v22  ;;  %v4205_v22 = vld [vmem:[%s4493_s3] ss:$0 sm:$0xff] }
0x22ed   :  { %1837 = vadd.xlane.f32.xlu1 %v1836_v8 }
0x2360   :  { %v1838_v47 = vpop.xlane.xlu1 %1837 }
0x2361   :  { %v1839_v48 = vmul.f32 0.015625, %v1838_v47 }
0x2363   :  { %v1840_v44 = vsub.f32 %v1836_v8, %v1839_v48 }
0x2365   :  { %v1841_v50 = vmul.f32 %v3995_v52, %v1840_v44 }
0x2367   :  { %v1842_v11 = vmul.f32 %v1841_v50, %v1841_v50 }
0x2369   :  { %1843 = vadd.xlane.f32.xlu2 %v1842_v11 }
0x23dc   :  { %v1844_v51 = vpop.xlane.xlu2 %1843 }
0x23dd   :  { %v1845_v41 = vmul.f32 0.015625, %v1844_v51 }
0x23df   :  { %v1846_v54 = vadd.f32 1e-05, %v1845_v41 }
0x23e1   :  { %3139 = vrsqrt.f32 %v1846_v54  ;;  %vm1853_vm3 = vweird.f32 %v1846_v54 }
0x23e7   :  { %v3140_v56 = vpop.eup %3139 }
0x23e8   :  { %v1848_v53 = vmul.f32 %v3140_v56, %v1846_v54  ;;  %vm1854_vm2 = vweird.f32 %v3140_v56 }
0x23e9   :  { %vm1855_vm4 = vmor %vm1853_vm3, %vm1854_vm2 }
0x23ea   :  { %v1849_v7 = vmul.f32 %v3140_v56, %v1848_v53 }
0x23ec   :  { %v1850_v32 = vmul.f32 0.5, %v1849_v7 }
0x23ee   :  { %v1851_v55 = vsub.f32 1.5, %v1850_v32 }
0x23f0   :  { %v1852_v25 = vmul.f32 %v3140_v56, %v1851_v55 }
0x23f2   :  { %v1856_v60 = vsel %vm1855_vm4, %v3140_v56, %v1852_v25 }
0x23f3   :  { %v1857_v17 = vmul.f32 %v1856_v60, %v1841_v50  ;;  %v4211_v50 = vld [vmem:[%s4494_s6] ss:$0 sm:$0xff] }
0x23f5   :  { %v1858_v59 = vmul.f32 %v4001_v16, %v1857_v17 }
0x23f7   :  { %v4178_v52 = vadd.f32 %v4007_v4, %v1858_v59 }
0x23f9   :  { %v4181_v6 = vmul.f32 0.33333334, %v4178_v52 }
0x23fb   :  { %v1861_v37 = vadd.f32 %v4181_v6, %v4152_v9 }
0x23fd   :  { %v1862_v38 = vpack.c.bf16 %v1861_v37, %v1861_v37 }
0x23ff   :  { %1871 = vmatmul.bf16.vlgmr.msra.gmra.mxu0 %v1862_v38  ;;  %1884 = vmatmul.bf16.vlgmr.msrb.gmra.mxu1 %v1862_v38 }
0x2400   :  { %2174 = vmatpush.bf16.msra.mxu0 %v3330_v10  ;;  %2187 = vmatpush.bf16.msrb.mxu1 %v3310_v3 }
0x2404   :  { %2175 = vmatpush.bf16.msra.mxu0 %v3339_v13  ;;  %2188 = vmatpush.bf16.msrb.mxu1 %v3316_v5 }
0x2408   :  { %2176 = vmatpush.bf16.msra.mxu0 %v3358_v19  ;;  %2189 = vmatpush.bf16.msrb.mxu1 %v3343_v14 }
0x240c   :  { %2177 = vmatpush.bf16.msra.mxu0 %v3385_v27  ;;  %2190 = vmatpush.bf16.msrb.mxu1 %v3365_v21 }
0x2410   :  { %2178 = vmatpush.bf16.msra.mxu0 %v3405_v33  ;;  %2191 = vmatpush.bf16.msrb.mxu1 %v3389_v28 }
0x2414   :  { %2179 = vmatpush.bf16.msra.mxu0 %v3425_v39  ;;  %2192 = vmatpush.bf16.msrb.mxu1 %v3409_v34 }
0x2418   :  { %2180 = vmatpush.bf16.msra.mxu0 %v3445_v45  ;;  %2193 = vmatpush.bf16.msrb.mxu1 %v3429_v40 }
0x241c   :  { %2181 = vmatpush.bf16.msra.mxu0 %v3459_v49  ;;  %2194 = vmatpush.bf16.msrb.mxu1 %v3449_v46 }
0x247c   :  { %v1872_v16 = vpop.f32.mrf.mxu0  ;;  %v1885_v4 = vpop.f32.mrf.mxu1 }
0x247d   :  { %v2900_v2 = vmul.f32 -1.442695, %v1885_v4  ;;  %v1889_v18 = vadd.f32 %v1872_v16, %v3654_v62  ;;  %v4223_v16 = vld [vmem:[%s4496_s5] ss:$0 sm:$0xff] }
0x247f   :  { %3141 = vpow2.f32 %v2900_v2 }
0x2484   :  { %v1874_v36 = vpop.f32.mrf.mxu0  ;;  %v1887_v1 = vpop.f32.mrf.mxu1 }
0x2485   :  { %v3142_v20 = vpop.eup %3141 }
0x2486   :  { %v1893_v15 = vadd.f32 1.0, %v3142_v20 }
0x2488   :  { %3143 = vrcp.f32 %v1893_v15  ;;  %v1905_v61 = vand.u32 2147483648, %v1893_v15  ;;  %v1903_v24 = vand.u32 2147483647, %v1893_v15  ;;  %vm1899_vm6 = vweird.f32 %v1893_v15 }
0x2489   :  { %3145 = vtanh.f32 %v1889_v18 }
0x248a   :  { %v1906_v26 = vor.u32 1.1754944e-38, %v1905_v61  ;;  %vm1904_vm7 = vcmp.eq.f32.partialorder %v1903_v24, 8.507059e+37 }
0x248e   :  { %v3144_v12 = vpop.eup %3143 }
0x248f   :  { %v1895_v43 = vmul.f32 %v3144_v12, %v1893_v15  ;;  %vm1900_vm5 = vweird.f32 %v3144_v12  ;;  %v3146_v29 = vpop.eup %3145 }
0x2490   :  { %vm1901_vm0 = vmor %vm1899_vm6, %vm1900_vm5 }
0x2491   :  { %v1896_v57 = vsub.f32 1.0, %v1895_v43 }
0x2493   :  { %v1897_v42 = vmul.f32 %v3144_v12, %v1896_v57 }
0x2495   :  { %v1898_v23 = vadd.f32 %v3144_v12, %v1897_v42 }
0x2497   :  { %v1902_v58 = vsel %vm1901_vm0, %v3144_v12, %v1898_v23 }
0x2498   :  { %v1907_v30 = vsel %vm1904_vm7, %v1906_v26, %v1902_v58 }
0x2499   :  { %v1910_v31 = vmul.f32 %v3146_v29, %v1907_v30 }
0x249b   :  { %v1911_v35 = vsub.f32 %v1910_v31, %v1861_v37  ;;  %v4217_v37 = vld [vmem:[%s4495_s4] ss:$0 sm:$0xff] }
0x249d   :  { %v1912_v8 = vmul.f32 %v4205_v22, %v1911_v35 }
0x249f   :  { %1913 = vadd.xlane.f32.xlu0 %v1912_v8 }
0x2512   :  { %v1914_v47 = vpop.xlane.xlu0 %1913 }
0x2513   :  { %v1915_v48 = vmul.f32 0.015625, %v1914_v47 }
0x2515   :  { %v1916_v44 = vsub.f32 %v1912_v8, %v1915_v48 }
0x2517   :  { %v1917_v11 = vmul.f32 %v4211_v50, %v1916_v44 }
0x2519   :  { %v1918_v51 = vmul.f32 %v1917_v11, %v1917_v11 }
0x251b   :  { %1919 = vadd.xlane.f32.xlu1 %v1918_v51 }
0x258e   :  { %v1920_v41 = vpop.xlane.xlu1 %1919 }
0x258f   :  { %v1921_v54 = vmul.f32 0.015625, %v1920_v41 }
0x2591   :  { %v1922_v56 = vadd.f32 1e-05, %v1921_v54 }
0x2593   :  { %3147 = vrsqrt.f32 %v1922_v56  ;;  %vm1929_vm9 = vweird.f32 %v1922_v56 }
0x2599   :  { %v3148_v53 = vpop.eup %3147 }
0x259a   :  { %v1924_v7 = vmul.f32 %v3148_v53, %v1922_v56  ;;  %vm1930_vm8 = vweird.f32 %v3148_v53 }
0x259b   :  { %vm1931_vm10 = vmor %vm1929_vm9, %vm1930_vm8 }
0x259c   :  { %v1925_v32 = vmul.f32 %v3148_v53, %v1924_v7 }
0x259e   :  { %v1926_v55 = vmul.f32 0.5, %v1925_v32 }
0x25a0   :  { %v1927_v25 = vsub.f32 1.5, %v1926_v55 }
0x25a2   :  { %v1928_v60 = vmul.f32 %v3148_v53, %v1927_v25 }
0x25a4   :  { %v1932_v17 = vsel %vm1931_vm10, %v3148_v53, %v1928_v60 }
0x25a5   :  { %v1933_v59 = vmul.f32 %v1932_v17, %v1917_v11 }
0x25a7   :  { %v1934_v38 = vmul.f32 %v4217_v37, %v1933_v59 }
0x25a9   :  { %v4226_v4 = vadd.f32 %v4223_v16, %v1934_v38 }
0x25ab   :  { %v1936_v2 = vsub.f32 %v4226_v4, %v4181_v6 }
0x25ad   :  { %v1937_v36 = vadd.f32 %v1936_v2, %v4152_v9 }
0x25af   :  { %v1938_v1 = vpack.c.bf16 %v1937_v36, %v1937_v36 }
0x25b1   :  { %1947 = vmatmul.bf16.vlgmr.msrb.gmra.mxu2 %v1938_v1  ;;  %1960 = vmatmul.bf16.vlgmr.msrb.gmra.mxu3 %v1938_v1 }
0x25b2   :  { %2250 = vmatpush.bf16.msrb.mxu2 %v3330_v10  ;;  %2263 = vmatpush.bf16.msrb.mxu3 %v3310_v3 }
0x25b6   :  { %2251 = vmatpush.bf16.msrb.mxu2 %v3339_v13  ;;  %2264 = vmatpush.bf16.msrb.mxu3 %v3316_v5 }
0x25ba   :  { %2252 = vmatpush.bf16.msrb.mxu2 %v3358_v19  ;;  %2265 = vmatpush.bf16.msrb.mxu3 %v3343_v14 }
0x25be   :  { %2253 = vmatpush.bf16.msrb.mxu2 %v3385_v27  ;;  %2266 = vmatpush.bf16.msrb.mxu3 %v3365_v21 }
0x25c2   :  { %2254 = vmatpush.bf16.msrb.mxu2 %v3405_v33  ;;  %2267 = vmatpush.bf16.msrb.mxu3 %v3389_v28 }
0x25c6   :  { %2255 = vmatpush.bf16.msrb.mxu2 %v3425_v39  ;;  %2268 = vmatpush.bf16.msrb.mxu3 %v3409_v34 }
0x25ca   :  { %2256 = vmatpush.bf16.msrb.mxu2 %v3445_v45  ;;  %2269 = vmatpush.bf16.msrb.mxu3 %v3429_v40 }
0x25ce   :  { %2257 = vmatpush.bf16.msrb.mxu2 %v3459_v49  ;;  %2270 = vmatpush.bf16.msrb.mxu3 %v3449_v46 }
0x2634   :  { %v1948_v6 = vpop.f32.mrf.mxu2  ;;  %v1961_v20 = vpop.f32.mrf.mxu3 }
0x2635   :  { %v2901_v15 = vmul.f32 -1.442695, %v1961_v20  ;;  %v1965_v42 = vadd.f32 %v1948_v6, %v3654_v62  ;;  %v2012_v6 = vsub.f32 %v4178_v52, %v4226_v4 }
0x2637   :  { %3149 = vpow2.f32 %v2901_v15 }
0x263c   :  { %v1950_v12 = vpop.f32.mrf.mxu2  ;;  %v1963_v18 = vpop.f32.mrf.mxu3 }
0x263d   :  { %v3150_v43 = vpop.eup %3149 }
0x263e   :  { %v1969_v57 = vadd.f32 1.0, %v3150_v43 }
0x2640   :  { %3151 = vrcp.f32 %v1969_v57  ;;  %v1981_v26 = vand.u32 2147483648, %v1969_v57  ;;  %v1979_v29 = vand.u32 2147483647, %v1969_v57  ;;  %vm1975_vm12 = vweird.f32 %v1969_v57 }
0x2641   :  { %3153 = vtanh.f32 %v1965_v42 }
0x2642   :  { %v1982_v31 = vor.u32 1.1754944e-38, %v1981_v26  ;;  %vm1980_vm14 = vcmp.eq.f32.partialorder %v1979_v29, 8.507059e+37 }
0x2646   :  { %v3152_v61 = vpop.eup %3151 }
0x2647   :  { %v1971_v24 = vmul.f32 %v3152_v61, %v1969_v57  ;;  %vm1976_vm11 = vweird.f32 %v3152_v61  ;;  %v3154_v8 = vpop.eup %3153 }
0x2648   :  { %vm1977_vm13 = vmor %vm1975_vm12, %vm1976_vm11 }
0x2649   :  { %v1972_v23 = vsub.f32 1.0, %v1971_v24 }
0x264b   :  { %v1973_v58 = vmul.f32 %v3152_v61, %v1972_v23 }
0x264d   :  { %v1974_v30 = vadd.f32 %v3152_v61, %v1973_v58 }
0x264f   :  { %v1978_v35 = vsel %vm1977_vm13, %v3152_v61, %v1974_v30 }
0x2650   :  { %v1983_v47 = vsel %vm1980_vm14, %v1982_v31, %v1978_v35 }
0x2651   :  { %v1986_v48 = vmul.f32 %v3154_v8, %v1983_v47 }
0x2653   :  { %v1987_v44 = vsub.f32 %v1986_v48, %v1937_v36 }
0x2655   :  { %v1988_v11 = vmul.f32 %v4205_v22, %v1987_v44 }
0x2657   :  { %1989 = vadd.xlane.f32.xlu2 %v1988_v11 }
0x26ca   :  { %v1990_v62 = vpop.xlane.xlu2 %1989 }
0x26cb   :  { %v1991_v51 = vmul.f32 0.015625, %v1990_v62 }
0x26cd   :  { %v1992_v41 = vsub.f32 %v1988_v11, %v1991_v51 }
0x26cf   :  { %v1993_v54 = vmul.f32 %v4211_v50, %v1992_v41 }
0x26d1   :  { %v1994_v56 = vmul.f32 %v1993_v54, %v1993_v54 }
0x26d3   :  { %1995 = vadd.xlane.f32.xlu0 %v1994_v56 }
0x2746   :  { %v1996_v53 = vpop.xlane.xlu0 %1995 }
0x2747   :  { %v1997_v7 = vmul.f32 0.015625, %v1996_v53 }
0x2749   :  { %v1998_v32 = vadd.f32 1e-05, %v1997_v7 }
0x274b   :  { %3155 = vrsqrt.f32 %v1998_v32  ;;  %vm2005_vm1 = vweird.f32 %v1998_v32 }
0x2751   :  { %v3156_v55 = vpop.eup %3155 }
0x2752   :  { %v2000_v25 = vmul.f32 %v3156_v55, %v1998_v32  ;;  %vm2006_vm15 = vweird.f32 %v3156_v55 }
0x2753   :  { %vm2007_vm2 = vmor %vm2005_vm1, %vm2006_vm15 }
0x2754   :  { %v2001_v60 = vmul.f32 %v3156_v55, %v2000_v25 }
0x2756   :  { %v2002_v17 = vmul.f32 0.5, %v2001_v60 }
0x2758   :  { %v2003_v59 = vsub.f32 1.5, %v2002_v17 }
0x275a   :  { %v2004_v38 = vmul.f32 %v3156_v55, %v2003_v59 }
0x275c   :  { %v2008_v2 = vsel %vm2007_vm2, %v3156_v55, %v2004_v38 }
0x275d   :  { %v2009_v36 = vmul.f32 %v2008_v2, %v1993_v54 }
0x275f   :  { %v2010_v1 = vmul.f32 %v4217_v37, %v2009_v36 }
0x2761   :  { %v4254_v20 = vadd.f32 %v4223_v16, %v2010_v1 }
0x2763   :  { %v2013_v15 = vadd.f32 %v2012_v6, %v4254_v20 }
0x2765   :  { %v2014_v12 = vadd.f32 %v2013_v15, %v4152_v9  ;;  %v2089_v15 = vadd.f32 %v4254_v20, %v4226_v4 }
0x2767   :  { %v2015_v18 = vpack.c.bf16 %v2014_v12, %v2014_v12 }
0x2769   :  { %2024 = vmatmul.bf16.vlgmr.msrb.gmra.mxu0 %v2015_v18  ;;  %2037 = vmatmul.bf16.vlgmr.msra.gmra.mxu1 %v2015_v18 }
0x276a   :  { %2327 = vmatpush.bf16.msrb.mxu0 %v3330_v10  ;;  %2340 = vmatpush.bf16.msra.mxu1 %v3310_v3 }
0x276e   :  { %2328 = vmatpush.bf16.msrb.mxu0 %v3339_v13  ;;  %2341 = vmatpush.bf16.msra.mxu1 %v3316_v5 }
0x2772   :  { %2329 = vmatpush.bf16.msrb.mxu0 %v3358_v19  ;;  %2342 = vmatpush.bf16.msra.mxu1 %v3343_v14 }
0x2776   :  { %2330 = vmatpush.bf16.msrb.mxu0 %v3385_v27  ;;  %2343 = vmatpush.bf16.msra.mxu1 %v3365_v21 }
0x277a   :  { %2331 = vmatpush.bf16.msrb.mxu0 %v3405_v33  ;;  %2344 = vmatpush.bf16.msra.mxu1 %v3389_v28 }
0x277e   :  { %2332 = vmatpush.bf16.msrb.mxu0 %v3425_v39  ;;  %2345 = vmatpush.bf16.msra.mxu1 %v3409_v34 }
0x2782   :  { %2333 = vmatpush.bf16.msrb.mxu0 %v3445_v45  ;;  %2346 = vmatpush.bf16.msra.mxu1 %v3429_v40 }
0x2786   :  { %2334 = vmatpush.bf16.msrb.mxu0 %v3459_v49  ;;  %2347 = vmatpush.bf16.msra.mxu1 %v3449_v46 }
0x27e6   :  { %v2025_v43 = vpop.f32.mrf.mxu0  ;;  %v2038_v57 = vpop.f32.mrf.mxu1 }
0x27e7   :  { %v2902_v61 = vmul.f32 -1.442695, %v2038_v57  ;;  %v2042_v29 = vadd.f32 %v2025_v43, %v3656_v63  ;;  %v2090_v43 = vmul.f32 3.0, %v2089_v15 }
0x27e9   :  { %3157 = vpow2.f32 %v2902_v61 }
0x27ee   :  { %v2027_v42 = vpop.f32.mrf.mxu0  ;;  %v2040_v24 = vpop.f32.mrf.mxu1 }
0x27ef   :  { %v3158_v23 = vpop.eup %3157  ;;  %v2091_v42 = vadd.f32 %v2090_v43, %v4178_v52 }
0x27f0   :  { %v2046_v26 = vadd.f32 1.0, %v3158_v23 }
0x27f2   :  { %3159 = vrcp.f32 %v2046_v26  ;;  %v2058_v35 = vand.u32 2147483648, %v2046_v26  ;;  %v2056_v47 = vand.u32 2147483647, %v2046_v26  ;;  %vm2052_vm4 = vweird.f32 %v2046_v26 }
0x27f3   :  { %3161 = vtanh.f32 %v2042_v29 }
0x27f4   :  { %v2059_v44 = vor.u32 1.1754944e-38, %v2058_v35  ;;  %vm2057_vm6 = vcmp.eq.f32.partialorder %v2056_v47, 8.507059e+37 }
0x27f8   :  { %v3160_v58 = vpop.eup %3159 }
0x27f9   :  { %v2048_v30 = vmul.f32 %v3160_v58, %v2046_v26  ;;  %vm2053_vm3 = vweird.f32 %v3160_v58  ;;  %v3162_v62 = vpop.eup %3161 }
0x27fa   :  { %vm2054_vm5 = vmor %vm2052_vm4, %vm2053_vm3 }
0x27fb   :  { %v2049_v31 = vsub.f32 1.0, %v2048_v30 }
0x27fd   :  { %v2050_v8 = vmul.f32 %v3160_v58, %v2049_v31 }
0x27ff   :  { %v2051_v48 = vadd.f32 %v3160_v58, %v2050_v8 }
0x2801   :  { %v2055_v11 = vsel %vm2054_vm5, %v3160_v58, %v2051_v48 }
0x2802   :  { %v2060_v51 = vsel %vm2057_vm6, %v2059_v44, %v2055_v11 }
0x2803   :  { %v2063_v41 = vmul.f32 %v3162_v62, %v2060_v51 }
0x2805   :  { %v2064_v54 = vsub.f32 %v2063_v41, %v2014_v12 }
0x2807   :  { %v2065_v56 = vmul.f32 %v4205_v22, %v2064_v54 }
0x2809   :  { %2066 = vadd.xlane.f32.xlu1 %v2065_v56 }
0x287c   :  { %v2067_v53 = vpop.xlane.xlu1 %2066 }
0x287d   :  { %v2068_v7 = vmul.f32 0.015625, %v2067_v53 }
0x287f   :  { %v2069_v32 = vsub.f32 %v2065_v56, %v2068_v7 }
0x2881   :  { %v2070_v55 = vmul.f32 %v4211_v50, %v2069_v32 }
0x2883   :  { %v2071_v25 = vmul.f32 %v2070_v55, %v2070_v55 }
0x2885   :  { %2072 = vadd.xlane.f32.xlu2 %v2071_v25 }
0x28f8   :  { %v2073_v60 = vpop.xlane.xlu2 %2072 }
0x28f9   :  { %v2074_v17 = vmul.f32 0.015625, %v2073_v60 }
0x28fb   :  { %v2075_v59 = vadd.f32 1e-05, %v2074_v17 }
0x28fd   :  { %3163 = vrsqrt.f32 %v2075_v59  ;;  %vm2082_vm7 = vweird.f32 %v2075_v59 }
0x2903   :  { %v3164_v38 = vpop.eup %3163 }
0x2904   :  { %v2077_v2 = vmul.f32 %v3164_v38, %v2075_v59  ;;  %vm2083_vm0 = vweird.f32 %v3164_v38 }
0x2905   :  { %vm2084_vm8 = vmor %vm2082_vm7, %vm2083_vm0 }
0x2906   :  { %v2078_v36 = vmul.f32 %v3164_v38, %v2077_v2 }
0x2908   :  { %v2079_v1 = vmul.f32 0.5, %v2078_v36 }
0x290a   :  { %v2080_v6 = vsub.f32 1.5, %v2079_v1 }
0x290c   :  { %v2081_v12 = vmul.f32 %v3164_v38, %v2080_v6 }
0x290e   :  { %v2085_v18 = vsel %vm2084_vm8, %v3164_v38, %v2081_v12 }
0x290f   :  { %v2086_v57 = vmul.f32 %v2085_v18, %v2070_v55 }
0x2911   :  { %v2087_v61 = vmul.f32 %v4217_v37, %v2086_v57 }
0x2913   :  { %v2088_v24 = vadd.f32 %v4223_v16, %v2087_v61 }
0x2915   :  { %v2092_v23 = vadd.f32 %v2091_v42, %v2088_v24 }
0x2917   :  { %v2093_v26 = vmul.f32 0.125, %v2092_v23 }
0x2919   :  { %v4283_v58 = vadd.f32 %v2093_v26, %v4152_v9 }
0x291b   :  { %v2097_v4 = vpack.c.bf16 %v4283_v58, %v4283_v58 }
0x291d   :  { %2106 = vmatmul.bf16.vlgmr.msra.gmra.mxu2 %v2097_v4  ;;  %2119 = vmatmul.bf16.vlgmr.msra.gmra.mxu3 %v2097_v4 }
0x291e   :  { %2407 = vmatpush.bf16.msra.mxu2 %v3330_v10  ;;  %2420 = vmatpush.bf16.msra.mxu3 %v3310_v3 }
0x2922   :  { %2408 = vmatpush.bf16.msra.mxu2 %v3339_v13  ;;  %2421 = vmatpush.bf16.msra.mxu3 %v3316_v5 }
0x2926   :  { %2409 = vmatpush.bf16.msra.mxu2 %v3358_v19  ;;  %2422 = vmatpush.bf16.msra.mxu3 %v3343_v14 }
0x292a   :  { %2410 = vmatpush.bf16.msra.mxu2 %v3385_v27  ;;  %2423 = vmatpush.bf16.msra.mxu3 %v3365_v21 }
0x292e   :  { %2411 = vmatpush.bf16.msra.mxu2 %v3405_v33  ;;  %2424 = vmatpush.bf16.msra.mxu3 %v3389_v28 }
0x2932   :  { %2412 = vmatpush.bf16.msra.mxu2 %v3425_v39  ;;  %2425 = vmatpush.bf16.msra.mxu3 %v3409_v34 }
0x2936   :  { %2413 = vmatpush.bf16.msra.mxu2 %v3445_v45  ;;  %2426 = vmatpush.bf16.msra.mxu3 %v3429_v40 }
0x293a   :  { %2414 = vmatpush.bf16.msra.mxu2 %v3459_v49  ;;  %2427 = vmatpush.bf16.msra.mxu3 %v3449_v46 }
0x29a0   :  { %v2107_v9 = vpop.f32.mrf.mxu2  ;;  %v2120_v52 = vpop.f32.mrf.mxu3 }
0x29a1   :  { %v2903_v20 = vmul.f32 -1.442695, %v2120_v52  ;;  %v2124_v47 = vadd.f32 %v2107_v9, %v3656_v63 }
0x29a3   :  { %3165 = vpow2.f32 %v2903_v20 }
0x29a8   :  { %v2109_v29 = vpop.f32.mrf.mxu2  ;;  %v2122_v30 = vpop.f32.mrf.mxu3 }
0x29a9   :  { %v3166_v31 = vpop.eup %3165 }
0x29aa   :  { %v2128_v35 = vadd.f32 1.0, %v3166_v31 }
0x29ac   :  { %3167 = vrcp.f32 %v2128_v35  ;;  %v2140_v11 = vand.u32 2147483648, %v2128_v35  ;;  %v2138_v51 = vand.u32 2147483647, %v2128_v35  ;;  %vm2134_vm10 = vweird.f32 %v2128_v35 }
0x29ad   :  { %3169 = vtanh.f32 %v2124_v47 }
0x29ae   :  { %v2141_v54 = vor.u32 1.1754944e-38, %v2140_v11  ;;  %vm2139_vm12 = vcmp.eq.f32.partialorder %v2138_v51, 8.507059e+37 }
0x29b2   :  { %v3168_v8 = vpop.eup %3167 }
0x29b3   :  { %v2130_v48 = vmul.f32 %v3168_v8, %v2128_v35  ;;  %vm2135_vm9 = vweird.f32 %v3168_v8  ;;  %v3170_v53 = vpop.eup %3169 }
0x29b4   :  { %vm2136_vm11 = vmor %vm2134_vm10, %vm2135_vm9 }
0x29b5   :  { %v2131_v44 = vsub.f32 1.0, %v2130_v48 }
0x29b7   :  { %v2132_v62 = vmul.f32 %v3168_v8, %v2131_v44 }
0x29b9   :  { %v2133_v41 = vadd.f32 %v3168_v8, %v2132_v62 }
0x29bb   :  { %v2137_v56 = vsel %vm2136_vm11, %v3168_v8, %v2133_v41 }
0x29bc   :  { %v2142_v7 = vsel %vm2139_vm12, %v2141_v54, %v2137_v56 }
0x29bd   :  { %v2145_v32 = vmul.f32 %v3170_v53, %v2142_v7 }
0x29bf   :  { %v2146_v55 = vsub.f32 %v2145_v32, %v4283_v58 }
0x29c1   :  { %v2147_v25 = vmul.f32 %v4205_v22, %v2146_v55 }
0x29c3   :  { %2148 = vadd.xlane.f32.xlu0 %v2147_v25 }
0x2a36   :  { %v2149_v60 = vpop.xlane.xlu0 %2148 }
0x2a37   :  { %v2150_v17 = vmul.f32 0.015625, %v2149_v60 }
0x2a39   :  { %v2151_v59 = vsub.f32 %v2147_v25, %v2150_v17 }
0x2a3b   :  { %v2152_v38 = vmul.f32 %v4211_v50, %v2151_v59 }
0x2a3d   :  { %v2153_v2 = vmul.f32 %v2152_v38, %v2152_v38 }
0x2a3f   :  { %2154 = vadd.xlane.f32.xlu1 %v2153_v2 }
0x2ab2   :  { %v2155_v36 = vpop.xlane.xlu1 %2154 }
0x2ab3   :  { %v2156_v1 = vmul.f32 0.015625, %v2155_v36 }
0x2ab5   :  { %v2157_v6 = vadd.f32 1e-05, %v2156_v1 }
0x2ab7   :  { %3171 = vrsqrt.f32 %v2157_v6  ;;  %vm2164_vm14 = vweird.f32 %v2157_v6 }
0x2abd   :  { %v3172_v15 = vpop.eup %3171 }
0x2abe   :  { %v2159_v12 = vmul.f32 %v3172_v15, %v2157_v6  ;;  %vm2165_vm13 = vweird.f32 %v3172_v15 }
0x2abf   :  { %vm2166_vm15 = vmor %vm2164_vm14, %vm2165_vm13 }
0x2ac0   :  { %v2160_v18 = vmul.f32 %v3172_v15, %v2159_v12 }
0x2ac2   :  { %v2161_v43 = vmul.f32 0.5, %v2160_v18 }
0x2ac4   :  { %v2162_v57 = vsub.f32 1.5, %v2161_v43 }
0x2ac6   :  { %v2163_v61 = vmul.f32 %v3172_v15, %v2162_v57 }
0x2ac8   :  { %v2167_v42 = vsel %vm2166_vm15, %v3172_v15, %v2163_v61 }
0x2ac9   :  { %v2168_v24 = vmul.f32 %v2167_v42, %v2152_v38 }
0x2acb   :  { %v2169_v23 = vmul.f32 %v4217_v37, %v2168_v24 }
0x2acd   :  { %v4309_v26 = vadd.f32 %v4223_v16, %v2169_v23 }
0x2acf   :  { %v4312_v4 = vmul.f32 0.33333334, %v4309_v26 }
0x2ad1   :  { %v2172_v9 = vadd.f32 %v4312_v4, %v4283_v58 }
0x2ad3   :  { %v2173_v52 = vpack.c.bf16 %v2172_v9, %v2172_v9 }
0x2ad5   :  { %2182 = vmatmul.bf16.vlgmr.msra.gmra.mxu0 %v2173_v52  ;;  %2195 = vmatmul.bf16.vlgmr.msrb.gmra.mxu1 %v2173_v52 }
0x2ad6   :  { %2483 = vmatpush.bf16.msra.mxu0 %v3330_v10  ;;  %2496 = vmatpush.bf16.msrb.mxu1 %v3310_v3 }
0x2ada   :  { %2484 = vmatpush.bf16.msra.mxu0 %v3339_v13  ;;  %2497 = vmatpush.bf16.msrb.mxu1 %v3316_v5 }
0x2ade   :  { %2485 = vmatpush.bf16.msra.mxu0 %v3358_v19  ;;  %2498 = vmatpush.bf16.msrb.mxu1 %v3343_v14 }
0x2ae2   :  { %2486 = vmatpush.bf16.msra.mxu0 %v3385_v27  ;;  %2499 = vmatpush.bf16.msrb.mxu1 %v3365_v21 }
0x2ae6   :  { %2487 = vmatpush.bf16.msra.mxu0 %v3405_v33  ;;  %2500 = vmatpush.bf16.msrb.mxu1 %v3389_v28 }
0x2aea   :  { %2488 = vmatpush.bf16.msra.mxu0 %v3425_v39  ;;  %2501 = vmatpush.bf16.msrb.mxu1 %v3409_v34 }
0x2aee   :  { %2489 = vmatpush.bf16.msra.mxu0 %v3445_v45  ;;  %2502 = vmatpush.bf16.msrb.mxu1 %v3429_v40 }
0x2af2   :  { %2490 = vmatpush.bf16.msra.mxu0 %v3459_v49  ;;  %2503 = vmatpush.bf16.msrb.mxu1 %v3449_v46 }
0x2b52   :  { %v2183_v20 = vpop.f32.mrf.mxu0  ;;  %v2196_v29 = vpop.f32.mrf.mxu1 }
0x2b53   :  { %v2904_v30 = vmul.f32 -1.442695, %v2196_v29  ;;  %v2200_v44 = vadd.f32 %v2183_v20, %v3656_v63 }
0x2b55   :  { %3173 = vpow2.f32 %v2904_v30 }
0x2b5a   :  { %v2185_v31 = vpop.f32.mrf.mxu0  ;;  %v2198_v35 = vpop.f32.mrf.mxu1 }
0x2b5b   :  { %v3174_v8 = vpop.eup %3173 }
0x2b5c   :  { %v2204_v47 = vadd.f32 1.0, %v3174_v8 }
0x2b5e   :  { %3175 = vrcp.f32 %v2204_v47  ;;  %v2216_v51 = vand.u32 2147483648, %v2204_v47  ;;  %v2214_v54 = vand.u32 2147483647, %v2204_v47  ;;  %vm2210_vm2 = vweird.f32 %v2204_v47 }
0x2b5f   :  { %3177 = vtanh.f32 %v2200_v44 }
0x2b60   :  { %v2217_v53 = vor.u32 1.1754944e-38, %v2216_v51  ;;  %vm2215_vm4 = vcmp.eq.f32.partialorder %v2214_v54, 8.507059e+37 }
0x2b64   :  { %v3176_v48 = vpop.eup %3175 }
0x2b65   :  { %v2206_v11 = vmul.f32 %v3176_v48, %v2204_v47  ;;  %vm2211_vm1 = vweird.f32 %v3176_v48  ;;  %v3178_v32 = vpop.eup %3177 }
0x2b66   :  { %vm2212_vm3 = vmor %vm2210_vm2, %vm2211_vm1 }
0x2b67   :  { %v2207_v62 = vsub.f32 1.0, %v2206_v11 }
0x2b69   :  { %v2208_v41 = vmul.f32 %v3176_v48, %v2207_v62 }
0x2b6b   :  { %v2209_v56 = vadd.f32 %v3176_v48, %v2208_v41 }
0x2b6d   :  { %v2213_v7 = vsel %vm2212_vm3, %v3176_v48, %v2209_v56 }
0x2b6e   :  { %v2218_v55 = vsel %vm2215_vm4, %v2217_v53, %v2213_v7 }
0x2b6f   :  { %v2221_v25 = vmul.f32 %v3178_v32, %v2218_v55 }
0x2b71   :  { %v2222_v60 = vsub.f32 %v2221_v25, %v2172_v9 }
0x2b73   :  { %v2223_v17 = vmul.f32 %v4205_v22, %v2222_v60 }
0x2b75   :  { %2224 = vadd.xlane.f32.xlu2 %v2223_v17 }
0x2be8   :  { %v2225_v59 = vpop.xlane.xlu2 %2224 }
0x2be9   :  { %v2226_v38 = vmul.f32 0.015625, %v2225_v59 }
0x2beb   :  { %v2227_v2 = vsub.f32 %v2223_v17, %v2226_v38 }
0x2bed   :  { %v2228_v36 = vmul.f32 %v4211_v50, %v2227_v2 }
0x2bef   :  { %v2229_v1 = vmul.f32 %v2228_v36, %v2228_v36 }
0x2bf1   :  { %2230 = vadd.xlane.f32.xlu0 %v2229_v1 }
0x2c64   :  { %v2231_v6 = vpop.xlane.xlu0 %2230 }
0x2c65   :  { %v2232_v15 = vmul.f32 0.015625, %v2231_v6 }
0x2c67   :  { %v2233_v12 = vadd.f32 1e-05, %v2232_v15 }
0x2c69   :  { %3179 = vrsqrt.f32 %v2233_v12  ;;  %vm2240_vm6 = vweird.f32 %v2233_v12 }
0x2c6f   :  { %v3180_v18 = vpop.eup %3179 }
0x2c70   :  { %v2235_v43 = vmul.f32 %v3180_v18, %v2233_v12  ;;  %vm2241_vm5 = vweird.f32 %v3180_v18 }
0x2c71   :  { %vm2242_vm0 = vmor %vm2240_vm6, %vm2241_vm5 }
0x2c72   :  { %v2236_v57 = vmul.f32 %v3180_v18, %v2235_v43 }
0x2c74   :  { %v2237_v61 = vmul.f32 0.5, %v2236_v57 }
0x2c76   :  { %v2238_v42 = vsub.f32 1.5, %v2237_v61 }
0x2c78   :  { %v2239_v24 = vmul.f32 %v3180_v18, %v2238_v42 }
0x2c7a   :  { %v2243_v23 = vsel %vm2242_vm0, %v3180_v18, %v2239_v24 }
0x2c7b   :  { %v2244_v9 = vmul.f32 %v2243_v23, %v2228_v36 }
0x2c7d   :  { %v2245_v52 = vmul.f32 %v4217_v37, %v2244_v9 }
0x2c7f   :  { %v4337_v20 = vadd.f32 %v4223_v16, %v2245_v52 }
0x2c81   :  { %v2247_v29 = vsub.f32 %v4337_v20, %v4312_v4 }
0x2c83   :  { %v2248_v30 = vadd.f32 %v2247_v29, %v4283_v58 }
0x2c85   :  { %v2249_v31 = vpack.c.bf16 %v2248_v30, %v2248_v30 }
0x2c87   :  { %2258 = vmatmul.bf16.vlgmr.msrb.gmra.mxu2 %v2249_v31  ;;  %2271 = vmatmul.bf16.vlgmr.msrb.gmra.mxu3 %v2249_v31  ;;  %v2323_v31 = vsub.f32 %v4309_v26, %v4337_v20 }
0x2c88   :  { %2559 = vmatpush.bf16.msrb.mxu2 %v3330_v10  ;;  %2572 = vmatpush.bf16.msrb.mxu3 %v3310_v3 }
0x2c8c   :  { %2560 = vmatpush.bf16.msrb.mxu2 %v3339_v13  ;;  %2573 = vmatpush.bf16.msrb.mxu3 %v3316_v5 }
0x2c90   :  { %2561 = vmatpush.bf16.msrb.mxu2 %v3358_v19  ;;  %2574 = vmatpush.bf16.msrb.mxu3 %v3343_v14 }
0x2c94   :  { %2562 = vmatpush.bf16.msrb.mxu2 %v3385_v27  ;;  %2575 = vmatpush.bf16.msrb.mxu3 %v3365_v21 }
0x2c98   :  { %2563 = vmatpush.bf16.msrb.mxu2 %v3405_v33  ;;  %2576 = vmatpush.bf16.msrb.mxu3 %v3389_v28 }
0x2c9c   :  { %2564 = vmatpush.bf16.msrb.mxu2 %v3425_v39  ;;  %2577 = vmatpush.bf16.msrb.mxu3 %v3409_v34 }
0x2ca0   :  { %2565 = vmatpush.bf16.msrb.mxu2 %v3445_v45  ;;  %2578 = vmatpush.bf16.msrb.mxu3 %v3429_v40 }
0x2ca4   :  { %2566 = vmatpush.bf16.msrb.mxu2 %v3459_v49  ;;  %2579 = vmatpush.bf16.msrb.mxu3 %v3449_v46 }
0x2d0a   :  { %v2259_v4 = vpop.f32.mrf.mxu2  ;;  %v2272_v35 = vpop.f32.mrf.mxu3 }
0x2d0b   :  { %v2905_v8 = vmul.f32 -1.442695, %v2272_v35  ;;  %v2276_v51 = vadd.f32 %v2259_v4, %v3656_v63 }
0x2d0d   :  { %3181 = vpow2.f32 %v2905_v8 }
0x2d12   :  { %v2261_v47 = vpop.f32.mrf.mxu2  ;;  %v2274_v48 = vpop.f32.mrf.mxu3 }
0x2d13   :  { %v3182_v44 = vpop.eup %3181 }
0x2d14   :  { %v2280_v11 = vadd.f32 1.0, %v3182_v44 }
0x2d16   :  { %3183 = vrcp.f32 %v2280_v11  ;;  %v2292_v56 = vand.u32 2147483648, %v2280_v11  ;;  %v2290_v7 = vand.u32 2147483647, %v2280_v11  ;;  %vm2286_vm8 = vweird.f32 %v2280_v11 }
0x2d17   :  { %3185 = vtanh.f32 %v2276_v51 }
0x2d18   :  { %v2293_v55 = vor.u32 1.1754944e-38, %v2292_v56  ;;  %vm2291_vm10 = vcmp.eq.f32.partialorder %v2290_v7, 8.507059e+37 }
0x2d1c   :  { %v3184_v62 = vpop.eup %3183 }
0x2d1d   :  { %v2282_v41 = vmul.f32 %v3184_v62, %v2280_v11  ;;  %vm2287_vm7 = vweird.f32 %v3184_v62  ;;  %v3186_v60 = vpop.eup %3185 }
0x2d1e   :  { %vm2288_vm9 = vmor %vm2286_vm8, %vm2287_vm7 }
0x2d1f   :  { %v2283_v54 = vsub.f32 1.0, %v2282_v41 }
0x2d21   :  { %v2284_v53 = vmul.f32 %v3184_v62, %v2283_v54 }
0x2d23   :  { %v2285_v32 = vadd.f32 %v3184_v62, %v2284_v53 }
0x2d25   :  { %v2289_v25 = vsel %vm2288_vm9, %v3184_v62, %v2285_v32 }
0x2d26   :  { %v2294_v17 = vsel %vm2291_vm10, %v2293_v55, %v2289_v25 }
0x2d27   :  { %v2297_v59 = vmul.f32 %v3186_v60, %v2294_v17 }
0x2d29   :  { %v2298_v38 = vsub.f32 %v2297_v59, %v2248_v30 }
0x2d2b   :  { %v2299_v2 = vmul.f32 %v4205_v22, %v2298_v38 }
0x2d2d   :  { %2300 = vadd.xlane.f32.xlu1 %v2299_v2 }
0x2da0   :  { %v2301_v63 = vpop.xlane.xlu1 %2300 }
0x2da1   :  { %v2302_v36 = vmul.f32 0.015625, %v2301_v63 }
0x2da3   :  { %v2303_v1 = vsub.f32 %v2299_v2, %v2302_v36 }
0x2da5   :  { %v2304_v6 = vmul.f32 %v4211_v50, %v2303_v1 }
0x2da7   :  { %v2305_v15 = vmul.f32 %v2304_v6, %v2304_v6 }
0x2da9   :  { %2306 = vadd.xlane.f32.xlu2 %v2305_v15 }
0x2e1c   :  { %v2307_v12 = vpop.xlane.xlu2 %2306 }
0x2e1d   :  { %v2308_v18 = vmul.f32 0.015625, %v2307_v12 }
0x2e1f   :  { %v2309_v43 = vadd.f32 1e-05, %v2308_v18 }
0x2e21   :  { %3187 = vrsqrt.f32 %v2309_v43  ;;  %vm2316_vm12 = vweird.f32 %v2309_v43 }
0x2e27   :  { %v3188_v57 = vpop.eup %3187 }
0x2e28   :  { %v2311_v61 = vmul.f32 %v3188_v57, %v2309_v43  ;;  %vm2317_vm11 = vweird.f32 %v3188_v57 }
0x2e29   :  { %vm2318_vm13 = vmor %vm2316_vm12, %vm2317_vm11 }
0x2e2a   :  { %v2312_v42 = vmul.f32 %v3188_v57, %v2311_v61 }
0x2e2c   :  { %v2313_v24 = vmul.f32 0.5, %v2312_v42 }
0x2e2e   :  { %v2314_v23 = vsub.f32 1.5, %v2313_v24 }
0x2e30   :  { %v2315_v9 = vmul.f32 %v3188_v57, %v2314_v23 }
0x2e32   :  { %v2319_v52 = vsel %vm2318_vm13, %v3188_v57, %v2315_v9 }
0x2e33   :  { %v2320_v29 = vmul.f32 %v2319_v52, %v2304_v6 }
0x2e35   :  { %v2321_v30 = vmul.f32 %v4217_v37, %v2320_v29 }
0x2e37   :  { %v4365_v4 = vadd.f32 %v4223_v16, %v2321_v30 }
0x2e39   :  { %v2324_v35 = vadd.f32 %v2323_v31, %v4365_v4 }
0x2e3b   :  { %v2325_v8 = vadd.f32 %v2324_v35, %v4283_v58 }
0x2e3d   :  { %v2326_v47 = vpack.c.bf16 %v2325_v8, %v2325_v8 }
0x2e3f   :  { %2335 = vmatmul.bf16.vlgmr.msrb.gmra.mxu0 %v2326_v47  ;;  %2348 = vmatmul.bf16.vlgmr.msra.gmra.mxu1 %v2326_v47 }
0x2e40   :  { %2636 = vmatpush.bf16.msrb.mxu0 %v3330_v10  ;;  %2649 = vmatpush.bf16.msra.mxu1 %v3310_v3 }
0x2e44   :  { %2637 = vmatpush.bf16.msrb.mxu0 %v3339_v13  ;;  %2650 = vmatpush.bf16.msra.mxu1 %v3316_v5 }
0x2e48   :  { %2638 = vmatpush.bf16.msrb.mxu0 %v3358_v19  ;;  %2651 = vmatpush.bf16.msra.mxu1 %v3343_v14 }
0x2e4c   :  { %2639 = vmatpush.bf16.msrb.mxu0 %v3385_v27  ;;  %2652 = vmatpush.bf16.msra.mxu1 %v3365_v21 }
0x2e50   :  { %2640 = vmatpush.bf16.msrb.mxu0 %v3405_v33  ;;  %2653 = vmatpush.bf16.msra.mxu1 %v3389_v28 }
0x2e54   :  { %2641 = vmatpush.bf16.msrb.mxu0 %v3425_v39  ;;  %2654 = vmatpush.bf16.msra.mxu1 %v3409_v34 }
0x2e58   :  { %2642 = vmatpush.bf16.msrb.mxu0 %v3445_v45  ;;  %2655 = vmatpush.bf16.msra.mxu1 %v3429_v40 }
0x2e5c   :  { %2643 = vmatpush.bf16.msrb.mxu0 %v3459_v49  ;;  %2656 = vmatpush.bf16.msra.mxu1 %v3449_v46 }
0x2ebc   :  { %v2336_v3 = vpop.f32.mrf.mxu0  ;;  %v2349_v5 = vpop.f32.mrf.mxu1 }
0x2ebd   :  { %v2906_v10 = vmul.f32 -1.442695, %v2349_v5  ;;  %v2353_v28 = vadd.f32 %v2336_v3, %v3658_v0 }
0x2ebf   :  { %3189 = vpow2.f32 %v2906_v10 }
0x2ec4   :  { %v2338_v13 = vpop.f32.mrf.mxu0  ;;  %v2351_v14 = vpop.f32.mrf.mxu1 }
0x2ec5   :  { %v3190_v19 = vpop.eup %3189 }
0x2ec6   :  { %v2357_v21 = vadd.f32 1.0, %v3190_v19  ;;  %v4403_v19 = vld [vmem:[%s4493_s3] ss:$0 sm:$0xff] }
0x2ec8   :  { %3191 = vrcp.f32 %v2357_v21  ;;  %v2369_v39 = vand.u32 2147483648, %v2357_v21  ;;  %v2367_v45 = vand.u32 2147483647, %v2357_v21  ;;  %vm2363_vm15 = vweird.f32 %v2357_v21 }
0x2ec9   :  { %3193 = vtanh.f32 %v2353_v28 }
0x2eca   :  { %v2370_v49 = vor.u32 1.1754944e-38, %v2369_v39  ;;  %vm2368_vm2 = vcmp.eq.f32.partialorder %v2367_v45, 8.507059e+37 }
0x2ece   :  { %v3192_v27 = vpop.eup %3191 }
0x2ecf   :  { %v2359_v33 = vmul.f32 %v3192_v27, %v2357_v21  ;;  %vm2364_vm14 = vweird.f32 %v3192_v27  ;;  %v3194_v44 = vpop.eup %3193 }
0x2ed0   :  { %vm2365_vm1 = vmor %vm2363_vm15, %vm2364_vm14 }
0x2ed1   :  { %v2360_v34 = vsub.f32 1.0, %v2359_v33 }
0x2ed3   :  { %v2361_v40 = vmul.f32 %v3192_v27, %v2360_v34  ;;  %v4409_v34 = vld [vmem:[%s4494_s6] ss:$0 sm:$0xff] }
0x2ed5   :  { %v2362_v46 = vadd.f32 %v3192_v27, %v2361_v40 }
0x2ed7   :  { %v2366_v48 = vsel %vm2365_vm1, %v3192_v27, %v2362_v46 }
0x2ed8   :  { %v2371_v11 = vsel %vm2368_vm2, %v2370_v49, %v2366_v48 }
0x2ed9   :  { %v2374_v62 = vmul.f32 %v3194_v44, %v2371_v11 }
0x2edb   :  { %v2375_v51 = vsub.f32 %v2374_v62, %v2325_v8 }
0x2edd   :  { %v2376_v41 = vmul.f32 %v4205_v22, %v2375_v51  ;;  %v2400_v22 = vadd.f32 %v4365_v4, %v4337_v20 }
0x2edf   :  { %2377 = vadd.xlane.f32.xlu0 %v2376_v41 }
0x2f52   :  { %v2378_v54 = vpop.xlane.xlu0 %2377 }
0x2f53   :  { %v2379_v56 = vmul.f32 0.015625, %v2378_v54 }
0x2f55   :  { %v2380_v53 = vsub.f32 %v2376_v41, %v2379_v56 }
0x2f57   :  { %v2381_v7 = vmul.f32 %v4211_v50, %v2380_v53  ;;  %v2401_v50 = vmul.f32 3.0, %v2400_v22  ;;  %v4415_v53 = vld [vmem:[%s4495_s4] ss:$0 sm:$0xff] }
0x2f59   :  { %v2382_v32 = vmul.f32 %v2381_v7, %v2381_v7  ;;  %v2402_v12 = vadd.f32 %v2401_v50, %v4309_v26 }
0x2f5b   :  { %2383 = vadd.xlane.f32.xlu1 %v2382_v32  ;;  %v4421_v32 = vld [vmem:[%s4496_s5] ss:$0 sm:$0xff] }
0x2fce   :  { %v2384_v55 = vpop.xlane.xlu1 %2383 }
0x2fcf   :  { %v2385_v25 = vmul.f32 0.015625, %v2384_v55 }
0x2fd1   :  { %v2386_v60 = vadd.f32 1e-05, %v2385_v25 }
0x2fd3   :  { %3195 = vrsqrt.f32 %v2386_v60  ;;  %vm2393_vm4 = vweird.f32 %v2386_v60 }
0x2fd9   :  { %v3196_v17 = vpop.eup %3195 }
0x2fda   :  { %v2388_v59 = vmul.f32 %v3196_v17, %v2386_v60  ;;  %vm2394_vm3 = vweird.f32 %v3196_v17 }
0x2fdb   :  { %vm2395_vm5 = vmor %vm2393_vm4, %vm2394_vm3 }
0x2fdc   :  { %v2389_v38 = vmul.f32 %v3196_v17, %v2388_v59 }
0x2fde   :  { %v2390_v2 = vmul.f32 0.5, %v2389_v38 }
0x2fe0   :  { %v2391_v63 = vsub.f32 1.5, %v2390_v2 }
0x2fe2   :  { %v2392_v36 = vmul.f32 %v3196_v17, %v2391_v63 }
0x2fe4   :  { %v2396_v1 = vsel %vm2395_vm5, %v3196_v17, %v2392_v36 }
0x2fe5   :  { %v2397_v6 = vmul.f32 %v2396_v1, %v2381_v7 }
0x2fe7   :  { %v2398_v15 = vmul.f32 %v4217_v37, %v2397_v6 }
0x2fe9   :  { %v2399_v18 = vadd.f32 %v4223_v16, %v2398_v15 }
0x2feb   :  { %v2403_v43 = vadd.f32 %v2402_v12, %v2399_v18 }
0x2fed   :  { %v2404_v57 = vmul.f32 0.125, %v2403_v43 }
0x2fef   :  { %v4394_v61 = vadd.f32 %v2404_v57, %v4283_v58 }
0x2ff1   :  { %v2406_v20 = vpack.c.bf16 %v4394_v61, %v4394_v61 }
0x2ff3   :  { %2415 = vmatmul.bf16.vlgmr.msra.gmra.mxu2 %v2406_v20  ;;  %2428 = vmatmul.bf16.vlgmr.msra.gmra.mxu3 %v2406_v20 }
0x3076   :  { %v2416_v42 = vpop.f32.mrf.mxu2  ;;  %v2429_v24 = vpop.f32.mrf.mxu3 }
0x3077   :  { %v2907_v23 = vmul.f32 -1.442695, %v2429_v24  ;;  %v2433_v29 = vadd.f32 %v2416_v42, %v3658_v0 }
0x3079   :  { %3197 = vpow2.f32 %v2907_v23 }
0x307e   :  { %v2418_v9 = vpop.f32.mrf.mxu2  ;;  %v2431_v37 = vpop.f32.mrf.mxu3 }
0x307f   :  { %v3198_v52 = vpop.eup %3197 }
0x3080   :  { %v2437_v26 = vadd.f32 1.0, %v3198_v52 }
0x3082   :  { %3199 = vrcp.f32 %v2437_v26  ;;  %v2449_v31 = vand.u32 2147483648, %v2437_v26  ;;  %v2447_v35 = vand.u32 2147483647, %v2437_v26  ;;  %vm2443_vm0 = vweird.f32 %v2437_v26 }
0x3083   :  { %3201 = vtanh.f32 %v2433_v29 }
0x3084   :  { %v2450_v47 = vor.u32 1.1754944e-38, %v2449_v31  ;;  %vm2448_vm8 = vcmp.eq.f32.partialorder %v2447_v35, 8.507059e+37 }
0x3088   :  { %v3200_v16 = vpop.eup %3199 }
0x3089   :  { %v2439_v30 = vmul.f32 %v3200_v16, %v2437_v26  ;;  %vm2444_vm6 = vweird.f32 %v3200_v16  ;;  %v3202_v5 = vpop.eup %3201 }
0x308a   :  { %vm2445_vm7 = vmor %vm2443_vm0, %vm2444_vm6 }
0x308b   :  { %v2440_v58 = vsub.f32 1.0, %v2439_v30 }
0x308d   :  { %v2441_v4 = vmul.f32 %v3200_v16, %v2440_v58 }
0x308f   :  { %v2442_v8 = vadd.f32 %v3200_v16, %v2441_v4 }
0x3091   :  { %v2446_v3 = vsel %vm2445_vm7, %v3200_v16, %v2442_v8 }
0x3092   :  { %v2451_v10 = vsel %vm2448_vm8, %v2450_v47, %v2446_v3 }
0x3093   :  { %v2454_v13 = vmul.f32 %v3202_v5, %v2451_v10 }
0x3095   :  { %v2455_v14 = vsub.f32 %v2454_v13, %v4394_v61 }
0x3097   :  { %v2456_v21 = vmul.f32 %v4403_v19, %v2455_v14 }
0x3099   :  { %2457 = vadd.xlane.f32.xlu2 %v2456_v21 }
0x310c   :  { %v2458_v27 = vpop.xlane.xlu2 %2457 }
0x310d   :  { %v2459_v28 = vmul.f32 0.015625, %v2458_v27 }
0x310f   :  { %v2460_v33 = vsub.f32 %v2456_v21, %v2459_v28 }
0x3111   :  { %v2461_v39 = vmul.f32 %v4409_v34, %v2460_v33 }
0x3113   :  { %v2462_v40 = vmul.f32 %v2461_v39, %v2461_v39 }
0x3115   :  { %2463 = vadd.xlane.f32.xlu0 %v2462_v40 }
0x3188   :  { %v2464_v45 = vpop.xlane.xlu0 %2463 }
0x3189   :  { %v2465_v46 = vmul.f32 0.015625, %v2464_v45 }
0x318b   :  { %v2466_v49 = vadd.f32 1e-05, %v2465_v46 }
0x318d   :  { %3203 = vrsqrt.f32 %v2466_v49  ;;  %vm2473_vm10 = vweird.f32 %v2466_v49 }
0x3193   :  { %v3204_v48 = vpop.eup %3203 }
0x3194   :  { %v2468_v44 = vmul.f32 %v3204_v48, %v2466_v49  ;;  %vm2474_vm9 = vweird.f32 %v3204_v48 }
0x3195   :  { %vm2475_vm11 = vmor %vm2473_vm10, %vm2474_vm9 }
0x3196   :  { %v2469_v11 = vmul.f32 %v3204_v48, %v2468_v44 }
0x3198   :  { %v2470_v62 = vmul.f32 0.5, %v2469_v11 }
0x319a   :  { %v2471_v51 = vsub.f32 1.5, %v2470_v62 }
0x319c   :  { %v2472_v41 = vmul.f32 %v3204_v48, %v2471_v51 }
0x319e   :  { %v2476_v54 = vsel %vm2475_vm11, %v3204_v48, %v2472_v41 }
0x319f   :  { %v2477_v56 = vmul.f32 %v2476_v54, %v2461_v39 }
0x31a1   :  { %v2478_v7 = vmul.f32 %v4415_v53, %v2477_v56 }
0x31a3   :  { %v4424_v55 = vadd.f32 %v4421_v32, %v2478_v7 }
0x31a5   :  { %v2480_v25 = vmul.f32 0.33333334, %v4424_v55 }
0x31a7   :  { %v2481_v60 = vadd.f32 %v2480_v25, %v4394_v61 }
0x31a9   :  { %v2482_v17 = vpack.c.bf16 %v2481_v60, %v2481_v60 }
0x31ab   :  { %2491 = vmatmul.bf16.vlgmr.msra.gmra.mxu0 %v2482_v17  ;;  %2504 = vmatmul.bf16.vlgmr.msrb.gmra.mxu1 %v2482_v17 }
0x3228   :  { %v2492_v59 = vpop.f32.mrf.mxu0  ;;  %v2505_v38 = vpop.f32.mrf.mxu1 }
0x3229   :  { %v2908_v2 = vmul.f32 -1.442695, %v2505_v38  ;;  %v2509_v6 = vadd.f32 %v2492_v59, %v3658_v0 }
0x322b   :  { %3205 = vpow2.f32 %v2908_v2 }
0x3230   :  { %v2494_v63 = vpop.f32.mrf.mxu0  ;;  %v2507_v22 = vpop.f32.mrf.mxu1 }
0x3231   :  { %v3206_v36 = vpop.eup %3205 }
0x3232   :  { %v2513_v1 = vadd.f32 1.0, %v3206_v36 }
0x3234   :  { %3207 = vrcp.f32 %v2513_v1  ;;  %v2525_v18 = vand.u32 2147483648, %v2513_v1  ;;  %v2523_v57 = vand.u32 2147483647, %v2513_v1  ;;  %vm2519_vm13 = vweird.f32 %v2513_v1 }
0x3235   :  { %3209 = vtanh.f32 %v2509_v6 }
0x3236   :  { %v2526_v42 = vor.u32 1.1754944e-38, %v2525_v18  ;;  %vm2524_vm15 = vcmp.eq.f32.partialorder %v2523_v57, 8.507059e+37 }
0x323a   :  { %v3208_v50 = vpop.eup %3207 }
0x323b   :  { %v2515_v15 = vmul.f32 %v3208_v50, %v2513_v1  ;;  %vm2520_vm12 = vweird.f32 %v3208_v50  ;;  %v3210_v23 = vpop.eup %3209 }
0x323c   :  { %vm2521_vm14 = vmor %vm2519_vm13, %vm2520_vm12 }
0x323d   :  { %v2516_v12 = vsub.f32 1.0, %v2515_v15 }
0x323f   :  { %v2517_v43 = vmul.f32 %v3208_v50, %v2516_v12 }
0x3241   :  { %v2518_v20 = vadd.f32 %v3208_v50, %v2517_v43 }
0x3243   :  { %v2522_v24 = vsel %vm2521_vm14, %v3208_v50, %v2518_v20 }
0x3244   :  { %v2527_v9 = vsel %vm2524_vm15, %v2526_v42, %v2522_v24 }
0x3245   :  { %v2530_v37 = vmul.f32 %v3210_v23, %v2527_v9 }
0x3247   :  { %v2531_v52 = vsub.f32 %v2530_v37, %v2481_v60 }
0x3249   :  { %v2532_v26 = vmul.f32 %v4403_v19, %v2531_v52 }
0x324b   :  { %2533 = vadd.xlane.f32.xlu1 %v2532_v26 }
0x32be   :  { %v2534_v16 = vpop.xlane.xlu1 %2533 }
0x32bf   :  { %v2535_v29 = vmul.f32 0.015625, %v2534_v16 }
0x32c1   :  { %v2536_v30 = vsub.f32 %v2532_v26, %v2535_v29 }
0x32c3   :  { %v2537_v58 = vmul.f32 %v4409_v34, %v2536_v30 }
0x32c5   :  { %v2538_v31 = vmul.f32 %v2537_v58, %v2537_v58 }
0x32c7   :  { %2539 = vadd.xlane.f32.xlu2 %v2538_v31 }
0x333a   :  { %v2540_v4 = vpop.xlane.xlu2 %2539 }
0x333b   :  { %v2541_v35 = vmul.f32 0.015625, %v2540_v4 }
0x333d   :  { %v2542_v8 = vadd.f32 1e-05, %v2541_v35 }
0x333f   :  { %3211 = vrsqrt.f32 %v2542_v8  ;;  %vm2549_vm2 = vweird.f32 %v2542_v8 }
0x3345   :  { %v3212_v47 = vpop.eup %3211 }
0x3346   :  { %v2544_v3 = vmul.f32 %v3212_v47, %v2542_v8  ;;  %vm2550_vm1 = vweird.f32 %v3212_v47 }
0x3347   :  { %vm2551_vm3 = vmor %vm2549_vm2, %vm2550_vm1 }
0x3348   :  { %v2545_v5 = vmul.f32 %v3212_v47, %v2544_v3 }
0x334a   :  { %v2546_v10 = vmul.f32 0.5, %v2545_v5 }
0x334c   :  { %v2547_v13 = vsub.f32 1.5, %v2546_v10 }
0x334e   :  { %v2548_v14 = vmul.f32 %v3212_v47, %v2547_v13 }
0x3350   :  { %v2552_v21 = vsel %vm2551_vm3, %v3212_v47, %v2548_v14 }
0x3351   :  { %v2553_v27 = vmul.f32 %v2552_v21, %v2537_v58 }
0x3353   :  { %v2554_v28 = vmul.f32 %v4415_v53, %v2553_v27 }
0x3355   :  { %v4433_v33 = vadd.f32 %v4421_v32, %v2554_v28 }
0x3357   :  { %v2556_v39 = vsub.f32 %v4433_v33, %v2480_v25  ;;  %v2632_v58 = vsub.f32 %v4424_v55, %v4433_v33 }
0x3359   :  { %v2557_v40 = vadd.f32 %v2556_v39, %v4394_v61 }
0x335b   :  { %v2558_v45 = vpack.c.bf16 %v2557_v40, %v2557_v40 }
0x335d   :  { %2567 = vmatmul.bf16.vlgmr.msrb.gmra.mxu2 %v2558_v45  ;;  %2580 = vmatmul.bf16.vlgmr.msrb.gmra.mxu3 %v2558_v45 }
0x33e0   :  { %v2568_v46 = vpop.f32.mrf.mxu2  ;;  %v2581_v49 = vpop.f32.mrf.mxu3 }
0x33e1   :  { %v2909_v48 = vmul.f32 -1.442695, %v2581_v49  ;;  %v2585_v54 = vadd.f32 %v2568_v46, %v3658_v0 }
0x33e3   :  { %3213 = vpow2.f32 %v2909_v48 }
0x33e8   :  { %v2570_v44 = vpop.f32.mrf.mxu2  ;;  %v2583_v11 = vpop.f32.mrf.mxu3 }
0x33e9   :  { %v3214_v62 = vpop.eup %3213 }
0x33ea   :  { %v2589_v51 = vadd.f32 1.0, %v3214_v62 }
0x33ec   :  { %3215 = vrcp.f32 %v2589_v51  ;;  %v2601_v25 = vand.u32 2147483648, %v2589_v51  ;;  %v2599_v17 = vand.u32 2147483647, %v2589_v51  ;;  %vm2595_vm5 = vweird.f32 %v2589_v51 }
0x33ed   :  { %3217 = vtanh.f32 %v2585_v54 }
0x33ee   :  { %v2602_v38 = vor.u32 1.1754944e-38, %v2601_v25  ;;  %vm2600_vm0 = vcmp.eq.f32.partialorder %v2599_v17, 8.507059e+37 }
0x33f2   :  { %v3216_v41 = vpop.eup %3215 }
0x33f3   :  { %v2591_v56 = vmul.f32 %v3216_v41, %v2589_v51  ;;  %vm2596_vm4 = vweird.f32 %v3216_v41  ;;  %v3218_v63 = vpop.eup %3217 }
0x33f4   :  { %vm2597_vm6 = vmor %vm2595_vm5, %vm2596_vm4 }
0x33f5   :  { %v2592_v7 = vsub.f32 1.0, %v2591_v56 }
0x33f7   :  { %v2593_v60 = vmul.f32 %v3216_v41, %v2592_v7 }
0x33f9   :  { %v2594_v59 = vadd.f32 %v3216_v41, %v2593_v60 }
0x33fb   :  { %v2598_v2 = vsel %vm2597_vm6, %v3216_v41, %v2594_v59  ;;  %v2966_v59 = vld [vmem:[%s4498_s7 + $0x38] sm:$0xff] }
0x33fc   :  { %v2603_v22 = vsel %vm2600_vm0, %v2602_v38, %v2598_v2  ;;  %2785 = vmatpush.bf16.msra.mxu2 %v2966_v59  ;;  %v2965_v38 = vld [vmem:[%s4498_s7 + $0x30] sm:$0xff]  ;;  %v2962_v2 = vld [vmem:[%s4498_s7 + $0x18] sm:$0xff] }
0x33fd   :  { %v2606_v36 = vmul.f32 %v3218_v63, %v2603_v22  ;;  %v2961_v63 = vld [vmem:[%s4498_s7 + $0x10] sm:$0xff]  ;;  %v2960_v22 = vld [vmem:[%s4498_s7 + $0x8] sm:$0xff] }
0x33ff   :  { %v2607_v1 = vsub.f32 %v2606_v36, %v2557_v40  ;;  %v2959_v36 = vld [vmem:[%s4498_s7] sm:$0xff] }
0x3400   :  { %2786 = vmatpush.bf16.msra.mxu2 %v2965_v38 }
0x3401   :  { %v2608_v50 = vmul.f32 %v4403_v19, %v2607_v1 }
0x3403   :  { %2609 = vadd.xlane.f32.xlu0 %v2608_v50 }
0x3476   :  { %v2610_v6 = vpop.xlane.xlu0 %2609 }
0x3477   :  { %v2611_v15 = vmul.f32 0.015625, %v2610_v6 }
0x3479   :  { %v2612_v12 = vsub.f32 %v2608_v50, %v2611_v15 }
0x347b   :  { %v2613_v18 = vmul.f32 %v4409_v34, %v2612_v12 }
0x347d   :  { %v2614_v43 = vmul.f32 %v2613_v18, %v2613_v18 }
0x347f   :  { %2615 = vadd.xlane.f32.xlu1 %v2614_v43 }
0x34f2   :  { %v2616_v57 = vpop.xlane.xlu1 %2615 }
0x34f3   :  { %v2617_v20 = vmul.f32 0.015625, %v2616_v57 }
0x34f5   :  { %v2618_v42 = vadd.f32 1e-05, %v2617_v20 }
0x34f7   :  { %3219 = vrsqrt.f32 %v2618_v42  ;;  %vm2625_vm8 = vweird.f32 %v2618_v42 }
0x34fd   :  { %v3220_v24 = vpop.eup %3219 }
0x34fe   :  { %v2620_v23 = vmul.f32 %v3220_v24, %v2618_v42  ;;  %vm2626_vm7 = vweird.f32 %v3220_v24 }
0x34ff   :  { %vm2627_vm9 = vmor %vm2625_vm8, %vm2626_vm7 }
0x3500   :  { %v2621_v9 = vmul.f32 %v3220_v24, %v2620_v23 }
0x3502   :  { %v2622_v37 = vmul.f32 0.5, %v2621_v9 }
0x3504   :  { %v2623_v52 = vsub.f32 1.5, %v2622_v37 }
0x3506   :  { %v2624_v26 = vmul.f32 %v3220_v24, %v2623_v52 }
0x3508   :  { %v2628_v16 = vsel %vm2627_vm9, %v3220_v24, %v2624_v26 }
0x3509   :  { %v2629_v29 = vmul.f32 %v2628_v16, %v2613_v18 }
0x350b   :  { %v2630_v30 = vmul.f32 %v4415_v53, %v2629_v29 }
0x350d   :  { %v4444_v31 = vadd.f32 %v4421_v32, %v2630_v30 }
0x350f   :  { %v2633_v4 = vadd.f32 %v2632_v58, %v4444_v31  ;;  %v2709_v20 = vadd.f32 %v4444_v31, %v4433_v33  ;;  %v2972_v58 = vld [vmem:[%s4497_s8] ss:$0 sm:$0xff] }
0x3511   :  { %v2634_v35 = vadd.f32 %v2633_v4, %v4394_v61  ;;  %v2710_v23 = vmul.f32 3.0, %v2709_v20 }
0x3513   :  { %v2635_v8 = vpack.c.bf16 %v2634_v35, %v2634_v35  ;;  %v2711_v52 = vadd.f32 %v2710_v23, %v4424_v55 }
0x3515   :  { %2644 = vmatmul.bf16.vlgmr.msrb.gmra.mxu0 %v2635_v8  ;;  %2657 = vmatmul.bf16.vlgmr.msra.gmra.mxu1 %v2635_v8 }
0x3592   :  { %v2645_v47 = vpop.f32.mrf.mxu0  ;;  %v2658_v3 = vpop.f32.mrf.mxu1 }
0x3593   :  { %v2910_v5 = vmul.f32 -1.442695, %v2658_v3  ;;  %v2662_v28 = vadd.f32 %v2645_v47, %v3658_v0 }
0x3595   :  { %3221 = vpow2.f32 %v2910_v5 }
0x359a   :  { %v2647_v10 = vpop.f32.mrf.mxu0  ;;  %v2660_v13 = vpop.f32.mrf.mxu1 }
0x359b   :  { %v3222_v14 = vpop.eup %3221 }
0x359c   :  { %v2666_v21 = vadd.f32 1.0, %v3222_v14 }
0x359e   :  { %3223 = vrcp.f32 %v2666_v21  ;;  %v2678_v45 = vand.u32 2147483648, %v2666_v21  ;;  %v2676_v49 = vand.u32 2147483647, %v2666_v21  ;;  %vm2672_vm11 = vweird.f32 %v2666_v21 }
0x359f   :  { %3225 = vtanh.f32 %v2662_v28 }
0x35a0   :  { %v2679_v44 = vor.u32 1.1754944e-38, %v2678_v45  ;;  %vm2677_vm13 = vcmp.eq.f32.partialorder %v2676_v49, 8.507059e+37 }
0x35a4   :  { %v3224_v27 = vpop.eup %3223 }
0x35a5   :  { %v2668_v39 = vmul.f32 %v3224_v27, %v2666_v21  ;;  %vm2673_vm10 = vweird.f32 %v3224_v27  ;;  %v3226_v62 = vpop.eup %3225 }
0x35a6   :  { %vm2674_vm12 = vmor %vm2672_vm11, %vm2673_vm10 }
0x35a7   :  { %v2669_v40 = vsub.f32 1.0, %v2668_v39 }
0x35a9   :  { %v2670_v46 = vmul.f32 %v3224_v27, %v2669_v40 }
0x35ab   :  { %v2671_v48 = vadd.f32 %v3224_v27, %v2670_v46 }
0x35ad   :  { %v2675_v11 = vsel %vm2674_vm12, %v3224_v27, %v2671_v48 }
0x35ae   :  { %v2680_v51 = vsel %vm2677_vm13, %v2679_v44, %v2675_v11 }
0x35af   :  { %v2683_v41 = vmul.f32 %v3226_v62, %v2680_v51 }
0x35b1   :  { %v2684_v54 = vsub.f32 %v2683_v41, %v2634_v35 }
0x35b3   :  { %v2685_v56 = vmul.f32 %v4403_v19, %v2684_v54  ;;  %v2964_v19 = vld [vmem:[%s4498_s7 + $0x28] sm:$0xff] }
0x35b4   :  { %2787 = vmatpush.bf16.msra.mxu2 %v2964_v19 }
0x35b5   :  { %2686 = vadd.xlane.f32.xlu2 %v2685_v56 }
0x3628   :  { %v2687_v0 = vpop.xlane.xlu2 %2686 }
0x3629   :  { %v2688_v7 = vmul.f32 0.015625, %v2687_v0 }
0x362b   :  { %v2689_v25 = vsub.f32 %v2685_v56, %v2688_v7 }
0x362d   :  { %v2690_v60 = vmul.f32 %v4409_v34, %v2689_v25  ;;  %v2963_v34 = vld [vmem:[%s4498_s7 + $0x20] sm:$0xff] }
0x362e   :  { %2788 = vmatpush.bf16.msra.mxu2 %v2963_v34 }
0x362f   :  { %v2691_v17 = vmul.f32 %v2690_v60, %v2690_v60 }
0x3631   :  { %2692 = vadd.xlane.f32.xlu0 %v2691_v17 }
0x3632   :  { %2789 = vmatpush.bf16.msra.mxu2 %v2962_v2 }
0x3636   :  { %2790 = vmatpush.bf16.msra.mxu2 %v2961_v63 }
0x363a   :  { %2791 = vmatpush.bf16.msra.mxu2 %v2960_v22 }
0x363e   :  { %2792 = vmatpush.bf16.msra.mxu2 %v2959_v36 }
0x36a4   :  { %v2693_v1 = vpop.xlane.xlu0 %2692 }
0x36a5   :  { %v2694_v50 = vmul.f32 0.015625, %v2693_v1 }
0x36a7   :  { %v2695_v6 = vadd.f32 1e-05, %v2694_v50 }
0x36a9   :  { %3227 = vrsqrt.f32 %v2695_v6  ;;  %vm2702_vm15 = vweird.f32 %v2695_v6 }
0x36af   :  { %v3228_v15 = vpop.eup %3227 }
0x36b0   :  { %v2697_v12 = vmul.f32 %v3228_v15, %v2695_v6  ;;  %vm2703_vm14 = vweird.f32 %v3228_v15 }
0x36b1   :  { %vm2704_vm1 = vmor %vm2702_vm15, %vm2703_vm14 }
0x36b2   :  { %v2698_v18 = vmul.f32 %v3228_v15, %v2697_v12 }
0x36b4   :  { %v2699_v43 = vmul.f32 0.5, %v2698_v18 }
0x36b6   :  { %v2700_v57 = vsub.f32 1.5, %v2699_v43 }
0x36b8   :  { %v2701_v42 = vmul.f32 %v3228_v15, %v2700_v57 }
0x36ba   :  { %v2705_v24 = vsel %vm2704_vm1, %v3228_v15, %v2701_v42 }
0x36bb   :  { %v2706_v9 = vmul.f32 %v2705_v24, %v2690_v60 }
0x36bd   :  { %v2707_v37 = vmul.f32 %v4415_v53, %v2706_v9 }
0x36bf   :  { %v2708_v26 = vadd.f32 %v4421_v32, %v2707_v37 }
0x36c1   :  { %v2712_v16 = vadd.f32 %v2711_v52, %v2708_v26 }
0x36c3   :  { %v2713_v29 = vmul.f32 0.125, %v2712_v16 }
0x36c5   :  { %v2714_v30 = vadd.f32 %v2713_v29, %v4394_v61 }
0x36c7   :  { %2715 = vst [vmem:[%s4499_s10] sm:$0xff] %v2714_v30  ;;  %v2716_v33 = vpack.c.bf16 %v2714_v30, %v2714_v30 }
0x36c9   :  { %2793 = vmatmul.bf16.vlgmr.msra.gmra.mxu2 %v2716_v33 }
0x374c   :  { %v2794_v31 = vpop.f32.mrf.mxu2 }
0x374d   :  { %v2795_v53 = vadd.f32 %v2972_v58, %v2794_v31 }
0x374f   :  { %2798 = vst [vmem:[%s4500_s9] sm:$0xff] %v2795_v53 }
0x3754   :  { %v2796_v32 = vpop.f32.mrf.mxu2 }

</bundles_post_ra>
